<compile_context>
chip_gen: v6e
topology: v6e:2x2x1
jax: 0.10.0
libtpu: 0.0.40
codegen_flags: <defaults>
</compile_context>

<pallas_src>
import functools

import jax
import jax.numpy as jnp
from jax.experimental import pallas as pl
from jax.experimental.pallas import tpu as pltpu


def _fusion_kernel(mm_dtype,
                   vis_ref, txt_ref,
                   wvp_ref, bvp_ref,
                   wqkv_ref, bqkv_ref,
                   bd_ref,
                   w1_ref, b1_ref, w2_ref, b2_ref,
                   gamma_ref, beta_ref,
                   out_ref):
    f32 = jnp.float32
    vis = vis_ref[...]                                   # (BM, Dv)  mm_dtype
    txt = txt_ref[...]                                   # (BM, H)   mm_dtype
    BM = vis.shape[0]
    H = txt.shape[1]

    def mm(x, w_ref):
        # matmul operands in mm_dtype (bf16 on the perf path), f32 accumulation
        return jnp.dot(x.astype(mm_dtype), w_ref[...],
                       preferred_element_type=f32)

    # visual_proj: (BM, Dv) -> (BM, H); bias add in f32.
    va = mm(vis, wvp_ref) + bvp_ref[...]

    # Fused QKV over the row-stacked 2-token sequence [visual ; text].
    seq = jnp.concatenate([va.astype(mm_dtype), txt.astype(mm_dtype)], axis=0)
    qkv = mm(seq, wqkv_ref) + bqkv_ref[...]               # (2BM, 3H) f32
    q = qkv[:, :H]
    k = qkv[:, H:2 * H]
    v = qkv[:, 2 * H:]
    # q/k go straight back into a matmul-feeding product -> keep in mm_dtype.
    qv, qt = q[:BM].astype(mm_dtype), q[BM:].astype(mm_dtype)
    kv, kt = k[:BM].astype(mm_dtype), k[BM:].astype(mm_dtype)
    vv, vt = v[:BM], v[BM:]                               # f32 for the prob mix

    # Per-head scores on the MXU with a block-diagonal (scale-folded) ones
    # matrix: each head's score ends up broadcast over its HD lanes, so no
    # (B, NH, HD) reshapes and no cross-lane reductions are needed.
    prod = jnp.concatenate([qv * kv, qv * kt, qt * kv, qt * kt], axis=0)
    s = jnp.dot(prod, bd_ref[...], preferred_element_type=f32)   # (4BM, H)
    s_vv, s_vt = s[:BM], s[BM:2 * BM]
    s_tv, s_tt = s[2 * BM:3 * BM], s[3 * BM:]

    # 2-way softmax via the sigmoid identity: p_a = 1/(1+exp(b-a)), p_b = 1-p_a.
    p_vv = 1.0 / (1.0 + jnp.exp(s_vt - s_vv))
    p_tv = 1.0 / (1.0 + jnp.exp(s_tt - s_tv))
    attn_v = p_vv * vv + (1.0 - p_vv) * vt                # (BM, H)
    attn_t = p_tv * vv + (1.0 - p_tv) * vt                # (BM, H)

    # `wo` is folded into w1 on the host, so the attention output feeds the
    # fusion MLP directly (single K=2H matmul).
    h1 = mm(jnp.concatenate([attn_v, attn_t], axis=-1), w1_ref) + b1_ref[...]
    h1 = jnp.maximum(h1, 0.0)                             # ReLU; Dropout = id
    h2 = mm(h1, w2_ref) + b2_ref[...]

    # LayerNorm (eps = 1e-5, matching nn.LayerNorm default), f32 throughout.
    mu = jnp.mean(h2, axis=-1, keepdims=True)
    var = jnp.mean((h2 - mu) ** 2, axis=-1, keepdims=True)
    out = (h2 - mu) * jax.lax.rsqrt(var + 1e-5) * gamma_ref[...] + beta_ref[...]
    out_ref[...] = out.astype(out_ref.dtype)


def _vmem_and_block_cap():
    """Generation-aware VMEM limit and max row-block size."""
    try:
        vmem_cap = pltpu.get_tpu_info().vmem_capacity_bytes
    except Exception:
        vmem_cap = 64 * 1024 * 1024                       # conservative default
    if vmem_cap >= 128 * 1024 * 1024:                     # v5e / v6e
        return 96 * 1024 * 1024, 512
    return 48 * 1024 * 1024, 256                          # v7x (64 MiB per TC)


def brand_fusion_pallas(visual, text, params, *, num_heads, block_b=None,
                        matmul_dtype=jnp.bfloat16, out_dtype=None):
    B, Dv = visual.shape
    H = text.shape[1]
    assert H % num_heads == 0
    HD = H // num_heads
    f32 = jnp.float32
    if out_dtype is None:
        out_dtype = f32 if matmul_dtype == jnp.float32 else jnp.bfloat16

    vmem_limit, block_cap = _vmem_and_block_cap()
    row_mult = 8 if matmul_dtype == jnp.float32 else 16   # bf16 packs 16 sublanes

    # Zero-pad the batch to a row-tile multiple instead of rejecting it.
    B_pad = max(row_mult, ((B + row_mult - 1) // row_mult) * row_mult)
    if B_pad != B:
        visual = jnp.pad(visual, ((0, B_pad - B), (0, 0)))
        text = jnp.pad(text, ((0, B_pad - B), (0, 0)))

    if block_b is None:
        # >= 2 grid steps whenever possible (v7x megacore), capped so f32
        # intermediates stay comfortably inside VMEM.
        target = min(block_cap, max(row_mult, B_pad // 2))
        block_b = row_mult
        for cand in range(row_mult, target + 1, row_mult):
            if B_pad % cand == 0:
                block_b = cand
    assert B_pad % block_b == 0 and block_b % row_mult == 0

    # ---- host-side weight preparation (all folds in f32, cast once) ----
    def wcast(x):
        return x.astype(matmul_dtype)

    wvp = wcast(params["wvp"])                                        # (Dv, H)
    w_qkv = wcast(jnp.concatenate(
        [params["wq"], params["wk"], params["wv"]], axis=1))          # (H, 3H)
    b_qkv = jnp.concatenate(
        [params["bq"], params["bk"], params["bv"]], axis=1).astype(f32)

    head_ids = jnp.arange(H) // HD
    scale = 1.0 / (HD ** 0.5)
    bd = wcast((head_ids[:, None] == head_ids[None, :]).astype(f32) * scale)

    # Fold the attention output projection into fusion-MLP layer 1.
    wo, bo = params["wo"].astype(f32), params["bo"].astype(f32)
    w1a, w1b = params["w1a"].astype(f32), params["w1b"].astype(f32)
    w1 = wcast(jnp.concatenate([wo @ w1a, wo @ w1b], axis=0))         # (2H, H)
    b1 = params["b1"].astype(f32) + bo @ w1a + bo @ w1b               # (1, H)

    w2 = wcast(params["w2"])                                          # (H, H)
    bvp = params["bvp"].astype(f32)
    b2 = params["b2"].astype(f32)
    gamma = params["gamma"].astype(f32)
    beta = params["beta"].astype(f32)

    weights = [wvp, bvp, w_qkv, b_qkv, bd, w1, b1, w2, b2, gamma, beta]

    # bf16 activations at the call boundary: halves input DMA bytes (perf path).
    vis_in = visual.astype(matmul_dtype)
    txt_in = text.astype(matmul_dtype)

    kernel = functools.partial(_fusion_kernel, matmul_dtype)

    def run(single_buffer_weights):
        def row_spec(cols):
            return pl.BlockSpec((block_b, cols), lambda i: (i, 0))

        def full_spec(arr):
            if single_buffer_weights:
                # Constant-index weights: double-buffering would only double
                # the resident VMEM, so keep a single buffer.
                return pl.BlockSpec(arr.shape, lambda i: (0,) * arr.ndim,
                                    pipeline_mode=pl.Buffered(1))
            return pl.BlockSpec(arr.shape, lambda i: (0,) * arr.ndim)

        grid_spec = pltpu.PrefetchScalarGridSpec(
            num_scalar_prefetch=0,
            grid=(B_pad // block_b,),
            in_specs=[row_spec(Dv), row_spec(H)] + [full_spec(w) for w in weights],
            out_specs=pl.BlockSpec((block_b, H), lambda i: (i, 0)),
        )
        return pl.pallas_call(
            kernel,
            out_shape=jax.ShapeDtypeStruct((B_pad, H), out_dtype),
            grid_spec=grid_spec,
            compiler_params=pltpu.CompilerParams(
                dimension_semantics=("parallel",),
                vmem_limit_bytes=vmem_limit,
            ),
        )(vis_in, txt_in, *weights)

    try:
        out = run(single_buffer_weights=True)
    except Exception:
        # TODO(synk): pl.Buffered(1) single-buffering rejected by this
        # jax/Mosaic version; fall back to default double-buffered weights.
        out = run(single_buffer_weights=False)

    return out[:B] if B_pad != B else out


def brand_fusion_reference(visual, text, p, *, num_heads):
    """Pure-JAX f32 reference mirroring the PyTorch forward."""
    B = visual.shape[0]
    H = text.shape[1]
    HD = H // num_heads
    va = visual @ p["wvp"] + p["bvp"]                      # visual_proj
    seq = jnp.stack([va, text], axis=1)                    # (B, 2, H)
    q = seq @ p["wq"] + p["bq"]
    k = seq @ p["wk"] + p["bk"]
    v = seq @ p["wv"] + p["bv"]
    qh = q.reshape(B, 2, num_heads, HD).transpose(0, 2, 1, 3)
    kh = k.reshape(B, 2, num_heads, HD).transpose(0, 2, 1, 3)
    vh = v.reshape(B, 2, num_heads, HD).transpose(0, 2, 1, 3)
    s = jnp.einsum("bhqd,bhkd->bhqk", qh, kh) / jnp.sqrt(HD)
    pr = jax.nn.softmax(s, axis=-1)
    o = jnp.einsum("bhqk,bhkd->bhqd", pr, vh).transpose(0, 2, 1, 3).reshape(B, 2, H)
    o = o @ p["wo"] + p["bo"]
    av, at = o[:, 0], o[:, 1]
    w1 = jnp.concatenate([p["w1a"], p["w1b"]], axis=0)
    h1 = jax.nn.relu(jnp.concatenate([av, at], axis=-1) @ w1 + p["b1"])
    h2 = h1 @ p["w2"] + p["b2"]
    mu = h2.mean(-1, keepdims=True)
    var = ((h2 - mu) ** 2).mean(-1, keepdims=True)
    return (h2 - mu) / jnp.sqrt(var + 1e-5) * p["gamma"] + p["beta"]


def init_params(key, hidden, visual_dim):
    ks = jax.random.split(key, 16)
    s = 0.05

    def w(k, shape):
        return jax.random.normal(k, shape, jnp.float32) * s

    return {
        "wvp": w(ks[0], (visual_dim, hidden)), "bvp": w(ks[1], (1, hidden)),
        "wq": w(ks[2], (hidden, hidden)), "bq": w(ks[3], (1, hidden)),
        "wk": w(ks[4], (hidden, hidden)), "bk": w(ks[5], (1, hidden)),
        "wv": w(ks[6], (hidden, hidden)), "bv": w(ks[7], (1, hidden)),
        "wo": w(ks[8], (hidden, hidden)), "bo": w(ks[9], (1, hidden)),
        "w1a": w(ks[10], (hidden, hidden)), "w1b": w(ks[11], (hidden, hidden)),
        "b1": w(ks[12], (1, hidden)),
        "w2": w(ks[13], (hidden, hidden)), "b2": w(ks[14], (1, hidden)),
        "gamma": jnp.ones((1, hidden), jnp.float32),
        "beta": jnp.zeros((1, hidden), jnp.float32),
    }


if __name__ == "__main__":
    # Small, module-consistent shapes: hidden_size=128, heads=4, visual_dim=256.
    B, HIDDEN, NUM_HEADS, VISUAL_DIM = 32, 128, 4, 256

    root = jax.random.PRNGKey(0)
    k_vis, k_txt, k_par = jax.random.split(root, 3)
    visual = jax.random.normal(k_vis, (B, VISUAL_DIM), jnp.float32)
    text = jax.random.normal(k_txt, (B, HIDDEN), jnp.float32)
    params = init_params(k_par, HIDDEN, VISUAL_DIM)

    ref = brand_fusion_reference(visual, text, params, num_heads=NUM_HEADS)

    # Strict structural check: f32 matmuls / f32 I/O.
    out_f32 = jax.block_until_ready(
        brand_fusion_pallas(visual, text, params, num_heads=NUM_HEADS,
                            matmul_dtype=jnp.float32))
    assert out_f32.shape == (B, HIDDEN)
    assert jnp.allclose(out_f32, ref, atol=2e-4, rtol=2e-4), \
        "f32 kernel mismatch vs pure-JAX reference"

    # Perf configuration: bf16 inputs / weights / output, f32 accumulation.
    out_bf16 = jax.block_until_ready(
        brand_fusion_pallas(visual, text, params, num_heads=NUM_HEADS,
                            matmul_dtype=jnp.bfloat16))
    assert out_bf16.shape == (B, HIDDEN)
    assert jnp.allclose(out_bf16.astype(jnp.float32), ref, atol=5e-2, rtol=5e-2), \
        "bf16 kernel mismatch vs pure-JAX reference"

    print("KERNEL_OK")
</pallas_src>

<mosaic_0001>
module attributes {stable_mosaic.version = 11 : i64} {
  func.func @_fusion_kernel(%arg0: i32, %arg1: memref<16x256xf32, #tpu.memory_space<vmem>>, %arg2: memref<16x128xf32, #tpu.memory_space<vmem>>, %arg3: memref<256x128xf32, #tpu.memory_space<vmem>>, %arg4: memref<1x128xf32, #tpu.memory_space<vmem>>, %arg5: memref<128x384xf32, #tpu.memory_space<vmem>>, %arg6: memref<1x384xf32, #tpu.memory_space<vmem>>, %arg7: memref<128x128xf32, #tpu.memory_space<vmem>>, %arg8: memref<256x128xf32, #tpu.memory_space<vmem>>, %arg9: memref<1x128xf32, #tpu.memory_space<vmem>>, %arg10: memref<128x128xf32, #tpu.memory_space<vmem>>, %arg11: memref<1x128xf32, #tpu.memory_space<vmem>>, %arg12: memref<1x128xf32, #tpu.memory_space<vmem>>, %arg13: memref<1x128xf32, #tpu.memory_space<vmem>>, %arg14: memref<16x128xf32, #tpu.memory_space<vmem>>) attributes {dimension_semantics = [#tpu.dimension_semantics<parallel>], iteration_bounds = array<i64: 2>, scalar_prefetch = 0 : i64, scratch_operands = 0 : i64, tpu.core_type = #tpu.core_type<tc>, window_params = [{transform_indices = @transform_0, window_bounds = array<i64: 16, 256>}, {transform_indices = @transform_1, window_bounds = array<i64: 16, 128>}, {pipeline_mode = #tpu.pipeline_mode<synchronous>, transform_indices = @transform_2, window_bounds = array<i64: 256, 128>}, {pipeline_mode = #tpu.pipeline_mode<synchronous>, transform_indices = @transform_3, window_bounds = array<i64: 1, 128>}, {pipeline_mode = #tpu.pipeline_mode<synchronous>, transform_indices = @transform_4, window_bounds = array<i64: 128, 384>}, {pipeline_mode = #tpu.pipeline_mode<synchronous>, transform_indices = @transform_5, window_bounds = array<i64: 1, 384>}, {pipeline_mode = #tpu.pipeline_mode<synchronous>, transform_indices = @transform_6, window_bounds = array<i64: 128, 128>}, {pipeline_mode = #tpu.pipeline_mode<synchronous>, transform_indices = @transform_7, window_bounds = array<i64: 256, 128>}, {pipeline_mode = #tpu.pipeline_mode<synchronous>, transform_indices = @transform_8, window_bounds = array<i64: 1, 128>}, {pipeline_mode = #tpu.pipeline_mode<synchronous>, transform_indices = @transform_9, window_bounds = array<i64: 128, 128>}, {pipeline_mode = #tpu.pipeline_mode<synchronous>, transform_indices = @transform_10, window_bounds = array<i64: 1, 128>}, {pipeline_mode = #tpu.pipeline_mode<synchronous>, transform_indices = @transform_11, window_bounds = array<i64: 1, 128>}, {pipeline_mode = #tpu.pipeline_mode<synchronous>, transform_indices = @transform_12, window_bounds = array<i64: 1, 128>}, {transform_indices = @transform_13, window_bounds = array<i64: 16, 128>}]} {
    %c0 = arith.constant 0 : index
    %c0_0 = arith.constant 0 : index
    %0 = vector.load %arg1[%c0, %c0_0] : memref<16x256xf32, #tpu.memory_space<vmem>>, vector<16x256xf32>
    %c0_1 = arith.constant 0 : index
    %c0_2 = arith.constant 0 : index
    %1 = vector.load %arg2[%c0_1, %c0_2] : memref<16x128xf32, #tpu.memory_space<vmem>>, vector<16x128xf32>
    %c0_3 = arith.constant 0 : index
    %c0_4 = arith.constant 0 : index
    %2 = vector.load %arg3[%c0_3, %c0_4] : memref<256x128xf32, #tpu.memory_space<vmem>>, vector<256x128xf32>
    %cst = arith.constant dense<0.000000e+00> : vector<16x128xf32>
    %3 = tpu.matmul %0, %2, %cst {dimension_numbers = #tpu.dot_dimension_numbers<[1], [0], [0], [1], [0, 0, 1, 1], [], []>} : vector<16x256xf32>, vector<256x128xf32>, vector<16x128xf32> -> vector<16x128xf32>
    %c0_5 = arith.constant 0 : index
    %c0_6 = arith.constant 0 : index
    %4 = vector.load %arg4[%c0_5, %c0_6] : memref<1x128xf32, #tpu.memory_space<vmem>>, vector<1x128xf32>
    %5 = vector.broadcast %4 : vector<1x128xf32> to vector<16x128xf32>
    %6 = arith.addf %3, %5 : vector<16x128xf32>
    %7 = tpu.concatenate %6, %1 in 0 : vector<16x128xf32>, vector<16x128xf32> -> vector<32x128xf32>
    %c0_7 = arith.constant 0 : index
    %c0_8 = arith.constant 0 : index
    %8 = vector.load %arg5[%c0_7, %c0_8] : memref<128x384xf32, #tpu.memory_space<vmem>>, vector<128x384xf32>
    %cst_9 = arith.constant dense<0.000000e+00> : vector<32x384xf32>
    %9 = tpu.matmul %7, %8, %cst_9 {dimension_numbers = #tpu.dot_dimension_numbers<[1], [0], [0], [1], [0, 0, 1, 1], [], []>} : vector<32x128xf32>, vector<128x384xf32>, vector<32x384xf32> -> vector<32x384xf32>
    %c0_10 = arith.constant 0 : index
    %c0_11 = arith.constant 0 : index
    %10 = vector.load %arg6[%c0_10, %c0_11] : memref<1x384xf32, #tpu.memory_space<vmem>>, vector<1x384xf32>
    %11 = vector.broadcast %10 : vector<1x384xf32> to vector<32x384xf32>
    %12 = arith.addf %9, %11 : vector<32x384xf32>
    %13 = vector.extract_strided_slice %12 {offsets = [0, 0], sizes = [32, 128], strides = [1, 1]} : vector<32x384xf32> to vector<32x128xf32>
    %14 = vector.extract_strided_slice %12 {offsets = [0, 128], sizes = [32, 128], strides = [1, 1]} : vector<32x384xf32> to vector<32x128xf32>
    %15 = vector.extract_strided_slice %12 {offsets = [0, 256], sizes = [32, 128], strides = [1, 1]} : vector<32x384xf32> to vector<32x128xf32>
    %16 = vector.extract_strided_slice %13 {offsets = [0, 0], sizes = [16, 128], strides = [1, 1]} : vector<32x128xf32> to vector<16x128xf32>
    %17 = vector.extract_strided_slice %13 {offsets = [16, 0], sizes = [16, 128], strides = [1, 1]} : vector<32x128xf32> to vector<16x128xf32>
    %18 = vector.extract_strided_slice %14 {offsets = [0, 0], sizes = [16, 128], strides = [1, 1]} : vector<32x128xf32> to vector<16x128xf32>
    %19 = vector.extract_strided_slice %14 {offsets = [16, 0], sizes = [16, 128], strides = [1, 1]} : vector<32x128xf32> to vector<16x128xf32>
    %20 = vector.extract_strided_slice %15 {offsets = [0, 0], sizes = [16, 128], strides = [1, 1]} : vector<32x128xf32> to vector<16x128xf32>
    %21 = vector.extract_strided_slice %15 {offsets = [16, 0], sizes = [16, 128], strides = [1, 1]} : vector<32x128xf32> to vector<16x128xf32>
    %22 = arith.mulf %16, %18 : vector<16x128xf32>
    %23 = arith.mulf %16, %19 : vector<16x128xf32>
    %24 = arith.mulf %17, %18 : vector<16x128xf32>
    %25 = arith.mulf %17, %19 : vector<16x128xf32>
    %26 = tpu.concatenate %22, %23, %24, %25 in 0 : vector<16x128xf32>, vector<16x128xf32>, vector<16x128xf32>, vector<16x128xf32> -> vector<64x128xf32>
    %c0_12 = arith.constant 0 : index
    %c0_13 = arith.constant 0 : index
    %27 = vector.load %arg7[%c0_12, %c0_13] : memref<128x128xf32, #tpu.memory_space<vmem>>, vector<128x128xf32>
    %cst_14 = arith.constant dense<0.000000e+00> : vector<64x128xf32>
    %28 = tpu.matmul %26, %27, %cst_14 {dimension_numbers = #tpu.dot_dimension_numbers<[1], [0], [0], [1], [0, 0, 1, 1], [], []>} : vector<64x128xf32>, vector<128x128xf32>, vector<64x128xf32> -> vector<64x128xf32>
    %29 = vector.extract_strided_slice %28 {offsets = [0, 0], sizes = [16, 128], strides = [1, 1]} : vector<64x128xf32> to vector<16x128xf32>
    %30 = vector.extract_strided_slice %28 {offsets = [16, 0], sizes = [16, 128], strides = [1, 1]} : vector<64x128xf32> to vector<16x128xf32>
    %31 = vector.extract_strided_slice %28 {offsets = [32, 0], sizes = [16, 128], strides = [1, 1]} : vector<64x128xf32> to vector<16x128xf32>
    %32 = vector.extract_strided_slice %28 {offsets = [48, 0], sizes = [16, 128], strides = [1, 1]} : vector<64x128xf32> to vector<16x128xf32>
    %33 = arith.subf %30, %29 : vector<16x128xf32>
    %34 = math.exp %33 : vector<16x128xf32>
    %cst_15 = arith.constant 1.000000e+00 : f32
    %35 = vector.broadcast %cst_15 : f32 to vector<16x128xf32>
    %36 = arith.addf %35, %34 : vector<16x128xf32>
    %cst_16 = arith.constant 1.000000e+00 : f32
    %37 = vector.broadcast %cst_16 : f32 to vector<16x128xf32>
    %38 = arith.divf %37, %36 : vector<16x128xf32>
    %39 = arith.subf %32, %31 : vector<16x128xf32>
    %40 = math.exp %39 : vector<16x128xf32>
    %cst_17 = arith.constant 1.000000e+00 : f32
    %41 = vector.broadcast %cst_17 : f32 to vector<16x128xf32>
    %42 = arith.addf %41, %40 : vector<16x128xf32>
    %cst_18 = arith.constant 1.000000e+00 : f32
    %43 = vector.broadcast %cst_18 : f32 to vector<16x128xf32>
    %44 = arith.divf %43, %42 : vector<16x128xf32>
    %45 = arith.mulf %38, %20 : vector<16x128xf32>
    %cst_19 = arith.constant 1.000000e+00 : f32
    %46 = vector.broadcast %cst_19 : f32 to vector<16x128xf32>
    %47 = arith.subf %46, %38 : vector<16x128xf32>
    %48 = arith.mulf %47, %21 : vector<16x128xf32>
    %49 = arith.addf %45, %48 : vector<16x128xf32>
    %50 = arith.mulf %44, %20 : vector<16x128xf32>
    %cst_20 = arith.constant 1.000000e+00 : f32
    %51 = vector.broadcast %cst_20 : f32 to vector<16x128xf32>
    %52 = arith.subf %51, %44 : vector<16x128xf32>
    %53 = arith.mulf %52, %21 : vector<16x128xf32>
    %54 = arith.addf %50, %53 : vector<16x128xf32>
    %55 = tpu.concatenate %49, %54 in 1 : vector<16x128xf32>, vector<16x128xf32> -> vector<16x256xf32>
    %c0_21 = arith.constant 0 : index
    %c0_22 = arith.constant 0 : index
    %56 = vector.load %arg8[%c0_21, %c0_22] : memref<256x128xf32, #tpu.memory_space<vmem>>, vector<256x128xf32>
    %cst_23 = arith.constant dense<0.000000e+00> : vector<16x128xf32>
    %57 = tpu.matmul %55, %56, %cst_23 {dimension_numbers = #tpu.dot_dimension_numbers<[1], [0], [0], [1], [0, 0, 1, 1], [], []>} : vector<16x256xf32>, vector<256x128xf32>, vector<16x128xf32> -> vector<16x128xf32>
    %c0_24 = arith.constant 0 : index
    %c0_25 = arith.constant 0 : index
    %58 = vector.load %arg9[%c0_24, %c0_25] : memref<1x128xf32, #tpu.memory_space<vmem>>, vector<1x128xf32>
    %59 = vector.broadcast %58 : vector<1x128xf32> to vector<16x128xf32>
    %60 = arith.addf %57, %59 : vector<16x128xf32>
    %cst_26 = arith.constant 0.000000e+00 : f32
    %61 = vector.broadcast %cst_26 : f32 to vector<16x128xf32>
    %62 = arith.maximumf %60, %61 : vector<16x128xf32>
    %c0_27 = arith.constant 0 : index
    %c0_28 = arith.constant 0 : index
    %63 = vector.load %arg10[%c0_27, %c0_28] : memref<128x128xf32, #tpu.memory_space<vmem>>, vector<128x128xf32>
    %cst_29 = arith.constant dense<0.000000e+00> : vector<16x128xf32>
    %64 = tpu.matmul %62, %63, %cst_29 {dimension_numbers = #tpu.dot_dimension_numbers<[1], [0], [0], [1], [0, 0, 1, 1], [], []>} : vector<16x128xf32>, vector<128x128xf32>, vector<16x128xf32> -> vector<16x128xf32>
    %c0_30 = arith.constant 0 : index
    %c0_31 = arith.constant 0 : index
    %65 = vector.load %arg11[%c0_30, %c0_31] : memref<1x128xf32, #tpu.memory_space<vmem>>, vector<1x128xf32>
    %66 = vector.broadcast %65 : vector<1x128xf32> to vector<16x128xf32>
    %67 = arith.addf %64, %66 : vector<16x128xf32>
    %cst_32 = arith.constant dense<0.000000e+00> : vector<16xf32>
    %68 = vector.multi_reduction <add>, %67, %cst_32 [1] : vector<16x128xf32> to vector<16xf32>
    %69 = vector.shape_cast %68 : vector<16xf32> to vector<16x1xf32>
    %cst_33 = arith.constant 1.280000e+02 : f32
    %70 = vector.broadcast %cst_33 : f32 to vector<16x1xf32>
    %71 = arith.divf %69, %70 : vector<16x1xf32>
    %72 = vector.broadcast %71 : vector<16x1xf32> to vector<16x128xf32>
    %73 = arith.subf %67, %72 : vector<16x128xf32>
    %74 = arith.mulf %73, %73 : vector<16x128xf32>
    %cst_34 = arith.constant dense<0.000000e+00> : vector<16xf32>
    %75 = vector.multi_reduction <add>, %74, %cst_34 [1] : vector<16x128xf32> to vector<16xf32>
    %76 = vector.shape_cast %75 : vector<16xf32> to vector<16x1xf32>
    %cst_35 = arith.constant 1.280000e+02 : f32
    %77 = vector.broadcast %cst_35 : f32 to vector<16x1xf32>
    %78 = arith.divf %76, %77 : vector<16x1xf32>
    %79 = vector.broadcast %71 : vector<16x1xf32> to vector<16x128xf32>
    %80 = arith.subf %67, %79 : vector<16x128xf32>
    %cst_36 = arith.constant 9.99999974E-6 : f32
    %81 = vector.broadcast %cst_36 : f32 to vector<16x1xf32>
    %82 = arith.addf %78, %81 : vector<16x1xf32>
    %83 = math.rsqrt %82 : vector<16x1xf32>
    %84 = vector.broadcast %83 : vector<16x1xf32> to vector<16x128xf32>
    %85 = arith.mulf %80, %84 : vector<16x128xf32>
    %c0_37 = arith.constant 0 : index
    %c0_38 = arith.constant 0 : index
    %86 = vector.load %arg12[%c0_37, %c0_38] : memref<1x128xf32, #tpu.memory_space<vmem>>, vector<1x128xf32>
    %87 = vector.broadcast %86 : vector<1x128xf32> to vector<16x128xf32>
    %88 = arith.mulf %85, %87 : vector<16x128xf32>
    %c0_39 = arith.constant 0 : index
    %c0_40 = arith.constant 0 : index
    %89 = vector.load %arg13[%c0_39, %c0_40] : memref<1x128xf32, #tpu.memory_space<vmem>>, vector<1x128xf32>
    %90 = vector.broadcast %89 : vector<1x128xf32> to vector<16x128xf32>
    %91 = arith.addf %88, %90 : vector<16x128xf32>
    %c0_41 = arith.constant 0 : index
    %c0_42 = arith.constant 0 : index
    %92 = vector.load %arg14[%c0_41, %c0_42] : memref<16x128xf32, #tpu.memory_space<vmem>>, vector<16x128xf32>
    tpu.vector_store %arg14[%c0_41, %c0_42], %91 {strides = array<i32>} : memref<16x128xf32, #tpu.memory_space<vmem>>, vector<16x128xf32>,
    return
  }
  func.func @transform_0(%arg0: i32) -> (i32, i32) {
    %c0_i32 = arith.constant 0 : i32
    %c0_i32_0 = arith.constant 0 : i32
    return %arg0, %c0_i32 : i32, i32
  }
  func.func @transform_1(%arg0: i32) -> (i32, i32) {
    %c0_i32 = arith.constant 0 : i32
    %c0_i32_0 = arith.constant 0 : i32
    return %arg0, %c0_i32 : i32, i32
  }
  func.func @transform_2(%arg0: i32) -> (i32, i32) {
    %c0_i32 = arith.constant 0 : i32
    %c0_i32_0 = arith.constant 0 : i32
    %c0_i32_1 = arith.constant 0 : i32
    return %c0_i32, %c0_i32_0 : i32, i32
  }
  func.func @transform_3(%arg0: i32) -> (i32, i32) {
    %c0_i32 = arith.constant 0 : i32
    %c0_i32_0 = arith.constant 0 : i32
    %c0_i32_1 = arith.constant 0 : i32
    return %c0_i32, %c0_i32_0 : i32, i32
  }
  func.func @transform_4(%arg0: i32) -> (i32, i32) {
    %c0_i32 = arith.constant 0 : i32
    %c0_i32_0 = arith.constant 0 : i32
    %c0_i32_1 = arith.constant 0 : i32
    return %c0_i32, %c0_i32_0 : i32, i32
  }
  func.func @transform_5(%arg0: i32) -> (i32, i32) {
    %c0_i32 = arith.constant 0 : i32
    %c0_i32_0 = arith.constant 0 : i32
    %c0_i32_1 = arith.constant 0 : i32
    return %c0_i32, %c0_i32_0 : i32, i32
  }
  func.func @transform_6(%arg0: i32) -> (i32, i32) {
    %c0_i32 = arith.constant 0 : i32
    %c0_i32_0 = arith.constant 0 : i32
    %c0_i32_1 = arith.constant 0 : i32
    return %c0_i32, %c0_i32_0 : i32, i32
  }
  func.func @transform_7(%arg0: i32) -> (i32, i32) {
    %c0_i32 = arith.constant 0 : i32
    %c0_i32_0 = arith.constant 0 : i32
    %c0_i32_1 = arith.constant 0 : i32
    return %c0_i32, %c0_i32_0 : i32, i32
  }
  func.func @transform_8(%arg0: i32) -> (i32, i32) {
    %c0_i32 = arith.constant 0 : i32
    %c0_i32_0 = arith.constant 0 : i32
    %c0_i32_1 = arith.constant 0 : i32
    return %c0_i32, %c0_i32_0 : i32, i32
  }
  func.func @transform_9(%arg0: i32) -> (i32, i32) {
    %c0_i32 = arith.constant 0 : i32
    %c0_i32_0 = arith.constant 0 : i32
    %c0_i32_1 = arith.constant 0 : i32
    return %c0_i32, %c0_i32_0 : i32, i32
  }
  func.func @transform_10(%arg0: i32) -> (i32, i32) {
    %c0_i32 = arith.constant 0 : i32
    %c0_i32_0 = arith.constant 0 : i32
    %c0_i32_1 = arith.constant 0 : i32
    return %c0_i32, %c0_i32_0 : i32, i32
  }
  func.func @transform_11(%arg0: i32) -> (i32, i32) {
    %c0_i32 = arith.constant 0 : i32
    %c0_i32_0 = arith.constant 0 : i32
    %c0_i32_1 = arith.constant 0 : i32
    return %c0_i32, %c0_i32_0 : i32, i32
  }
  func.func @transform_12(%arg0: i32) -> (i32, i32) {
    %c0_i32 = arith.constant 0 : i32
    %c0_i32_0 = arith.constant 0 : i32
    %c0_i32_1 = arith.constant 0 : i32
    return %c0_i32, %c0_i32_0 : i32, i32
  }
  func.func @transform_13(%arg0: i32) -> (i32, i32) {
    %c0_i32 = arith.constant 0 : i32
    %c0_i32_0 = arith.constant 0 : i32
    return %arg0, %c0_i32 : i32, i32
  }
}

module attributes {stable_mosaic.version = 11 : i64} {
  func.func @_fusion_kernel(%arg0: i32, %arg1: memref<16x256xf32, #tpu.memory_space<vmem>>, %arg2: memref<16x128xf32, #tpu.memory_space<vmem>>, %arg3: memref<256x128xf32, #tpu.memory_space<vmem>>, %arg4: memref<1x128xf32, #tpu.memory_space<vmem>>, %arg5: memref<128x384xf32, #tpu.memory_space<vmem>>, %arg6: memref<1x384xf32, #tpu.memory_space<vmem>>, %arg7: memref<128x128xf32, #tpu.memory_space<vmem>>, %arg8: memref<256x128xf32, #tpu.memory_space<vmem>>, %arg9: memref<1x128xf32, #tpu.memory_space<vmem>>, %arg10: memref<128x128xf32, #tpu.memory_space<vmem>>, %arg11: memref<1x128xf32, #tpu.memory_space<vmem>>, %arg12: memref<1x128xf32, #tpu.memory_space<vmem>>, %arg13: memref<1x128xf32, #tpu.memory_space<vmem>>, %arg14: memref<16x128xf32, #tpu.memory_space<vmem>>) attributes {dimension_semantics = [#tpu.dimension_semantics<parallel>], iteration_bounds = array<i64: 2>, scalar_prefetch = 0 : i64, scratch_operands = 0 : i64, tpu.core_type = #tpu.core_type<tc>, window_params = [{transform_indices = @transform_0, window_bounds = array<i64: 16, 256>}, {transform_indices = @transform_1, window_bounds = array<i64: 16, 128>}, {pipeline_mode = #tpu.pipeline_mode<synchronous>, transform_indices = @transform_2, window_bounds = array<i64: 256, 128>}, {pipeline_mode = #tpu.pipeline_mode<synchronous>, transform_indices = @transform_3, window_bounds = array<i64: 1, 128>}, {pipeline_mode = #tpu.pipeline_mode<synchronous>, transform_indices = @transform_4, window_bounds = array<i64: 128, 384>}, {pipeline_mode = #tpu.pipeline_mode<synchronous>, transform_indices = @transform_5, window_bounds = array<i64: 1, 384>}, {pipeline_mode = #tpu.pipeline_mode<synchronous>, transform_indices = @transform_6, window_bounds = array<i64: 128, 128>}, {pipeline_mode = #tpu.pipeline_mode<synchronous>, transform_indices = @transform_7, window_bounds = array<i64: 256, 128>}, {pipeline_mode = #tpu.pipeline_mode<synchronous>, transform_indices = @transform_8, window_bounds = array<i64: 1, 128>}, {pipeline_mode = #tpu.pipeline_mode<synchronous>, transform_indices = @transform_9, window_bounds = array<i64: 128, 128>}, {pipeline_mode = #tpu.pipeline_mode<synchronous>, transform_indices = @transform_10, window_bounds = array<i64: 1, 128>}, {pipeline_mode = #tpu.pipeline_mode<synchronous>, transform_indices = @transform_11, window_bounds = array<i64: 1, 128>}, {pipeline_mode = #tpu.pipeline_mode<synchronous>, transform_indices = @transform_12, window_bounds = array<i64: 1, 128>}, {transform_indices = @transform_13, window_bounds = array<i64: 16, 128>}]} {
    %c0 = arith.constant 0 : index
    %c0_0 = arith.constant 0 : index
    %0 = vector.load %arg1[%c0, %c0_0] : memref<16x256xf32, #tpu.memory_space<vmem>>, vector<16x256xf32>
    %c0_1 = arith.constant 0 : index
    %c0_2 = arith.constant 0 : index
    %1 = vector.load %arg2[%c0_1, %c0_2] : memref<16x128xf32, #tpu.memory_space<vmem>>, vector<16x128xf32>
    %c0_3 = arith.constant 0 : index
    %c0_4 = arith.constant 0 : index
    %2 = vector.load %arg3[%c0_3, %c0_4] : memref<256x128xf32, #tpu.memory_space<vmem>>, vector<256x128xf32>
    %cst = arith.constant dense<0.000000e+00> : vector<16x128xf32>
    %3 = tpu.matmul %0, %2, %cst {dimension_numbers = #tpu.dot_dimension_numbers<[1], [0], [0], [1], [0, 0, 1, 1], [], []>} : vector<16x256xf32>, vector<256x128xf32>, vector<16x128xf32> -> vector<16x128xf32>
    %c0_5 = arith.constant 0 : index
    %c0_6 = arith.constant 0 : index
    %4 = vector.load %arg4[%c0_5, %c0_6] : memref<1x128xf32, #tpu.memory_space<vmem>>, vector<1x128xf32>
    %5 = vector.broadcast %4 : vector<1x128xf32> to vector<16x128xf32>
    %6 = arith.addf %3, %5 : vector<16x128xf32>
    %7 = tpu.concatenate %6, %1 in 0 : vector<16x128xf32>, vector<16x128xf32> -> vector<32x128xf32>
    %c0_7 = arith.constant 0 : index
    %c0_8 = arith.constant 0 : index
    %8 = vector.load %arg5[%c0_7, %c0_8] : memref<128x384xf32, #tpu.memory_space<vmem>>, vector<128x384xf32>
    %cst_9 = arith.constant dense<0.000000e+00> : vector<32x384xf32>
    %9 = tpu.matmul %7, %8, %cst_9 {dimension_numbers = #tpu.dot_dimension_numbers<[1], [0], [0], [1], [0, 0, 1, 1], [], []>} : vector<32x128xf32>, vector<128x384xf32>, vector<32x384xf32> -> vector<32x384xf32>
    %c0_10 = arith.constant 0 : index
    %c0_11 = arith.constant 0 : index
    %10 = vector.load %arg6[%c0_10, %c0_11] : memref<1x384xf32, #tpu.memory_space<vmem>>, vector<1x384xf32>
    %11 = vector.broadcast %10 : vector<1x384xf32> to vector<32x384xf32>
    %12 = arith.addf %9, %11 : vector<32x384xf32>
    %13 = vector.extract_strided_slice %12 {offsets = [0, 0], sizes = [32, 128], strides = [1, 1]} : vector<32x384xf32> to vector<32x128xf32>
    %14 = vector.extract_strided_slice %12 {offsets = [0, 128], sizes = [32, 128], strides = [1, 1]} : vector<32x384xf32> to vector<32x128xf32>
    %15 = vector.extract_strided_slice %12 {offsets = [0, 256], sizes = [32, 128], strides = [1, 1]} : vector<32x384xf32> to vector<32x128xf32>
    %16 = vector.extract_strided_slice %13 {offsets = [0, 0], sizes = [16, 128], strides = [1, 1]} : vector<32x128xf32> to vector<16x128xf32>
    %17 = vector.extract_strided_slice %13 {offsets = [16, 0], sizes = [16, 128], strides = [1, 1]} : vector<32x128xf32> to vector<16x128xf32>
    %18 = vector.extract_strided_slice %14 {offsets = [0, 0], sizes = [16, 128], strides = [1, 1]} : vector<32x128xf32> to vector<16x128xf32>
    %19 = vector.extract_strided_slice %14 {offsets = [16, 0], sizes = [16, 128], strides = [1, 1]} : vector<32x128xf32> to vector<16x128xf32>
    %20 = vector.extract_strided_slice %15 {offsets = [0, 0], sizes = [16, 128], strides = [1, 1]} : vector<32x128xf32> to vector<16x128xf32>
    %21 = vector.extract_strided_slice %15 {offsets = [16, 0], sizes = [16, 128], strides = [1, 1]} : vector<32x128xf32> to vector<16x128xf32>
    %22 = arith.mulf %16, %18 : vector<16x128xf32>
    %23 = arith.mulf %16, %19 : vector<16x128xf32>
    %24 = arith.mulf %17, %18 : vector<16x128xf32>
    %25 = arith.mulf %17, %19 : vector<16x128xf32>
    %26 = tpu.concatenate %22, %23, %24, %25 in 0 : vector<16x128xf32>, vector<16x128xf32>, vector<16x128xf32>, vector<16x128xf32> -> vector<64x128xf32>
    %c0_12 = arith.constant 0 : index
    %c0_13 = arith.constant 0 : index
    %27 = vector.load %arg7[%c0_12, %c0_13] : memref<128x128xf32, #tpu.memory_space<vmem>>, vector<128x128xf32>
    %cst_14 = arith.constant dense<0.000000e+00> : vector<64x128xf32>
    %28 = tpu.matmul %26, %27, %cst_14 {dimension_numbers = #tpu.dot_dimension_numbers<[1], [0], [0], [1], [0, 0, 1, 1], [], []>} : vector<64x128xf32>, vector<128x128xf32>, vector<64x128xf32> -> vector<64x128xf32>
    %29 = vector.extract_strided_slice %28 {offsets = [0, 0], sizes = [16, 128], strides = [1, 1]} : vector<64x128xf32> to vector<16x128xf32>
    %30 = vector.extract_strided_slice %28 {offsets = [16, 0], sizes = [16, 128], strides = [1, 1]} : vector<64x128xf32> to vector<16x128xf32>
    %31 = vector.extract_strided_slice %28 {offsets = [32, 0], sizes = [16, 128], strides = [1, 1]} : vector<64x128xf32> to vector<16x128xf32>
    %32 = vector.extract_strided_slice %28 {offsets = [48, 0], sizes = [16, 128], strides = [1, 1]} : vector<64x128xf32> to vector<16x128xf32>
    %33 = arith.subf %30, %29 : vector<16x128xf32>
    %34 = math.exp %33 : vector<16x128xf32>
    %cst_15 = arith.constant 1.000000e+00 : f32
    %35 = vector.broadcast %cst_15 : f32 to vector<16x128xf32>
    %36 = arith.addf %35, %34 : vector<16x128xf32>
    %cst_16 = arith.constant 1.000000e+00 : f32
    %37 = vector.broadcast %cst_16 : f32 to vector<16x128xf32>
    %38 = arith.divf %37, %36 : vector<16x128xf32>
    %39 = arith.subf %32, %31 : vector<16x128xf32>
    %40 = math.exp %39 : vector<16x128xf32>
    %cst_17 = arith.constant 1.000000e+00 : f32
    %41 = vector.broadcast %cst_17 : f32 to vector<16x128xf32>
    %42 = arith.addf %41, %40 : vector<16x128xf32>
    %cst_18 = arith.constant 1.000000e+00 : f32
    %43 = vector.broadcast %cst_18 : f32 to vector<16x128xf32>
    %44 = arith.divf %43, %42 : vector<16x128xf32>
    %45 = arith.mulf %38, %20 : vector<16x128xf32>
    %cst_19 = arith.constant 1.000000e+00 : f32
    %46 = vector.broadcast %cst_19 : f32 to vector<16x128xf32>
    %47 = arith.subf %46, %38 : vector<16x128xf32>
    %48 = arith.mulf %47, %21 : vector<16x128xf32>
    %49 = arith.addf %45, %48 : vector<16x128xf32>
    %50 = arith.mulf %44, %20 : vector<16x128xf32>
    %cst_20 = arith.constant 1.000000e+00 : f32
    %51 = vector.broadcast %cst_20 : f32 to vector<16x128xf32>
    %52 = arith.subf %51, %44 : vector<16x128xf32>
    %53 = arith.mulf %52, %21 : vector<16x128xf32>
    %54 = arith.addf %50, %53 : vector<16x128xf32>
    %55 = tpu.concatenate %49, %54 in 1 : vector<16x128xf32>, vector<16x128xf32> -> vector<16x256xf32>
    %c0_21 = arith.constant 0 : index
    %c0_22 = arith.constant 0 : index
    %56 = vector.load %arg8[%c0_21, %c0_22] : memref<256x128xf32, #tpu.memory_space<vmem>>, vector<256x128xf32>
    %cst_23 = arith.constant dense<0.000000e+00> : vector<16x128xf32>
    %57 = tpu.matmul %55, %56, %cst_23 {dimension_numbers = #tpu.dot_dimension_numbers<[1], [0], [0], [1], [0, 0, 1, 1], [], []>} : vector<16x256xf32>, vector<256x128xf32>, vector<16x128xf32> -> vector<16x128xf32>
    %c0_24 = arith.constant 0 : index
    %c0_25 = arith.constant 0 : index
    %58 = vector.load %arg9[%c0_24, %c0_25] : memref<1x128xf32, #tpu.memory_space<vmem>>, vector<1x128xf32>
    %59 = vector.broadcast %58 : vector<1x128xf32> to vector<16x128xf32>
    %60 = arith.addf %57, %59 : vector<16x128xf32>
    %cst_26 = arith.constant 0.000000e+00 : f32
    %61 = vector.broadcast %cst_26 : f32 to vector<16x128xf32>
    %62 = arith.maximumf %60, %61 : vector<16x128xf32>
    %c0_27 = arith.constant 0 : index
    %c0_28 = arith.constant 0 : index
    %63 = vector.load %arg10[%c0_27, %c0_28] : memref<128x128xf32, #tpu.memory_space<vmem>>, vector<128x128xf32>
    %cst_29 = arith.constant dense<0.000000e+00> : vector<16x128xf32>
    %64 = tpu.matmul %62, %63, %cst_29 {dimension_numbers = #tpu.dot_dimension_numbers<[1], [0], [0], [1], [0, 0, 1, 1], [], []>} : vector<16x128xf32>, vector<128x128xf32>, vector<16x128xf32> -> vector<16x128xf32>
    %c0_30 = arith.constant 0 : index
    %c0_31 = arith.constant 0 : index
    %65 = vector.load %arg11[%c0_30, %c0_31] : memref<1x128xf32, #tpu.memory_space<vmem>>, vector<1x128xf32>
    %66 = vector.broadcast %65 : vector<1x128xf32> to vector<16x128xf32>
    %67 = arith.addf %64, %66 : vector<16x128xf32>
    %cst_32 = arith.constant dense<0.000000e+00> : vector<16xf32>
    %68 = vector.multi_reduction <add>, %67, %cst_32 [1] : vector<16x128xf32> to vector<16xf32>
    %69 = vector.shape_cast %68 : vector<16xf32> to vector<16x1xf32>
    %cst_33 = arith.constant 1.280000e+02 : f32
    %70 = vector.broadcast %cst_33 : f32 to vector<16x1xf32>
    %71 = arith.divf %69, %70 : vector<16x1xf32>
    %72 = vector.broadcast %71 : vector<16x1xf32> to vector<16x128xf32>
    %73 = arith.subf %67, %72 : vector<16x128xf32>
    %74 = arith.mulf %73, %73 : vector<16x128xf32>
    %cst_34 = arith.constant dense<0.000000e+00> : vector<16xf32>
    %75 = vector.multi_reduction <add>, %74, %cst_34 [1] : vector<16x128xf32> to vector<16xf32>
    %76 = vector.shape_cast %75 : vector<16xf32> to vector<16x1xf32>
    %cst_35 = arith.constant 1.280000e+02 : f32
    %77 = vector.broadcast %cst_35 : f32 to vector<16x1xf32>
    %78 = arith.divf %76, %77 : vector<16x1xf32>
    %79 = vector.broadcast %71 : vector<16x1xf32> to vector<16x128xf32>
    %80 = arith.subf %67, %79 : vector<16x128xf32>
    %cst_36 = arith.constant 9.99999974E-6 : f32
    %81 = vector.broadcast %cst_36 : f32 to vector<16x1xf32>
    %82 = arith.addf %78, %81 : vector<16x1xf32>
    %83 = math.rsqrt %82 : vector<16x1xf32>
    %84 = vector.broadcast %83 : vector<16x1xf32> to vector<16x128xf32>
    %85 = arith.mulf %80, %84 : vector<16x128xf32>
    %c0_37 = arith.constant 0 : index
    %c0_38 = arith.constant 0 : index
    %86 = vector.load %arg12[%c0_37, %c0_38] : memref<1x128xf32, #tpu.memory_space<vmem>>, vector<1x128xf32>
    %87 = vector.broadcast %86 : vector<1x128xf32> to vector<16x128xf32>
    %88 = arith.mulf %85, %87 : vector<16x128xf32>
    %c0_39 = arith.constant 0 : index
    %c0_40 = arith.constant 0 : index
    %89 = vector.load %arg13[%c0_39, %c0_40] : memref<1x128xf32, #tpu.memory_space<vmem>>, vector<1x128xf32>
    %90 = vector.broadcast %89 : vector<1x128xf32> to vector<16x128xf32>
    %91 = arith.addf %88, %90 : vector<16x128xf32>
    %c0_41 = arith.constant 0 : index
    %c0_42 = arith.constant 0 : index
    %92 = vector.load %arg14[%c0_41, %c0_42] : memref<16x128xf32, #tpu.memory_space<vmem>>, vector<16x128xf32>
    tpu.vector_store %arg14[%c0_41, %c0_42], %91 {strides = array<i32>} : memref<16x128xf32, #tpu.memory_space<vmem>>, vector<16x128xf32>,
    return
  }
  func.func @transform_0(%arg0: i32) -> (i32, i32) {
    %c0_i32 = arith.constant 0 : i32
    %c0_i32_0 = arith.constant 0 : i32
    return %arg0, %c0_i32 : i32, i32
  }
  func.func @transform_1(%arg0: i32) -> (i32, i32) {
    %c0_i32 = arith.constant 0 : i32
    %c0_i32_0 = arith.constant 0 : i32
    return %arg0, %c0_i32 : i32, i32
  }
  func.func @transform_2(%arg0: i32) -> (i32, i32) {
    %c0_i32 = arith.constant 0 : i32
    %c0_i32_0 = arith.constant 0 : i32
    %c0_i32_1 = arith.constant 0 : i32
    return %c0_i32, %c0_i32_0 : i32, i32
  }
  func.func @transform_3(%arg0: i32) -> (i32, i32) {
    %c0_i32 = arith.constant 0 : i32
    %c0_i32_0 = arith.constant 0 : i32
    %c0_i32_1 = arith.constant 0 : i32
    return %c0_i32, %c0_i32_0 : i32, i32
  }
  func.func @transform_4(%arg0: i32) -> (i32, i32) {
    %c0_i32 = arith.constant 0 : i32
    %c0_i32_0 = arith.constant 0 : i32
    %c0_i32_1 = arith.constant 0 : i32
    return %c0_i32, %c0_i32_0 : i32, i32
  }
  func.func @transform_5(%arg0: i32) -> (i32, i32) {
    %c0_i32 = arith.constant 0 : i32
    %c0_i32_0 = arith.constant 0 : i32
    %c0_i32_1 = arith.constant 0 : i32
    return %c0_i32, %c0_i32_0 : i32, i32
  }
  func.func @transform_6(%arg0: i32) -> (i32, i32) {
    %c0_i32 = arith.constant 0 : i32
    %c0_i32_0 = arith.constant 0 : i32
    %c0_i32_1 = arith.constant 0 : i32
    return %c0_i32, %c0_i32_0 : i32, i32
  }
  func.func @transform_7(%arg0: i32) -> (i32, i32) {
    %c0_i32 = arith.constant 0 : i32
    %c0_i32_0 = arith.constant 0 : i32
    %c0_i32_1 = arith.constant 0 : i32
    return %c0_i32, %c0_i32_0 : i32, i32
  }
  func.func @transform_8(%arg0: i32) -> (i32, i32) {
    %c0_i32 = arith.constant 0 : i32
    %c0_i32_0 = arith.constant 0 : i32
    %c0_i32_1 = arith.constant 0 : i32
    return %c0_i32, %c0_i32_0 : i32, i32
  }
  func.func @transform_9(%arg0: i32) -> (i32, i32) {
    %c0_i32 = arith.constant 0 : i32
    %c0_i32_0 = arith.constant 0 : i32
    %c0_i32_1 = arith.constant 0 : i32
    return %c0_i32, %c0_i32_0 : i32, i32
  }
  func.func @transform_10(%arg0: i32) -> (i32, i32) {
    %c0_i32 = arith.constant 0 : i32
    %c0_i32_0 = arith.constant 0 : i32
    %c0_i32_1 = arith.constant 0 : i32
    return %c0_i32, %c0_i32_0 : i32, i32
  }
  func.func @transform_11(%arg0: i32) -> (i32, i32) {
    %c0_i32 = arith.constant 0 : i32
    %c0_i32_0 = arith.constant 0 : i32
    %c0_i32_1 = arith.constant 0 : i32
    return %c0_i32, %c0_i32_0 : i32, i32
  }
  func.func @transform_12(%arg0: i32) -> (i32, i32) {
    %c0_i32 = arith.constant 0 : i32
    %c0_i32_0 = arith.constant 0 : i32
    %c0_i32_1 = arith.constant 0 : i32
    return %c0_i32, %c0_i32_0 : i32, i32
  }
  func.func @transform_13(%arg0: i32) -> (i32, i32) {
    %c0_i32 = arith.constant 0 : i32
    %c0_i32_0 = arith.constant 0 : i32
    return %arg0, %c0_i32 : i32, i32
  }
}

</mosaic_0001>

<bundles_post_ra>
// kernel: tpu_custom_call.1
= control target key start
LH: loop header
LB: loop body
LE: loop exit
PB: predicated region body
PF: predicated region fallthrough
CT: control target
= control target key end

     0   :  { %s2627_s0 = inlined_call_operand.hbm [shape: f32[32,256], index: 0, kind: input, shape index: {}]   ;;  %s2628_s1 = inlined_call_operand.hbm [shape: f32[32,128], index: 1, kind: input, shape index: {}]   ;;  %s2629_s2 = inlined_call_operand.hbm [shape: f32[256,128], index: 2, kind: input, shape index: {}]   ;;  %s2630_s3 = inlined_call_operand.vmem [shape: f32[1,128], index: 3, kind: input, shape index: {}]   ;;  %s2631_s4 = inlined_call_operand.hbm [shape: f32[128,384], index: 4, kind: input, shape index: {}]   ;;  %s2632_s5 = inlined_call_operand.vmem [shape: f32[1,384], index: 5, kind: input, shape index: {}]   ;;  %s2633_s6 = inlined_call_operand.hbm [shape: f32[128,128], index: 6, kind: input, shape index: {}]   ;;  %s2634_s7 = inlined_call_operand.hbm [shape: f32[256,128], index: 7, kind: input, shape index: {}]   ;;  %s2635_s8 = inlined_call_operand.vmem [shape: f32[1,128], index: 8, kind: input, shape index: {}]   ;;  %s2636_s9 = inlined_call_operand.hbm [shape: f32[128,128], index: 9, kind: input, shape index: {}]   ;;  %s2637_s10 = inlined_call_operand.vmem [shape: f32[1,128], index: 10, kind: input, shape index: {}]   ;;  %s2638_s11 = inlined_call_operand.vmem [shape: f32[1,128], index: 11, kind: input, shape index: {}]   ;;  %s2639_s12 = inlined_call_operand.vmem [shape: f32[1,128], index: 12, kind: input, shape index: {}]   ;;  %s2640_s13 = inlined_call_operand.hbm [shape: f32[32,128], index: 13, kind: output, shape index: {}]  }
   0x1   :  { %2651 = sst [smem:[#allocation25_spill]] %s2627_s0 }
   0x2   :  { %2652 = sst [smem:[#allocation26_spill]] %s2629_s2 }
   0x3   :  { %2653 = sst [smem:[#allocation27_spill]] %s2631_s4 }
   0x4   :  { %2654 = sst [smem:[#allocation28_spill]] %s2633_s6 }
   0x5   :  { %2655 = sst [smem:[#allocation29_spill]] %s2634_s7 }
   0x6   :  { %2656 = sst [smem:[#allocation30_spill]] %s2636_s9 }
   0x7   :  { %2657 = sst [smem:[#allocation31_spill]] %s2640_s13 }
   0x8   :  { %18 = vsyncpa [#allocation3], 0 }
   0x9   :  { %20 = vsyncpa [#allocation3 + $0x1], 0 }
   0xa   :  { %21 = vsyncpa [#allocation6], 0 }
   0xb   :  { %23 = vsyncpa [#allocation6 + $0x1], 0 }
   0xc   :  { %24 = vsyncpa [#allocation9], 0 }
   0xd   :  { %25 = vsyncpa [#allocation12], 0 }
   0xe   :  { %26 = vsyncpa [#allocation4], 0 }
   0xf   :  { %28 = vsyncpa [#allocation4 + $0x1], 0  ;;  %s2296_s25 = smov 0   ;;  %s2298_s26 = smov 0  }
  0x10   :  { %s2300_s27 = smov 0   ;;  %s2302_s28 = smov 0  }
  0x11 LB: > { %2658 = sst [smem:[#allocation21_spill]] %s2203_s27  ;;  %s2209_s29 = smov [#allocation7]   ;;  %s2207_s28 = sphi %s2302_s28, %s2690_s28   ;;  %s2203_s27 = sphi %s2300_s27, %s2692_s27   ;;  %s2199_s26 = sphi %s2298_s26, %s2694_s26   ;;  %s2195_s25 = sphi %s2296_s25, %s2693_s25  }
  0x12   : > { %s360_s30 = sshll.u32 %s2209_s29, 4  ;;  %s2317_s14 = sadd.s32 4294967295, %s2207_s28   ;;  %s361_s30 = int_to_ptr.vmem [resolvable:$true] %s360_s30 }
  0x13   : > { %p1518_p0 = scmp.ge.s32.totalorder %s2207_s28, 1  ;;  %p2644_p1 = scmp.eq.s32.totalorder %s2317_s14, 0 }
  0x14   : > { %p348_p2 = scmp.lt.s32.totalorder %s2207_s28, 3  ;;  %s2210_s16 = smov [#allocation8]  }
  0x15   : > { %s376_s17 = sshll.u32 %s2210_s16, 4  ;;  %s2211_s19 = smov [#allocation11]   ;;  %s2335_s17 = int_to_ptr.vmem [resolvable:$true] %s376_s17 }
  0x16   : > { %p2322_p3 = pnand %p1518_p0, %p348_p2  ;;  %s2337_s20 = sshll.u32 %s2211_s19, 4  ;;  %s406_s20 = int_to_ptr.vmem [resolvable:$true] %s2337_s20 }
  0x17   : > { %s1952_s22 = scalar_lea.vmem %s361_s30, 4096  ;;  %p1960_p11 = scmp.lt.s32.totalorder %s361_s30, %s361_s30 }
  0x18   : > { %p1836_p5 = pneg %p2322_p3  ;;  %p1953_p8 = scmp.ne.s32.totalorder %s361_s30, %s1952_s22 }
  0x19   : > { %p1961_p12 = scmp.lt.s32.totalorder %s1952_s22, %s1952_s22 }
  0x1a   : > { %p2331_p6 = pnand %p1836_p5, %p2644_p1 }
  0x1b   : > { %p1962_p13 = por %p1961_p12, %p1960_p11 }
  0x1c   : > { %p2341_p7 = pneg %p2331_p6 }
  0x1e   : > { %p1955_p9 = pnand %p1953_p8, %p2341_p7 }
  0x20   : > { %p1956_p10 = pneg %p1955_p9 }
  0x22   : > { %p1963_p0 = pnand %p1962_p13, %p1956_p10 }
  0x24   : > { %1966 = shalt.err (!%p1963_p0)
}
  0x25   : > { %s2642_s23 = smov 128   ;;  %s2643_s24 = smov 8  }
  0x26   : > { %s2662_s2 = sld [smem:[#allocation26_spill]]  ;;  %s1978_s19 = scalar_lea.vmem %s2335_s17, 6144 }
  0x27   : > { %p1979_p2 = scmp.ne.s32.totalorder %s2335_s17, %s1978_s19  ;;  %p1986_p9 = scmp.lt.s32.totalorder %s2335_s17, %s2335_s17 }
  0x28   : > { %p1987_p10 = scmp.lt.s32.totalorder %s1978_s19, %s1978_s19 }
  0x29   : > { %p1981_p5 = pnand %p1979_p2, %p2341_p7 }
  0x2a   : > { %p1988_p11 = por %p1987_p10, %p1986_p9 }
  0x2b   : > { %p1982_p8 = pneg %p1981_p5 }
  0x2c   : > { %1839 = dma.hbm_to_vmem [thread:$0]  (!%p2331_p6), %s2662_s2, 4096, %s361_s30, [#allocation6], %s2642_s23, %s2642_s23, %s2643_s24  }
  0x2d   : > { %p1989_p12 = pnand %p1988_p11, %p1982_p8 }
  0x2f   : > { %1992 = shalt.err (!%p1989_p12)
}
  0x30   : > { %s2214_s22 = smov 384   ;;  %s2215_s13 = smov 24  }
  0x31   : > { %s2663_s4 = sld [smem:[#allocation27_spill]]  ;;  %s2004_s16 = scalar_lea.vmem %s406_s20, 4096 }
  0x32   : > { %p2005_p13 = scmp.ne.s32.totalorder %s406_s20, %s2004_s16  ;;  %p2012_p5 = scmp.lt.s32.totalorder %s406_s20, %s406_s20 }
  0x33   : > { %p2013_p8 = scmp.lt.s32.totalorder %s2004_s16, %s2004_s16 }
  0x34   : > { %p2007_p0 = pnand %p2005_p13, %p2341_p7 }
  0x35   : > { %p2014_p9 = por %p2013_p8, %p2012_p5 }
  0x36   : > { %p2008_p2 = pneg %p2007_p0 }
  0x37   : > { %1842 = dma.hbm_to_vmem [thread:$0]  (!%p2331_p6), %s2663_s4, 6144, %s2335_s17, [#allocation9], %s2214_s22, %s2214_s22, %s2215_s13  }
  0x38   : > { %p2015_p10 = pnand %p2014_p9, %p2008_p2 }
  0x3a   : > { %2018 = shalt.err (!%p2015_p10)
}
  0x3b   : > { %s2664_s7 = sld [smem:[#allocation29_spill]]  ;;  %s2216_s13 = smov [#allocation10]  }
  0x3c   : > { %s392_s17 = sshll.u32 %s2216_s13, 4  ;;  %s2217_s22 = smov [#allocation13]   ;;  %s393_s17 = int_to_ptr.vmem [resolvable:$true] %s392_s17 }
  0x3d   : > { %s421_s29 = sshll.u32 %s2217_s22, 4  ;;  %s2030_s30 = scalar_lea.vmem %s393_s17, 2048  ;;  %s422_s29 = int_to_ptr.vmem [resolvable:$true] %s421_s29 }
  0x3e   : > { %p2031_p11 = scmp.ne.s32.totalorder %s393_s17, %s2030_s30  ;;  %p2038_p0 = scmp.lt.s32.totalorder %s393_s17, %s393_s17 }
  0x3f   : > { %p2039_p2 = scmp.lt.s32.totalorder %s2030_s30, %s2030_s30 }
  0x40   : > { %p2033_p12 = pnand %p2031_p11, %p2341_p7 }
  0x41   : > { %1848 = dma.hbm_to_vmem [thread:$0]  (!%p2331_p6), %s2664_s7, 4096, %s406_s20, [#allocation12], %s2642_s23, %s2642_s23, %s2643_s24  }
  0x42   : > { %p2034_p13 = pneg %p2033_p12  ;;  %p2040_p5 = por %p2039_p2, %p2038_p0 }
  0x44   : > { %p2041_p8 = pnand %p2040_p5, %p2034_p13 }
  0x46   : > { %2044 = shalt.err (!%p2041_p8)
}
  0x47   : > { %s2665_s6 = sld [smem:[#allocation28_spill]]  ;;  %s2056_s16 = scalar_lea.vmem %s422_s29, 2048 }
  0x48   : > { %p2057_p9 = scmp.ne.s32.totalorder %s422_s29, %s2056_s16  ;;  %p2064_p12 = scmp.lt.s32.totalorder %s422_s29, %s422_s29 }
  0x49   : > { %p2065_p0 = scmp.lt.s32.totalorder %s2056_s16, %s2056_s16 }
  0x4a   : > { %p2059_p10 = pnand %p2057_p9, %p2341_p7 }
  0x4b   : > { %p2066_p13 = por %p2065_p0, %p2064_p12 }
  0x4c   : > { %p2060_p11 = pneg %p2059_p10 }
  0x4d   : > { %1845 = dma.hbm_to_vmem [thread:$0]  (!%p2331_p6), %s2665_s6, 2048, %s393_s17, [#allocation9], %s2642_s23, %s2642_s23, %s2643_s24  }
  0x4e   : > { %p2067_p2 = pnand %p2066_p13, %p2060_p11 }
  0x50   : > { %2070 = shalt.err (!%p2067_p2)
}
  0x51   : > { %s2666_s9 = sld [smem:[#allocation30_spill]]  ;;  %s1517_s18 = sadd.s32 4294967294, %s2207_s28  }
  0x52   : > { %s2400_s21 = sadd.s32 1, %s2207_s28   ;;  %s41_s17 = sadd.s32 1, %s2203_s27 }
  0x53   : > { %2667 = sst [smem:[#allocation22_spill]] %s2400_s21  ;;  %s38_s22 = ssub.s32 %s2207_s28, %s2400_s21 }
  0x54   : > { %p48_p7 = scmp.ne.s32.totalorder %s2203_s27, %s2199_s26  ;;  %p39_p5 = scmp.eq.s32.totalorder %s38_s22, 0 }
  0x55   : > { %p49_p8 = scmp.eq.s32.totalorder %s2207_s28, 0  ;;  %p54_p9 = scmp.ne.s32.totalorder %s2199_s26, %s2195_s25 }
  0x56   : > { %p335_p10 = scmp.eq.s32.totalorder %s2317_s14, 1  ;;  %p341_p0 = scmp.eq.s32.totalorder %s1517_s18, 1 }
  0x57   : > { %1851 = dma.hbm_to_vmem [thread:$0]  (!%p2331_p6), %s2666_s9, 2048, %s422_s29, [#allocation12], %s2642_s23, %s2642_s23, %s2643_s24  }
  0x58   : > { %s2412_s30 = scalar_select %p39_p5, %s2203_s27, %s41_s17  }
  0x59   : > { %p50_p11 = por %p49_p8, %p48_p7  ;;  %p2416_p12 = por %p2644_p1, %p54_p9 }
  0x5a   : > { %2668 = sst [smem:[#allocation23_spill]] %s2412_s30  ;;  %p2420_p6 = por %p335_p10, %p48_p7 }
  0x5b   : > { %s2669_s2 = scalar_select %p2416_p12, 1, 0 }
  0x5c   : > { %s2670_s29 = scalar_select %p2420_p6, 1, 0 }
  0x5d   : > { %p1868_p13 = scmp.lt.s32.totalorder %s2207_s28, 2  ;;  %s2426_s20 = sand.u32 1, %s2203_s27  }
  0x5e   : > { %p2428_p2 = por %p341_p0, %p54_p9  ;;  %s1525_s19 = sshll.u32 %s2426_s20, 5 }
  0x5f   : > { %s1552_s13 = sshll.u32 %s2207_s28, 9  ;;  %s2673_s0 = sld [smem:[#allocation25_spill]] }
  0x60   : > { %s2671_s16 = scalar_select %p2428_p2, 1, 0 }
  0x61   : > { %s448_s18 = scalar_lea.vmem [#allocation2], %s1525_s19  ;;  %p2439_p7 = pnand %p1868_p13, %p50_p11 }
  0x62   : > { %2672 = sst [smem:[#allocation24_spill]] %s2671_s16  ;;  %s456_s24 = sshll.u32 %s448_s18, 4  ;;  %s2443_s24 = int_to_ptr.vmem [resolvable:$true] %s456_s24 }
  0x63   : > { %p2073_p8 = pneg %p2439_p7 }
  0x65   : > { %s2437_s23 = scalar_lea.hbm %s2673_s0, %s1552_s13  ;;  %s2076_s17 = scalar_lea.hbm %s2673_s0, 1024 }
  0x66   : > { %s2071_s7 = scalar_lea.hbm %s2437_s23, 512  ;;  %p2077_p11 = scmp.lt.s32.totalorder %s2437_s23, %s2673_s0 }
  0x67   : > { %p2072_p5 = scmp.ne.s32.totalorder %s2437_s23, %s2071_s7  ;;  %p2078_p0 = scmp.lt.s32.totalorder %s2076_s17, %s2071_s7 }
  0x69   : > { %p2074_p9 = pnand %p2073_p8, %p2072_p5  ;;  %p2079_p13 = por %p2078_p0, %p2077_p11 }
  0x6b   : > { %p2075_p10 = pneg %p2074_p9 }
  0x6d   : > { %p2080_p4 = pnand %p2079_p13, %p2075_p10 }
  0x6f   : > { %2083 = shalt.err (!%p2080_p4)
}
  0x70   : > { %s2084_s6 = scalar_lea.vmem %s2443_s24, 512  ;;  %s2218_s13 = smov [#allocation2]  }
  0x71   : > { %p2085_p1 = scmp.ne.s32.totalorder %s2443_s24, %s2084_s6  ;;  %s2089_s19 = sshll.u32 %s2218_s13, 4  ;;  %s2090_s19 = int_to_ptr.vmem [resolvable:$false] %s2089_s19 }
  0x72   : > { %s2091_s9 = scalar_lea.vmem %s2090_s19, 1024  ;;  %p2092_p2 = scmp.lt.s32.totalorder %s2443_s24, %s2090_s19 }
  0x73   : > { %p2087_p5 = pnand %p2085_p1, %p2073_p8  ;;  %p2093_p6 = scmp.lt.s32.totalorder %s2091_s9, %s2084_s6 }
  0x75   : > { %p2088_p9 = pneg %p2087_p5  ;;  %p2094_p12 = por %p2093_p6, %p2092_p2 }
  0x77   : > { %p2095_p11 = pnand %p2094_p12, %p2088_p9 }
  0x79   : > { %2098 = shalt.err (!%p2095_p11)
}
  0x7a   : > { %s2219_s7 = smov 256   ;;  %s2220_s17 = smov 16  }
  0x7b   : > { %s2675_s22 = scalar_lea.sflag [#allocation3], %s2426_s20  ;;  %s466_s18 = sand.u32 1, %s2207_s28  }
  0x7c   : > { %1855 = dma.hbm_to_vmem [thread:$0]  (!%p2439_p7), %s2437_s23, 512, %s2443_s24, %s2675_s22, %s2219_s7, %s2219_s7, %s2220_s17  }
  0x7d   : > { %s1529_s13 = sshll.u32 %s2426_s20, 4  ;;  %s1553_s19 = sshll.u32 %s2207_s28, 8 }
  0x7e   : > { %s470_s6 = scalar_lea.vmem [#allocation5], %s1529_s13  ;;  %s2478_s27 = scalar_lea.hbm %s2628_s1, %s1553_s19 }
  0x7f   : > { %s477_s9 = sshll.u32 %s470_s6, 4  ;;  %s467_s21 = scalar_lea.sflag [#allocation6], %s466_s18  ;;  %s2480_s9 = int_to_ptr.vmem [resolvable:$true] %s477_s9 }
  0x80   : > { %s2099_s16 = scalar_lea.hbm %s2478_s27, 256  ;;  %s2104_s20 = scalar_lea.hbm %s2628_s1, 512 }
  0x81   : > { %p2100_p1 = scmp.ne.s32.totalorder %s2478_s27, %s2099_s16  ;;  %p2105_p6 = scmp.lt.s32.totalorder %s2478_s27, %s2628_s1 }
  0x82   : > { %p2106_p2 = scmp.lt.s32.totalorder %s2104_s20, %s2099_s16 }
  0x83   : > { %p2102_p4 = pnand %p2100_p1, %p2073_p8 }
  0x84   : > { %p2107_p10 = por %p2106_p2, %p2105_p6 }
  0x85   : > { %p2103_p12 = pneg %p2102_p4 }
  0x87   : > { %p2108_p0 = pnand %p2107_p10, %p2103_p12 }
  0x89   : > { %2111 = shalt.err (!%p2108_p0)
}
  0x8a   : > { %s2112_s30 = scalar_lea.vmem %s2480_s9, 256  ;;  %s2221_s17 = smov [#allocation5]  }
  0x8b   : > { %p2113_p13 = scmp.ne.s32.totalorder %s2480_s9, %s2112_s30  ;;  %s2117_s22 = sshll.u32 %s2221_s17, 4  ;;  %s2118_s22 = int_to_ptr.vmem [resolvable:$false] %s2117_s22 }
  0x8c   : > { %s2119_s18 = scalar_lea.vmem %s2118_s22, 512  ;;  %p2120_p11 = scmp.lt.s32.totalorder %s2480_s9, %s2118_s22 }
  0x8d   : > { %p2115_p5 = pnand %p2113_p13, %p2073_p8  ;;  %p2121_p1 = scmp.lt.s32.totalorder %s2119_s18, %s2112_s30 }
  0x8f   : > { %p2116_p9 = pneg %p2115_p5  ;;  %p2122_p4 = por %p2121_p1, %p2120_p11 }
  0x91   : > { %p2123_p6 = pnand %p2122_p4, %p2116_p9 }
  0x93   : > { %2126 = shalt.err (!%p2123_p6)
}
  0x94   : > { %s2676_s16 = smov 8   ;;  %s2677_s13 = smov 128  }
  0x95   : > { %1858 = dma.hbm_to_vmem [thread:$0]  (!%p2439_p7), %s2478_s27, 256, %s2480_s9, %s467_s21, %s2677_s13, %s2677_s13, %s2676_s16  }
  0x96   : > { %489 = sbr.rel (%p2322_p3) target bundleno = 1582 (0x62e), region = 72  ;;  %s2510_s19 = sand.u32 (!%p2322_p3), 1, %s2199_s26  }
  0x97   : > { %s1533_s6 = sshll.u32 (!%p2322_p3), %s2510_s19, 5  ;;  %s492_s23 = scalar_lea.sflag (!%p2322_p3), [#allocation3], %s2510_s19 }
  0x98   : > { %s2514_s24 = scalar_lea.vmem (!%p2322_p3), [#allocation2], %s1533_s6  ;;  %p2678_p8 = scmp.ne.s32.totalorder (!%p2322_p3), %s2669_s2, 0 }
  0x9b   : > { %2170 = dma.done.wait (%p2678_p8), %s492_s23, 512  }
  0x9c   : > { %2172 = vsyncadd (%p2678_p8), %s492_s23, 4294966784  ;;  %s500_s4 = sand.u32 1, %s2317_s14   ;;  %s1534_s27 = sshll.u32 %s2510_s19, 4 }
  0x9d   : > { %s501_s15 = scalar_lea.sflag [#allocation6], %s500_s4  ;;  %s2524_s21 = scalar_lea.vmem [#allocation5], %s1534_s27 }
  0x9e   : > { %2174 = dma.done.wait (%p2678_p8), %s501_s15, 256  }
  0x9f   : > { %2176 = vsyncadd (%p2678_p8), %s501_s15, 4294967040  ;;  %p2679_p3 = scmp.eq.s32.totalorder %s2317_s14, 0 }
  0xa1   : > { %2178 = dma.done.wait (%p2679_p3), [#allocation6], 4096   ;;  %p2680_p7 = pmov %p2679_p3 }
  0xa2   : > { %p2681_p12 = pmov %p2679_p3 }
  0xa3   : > { %2180 = vsyncadd (%p2680_p7), [#allocation6], 4294963200 }
  0xa4   : > { %2182 = dma.done.wait (%p2681_p12), [#allocation9], 8192   ;;  %p2682_p2 = pmov %p2679_p3 }
  0xa6   : > { %2184 = vsyncadd (%p2682_p2), [#allocation9], 4294959104  ;;  %p2683_p10 = pmov %p2682_p2 }
  0xa7   : > { %p2684_p0 = pmov %p2682_p2 }
  0xa8   : > { %2186 = dma.done.wait (%p2683_p10), [#allocation12], 6144  }
  0xa9   : > { %2188 = vsyncadd (%p2684_p0), [#allocation12], 4294961152  ;;  %v612_v0 = vld [vmem:[#allocation7 + $0xf8] sm:$0xff]  ;;  %v611_v2 = vld [vmem:[#allocation7 + $0xf0] sm:$0xff]  ;;  %s1554_s23 = sshll.u32 %s2317_s14, 8  ;;  %s2685_s2 = sld [smem:[#allocation31_spill]] }
  0xaa   : > { %v596_v1 = vld [vmem:[#allocation7 + $0x78] sm:$0xff]  ;;  %1555 = vmatprep.subr.mxu0 %v612_v0  ;;  %v595_v3 = vld [vmem:[#allocation7 + $0x70] sm:$0xff]  ;;  %v610_v4 = vld [vmem:[#allocation7 + $0xe8] sm:$0xff]  ;;  %s1361_s20 = scalar_lea.sflag [#allocation4], %s2510_s19  ;;  %p2686_p5 = scmp.ne.s32.totalorder %s2670_s29, 0 }
  0xab   : > { %1556 = vmatpush3.msra.mxu0 %v596_v1  ;;  %v594_v5 = vld [vmem:[#allocation7 + $0x68] sm:$0xff]  ;;  %v609_v6 = vld [vmem:[#allocation7 + $0xe0] sm:$0xff]  ;;  %v608_v8 = vld [vmem:[#allocation7 + $0xd8] sm:$0xff]  ;;  %s2223_s14 = smov [#allocation14]  }
  0xac   : > { %1557 = vmatprep.subr.mxu0 %v611_v2  ;;  %v593_v7 = vld [vmem:[#allocation7 + $0x60] sm:$0xff]  ;;  %v592_v9 = vld [vmem:[#allocation7 + $0x58] sm:$0xff]  ;;  %v607_v10 = vld [vmem:[#allocation7 + $0xd0] sm:$0xff] }
  0xad   : > { %1558 = vmatpush3.msra.mxu0 %v595_v3  ;;  %v591_v11 = vld [vmem:[#allocation7 + $0x50] sm:$0xff]  ;;  %v606_v12 = vld [vmem:[#allocation7 + $0xc8] sm:$0xff]  ;;  %v605_v15 = vld [vmem:[#allocation7 + $0xc0] sm:$0xff] }
  0xae   : > { %1559 = vmatprep.subr.mxu0 %v610_v4  ;;  %v576_v13 = vld [vmem:[%s2514_s24 + $0x8] sm:$0xff]  ;;  %v741_v16 = vld [vmem:[#allocation8 + $0x170] sm:$0xff]  ;;  %v738_v18 = vld [vmem:[#allocation8 + $0x158] sm:$0xff] }
  0xaf   : > { %1560 = vmatpush3.msra.mxu0 %v594_v5  ;;  %v590_v14 = vld [vmem:[#allocation7 + $0x48] sm:$0xff]  ;;  %684 = vmatprep.mubr.f32.mxu0 %v576_v13  ;;  %v589_v19 = vld [vmem:[#allocation7 + $0x40] sm:$0xff]  ;;  %v737_v20 = vld [vmem:[#allocation8 + $0x150] sm:$0xff]  ;;  %s2582_s9 = scalar_lea.hbm %s2685_s2, %s1554_s23 }
  0xb0   : > { %1561 = vmatprep.subr.mxu0 %v609_v6  ;;  %v740_v17 = vld [vmem:[#allocation8 + $0x168] sm:$0xff]  ;;  %760 = vmatprep.subr.mxu1 %v741_v16  ;;  %v604_v21 = vld [vmem:[#allocation7 + $0xb8] sm:$0xff]  ;;  %v735_v22 = vld [vmem:[#allocation8 + $0x140] sm:$0xff] }
  0xb1   : > { %1562 = vmatpush3.msra.mxu0 %v593_v7  ;;  %761 = vmatpush1.msra.mxu1 %v740_v17  ;;  %v588_v23 = vld [vmem:[#allocation7 + $0x38] sm:$0xff]  ;;  %v603_v25 = vld [vmem:[#allocation7 + $0xb0] sm:$0xff]  ;;  %v732_v26 = vld [vmem:[#allocation8 + $0x128] sm:$0xff] }
  0xb2   : > { %1563 = vmatprep.subr.mxu0 %v608_v8  ;;  %762 = vmatprep.subr.mxu1 %v738_v18  ;;  %v734_v24 = vld [vmem:[#allocation8 + $0x138] sm:$0xff]  ;;  %v587_v27 = vld [vmem:[#allocation7 + $0x30] sm:$0xff]  ;;  %v731_v28 = vld [vmem:[#allocation8 + $0x120] sm:$0xff]  ;;  %v2222_v18 = vmov 0.0  }
  0xb3   : > { %1564 = vmatpush3.msra.mxu0 %v592_v9  ;;  %763 = vmatpush1.msra.mxu1 %v737_v20  ;;  %v602_v29 = vld [vmem:[#allocation7 + $0xa8] sm:$0xff]  ;;  %v729_v30 = vld [vmem:[#allocation8 + $0x110] sm:$0xff]  ;;  %v601_v33 = vld [vmem:[#allocation7 + $0xa0] sm:$0xff] }
  0xb4   : > { %1565 = vmatprep.subr.mxu0 %v607_v10  ;;  %764 = vmatprep.subr.mxu1 %v735_v22  ;;  %v586_v31 = vld [vmem:[#allocation7 + $0x28] sm:$0xff]  ;;  %v726_v34 = vld [vmem:[#allocation8 + $0xf8] sm:$0xff]  ;;  %v585_v35 = vld [vmem:[#allocation7 + $0x20] sm:$0xff] }
  0xb5   : > { %1566 = vmatpush3.msra.mxu0 %v591_v11  ;;  %765 = vmatpush1.msra.mxu1 %v734_v24  ;;  %v728_v32 = vld [vmem:[#allocation8 + $0x108] sm:$0xff]  ;;  %v725_v36 = vld [vmem:[#allocation8 + $0xf0] sm:$0xff]  ;;  %v600_v37 = vld [vmem:[#allocation7 + $0x98] sm:$0xff] }
  0xb6   : > { %1567 = vmatprep.subr.mxu0 %v606_v12  ;;  %766 = vmatprep.subr.mxu1 %v732_v26  ;;  %v723_v38 = vld [vmem:[#allocation8 + $0xe0] sm:$0xff]  ;;  %v584_v39 = vld [vmem:[#allocation7 + $0x18] sm:$0xff]  ;;  %v599_v41 = vld [vmem:[#allocation7 + $0x90] sm:$0xff] }
  0xb7   : > { %1568 = vmatpush3.msra.mxu0 %v590_v14  ;;  %767 = vmatpush1.msra.mxu1 %v731_v28  ;;  %v722_v40 = vld [vmem:[#allocation8 + $0xd8] sm:$0xff]  ;;  %v720_v42 = vld [vmem:[#allocation8 + $0xc8] sm:$0xff]  ;;  %v583_v43 = vld [vmem:[#allocation7 + $0x10] sm:$0xff] }
  0xb8   : > { %1569 = vmatprep.subr.mxu0 %v605_v15  ;;  %768 = vmatprep.subr.mxu1 %v729_v30  ;;  %v719_v44 = vld [vmem:[#allocation8 + $0xc0] sm:$0xff]  ;;  %v598_v45 = vld [vmem:[#allocation7 + $0x88] sm:$0xff]  ;;  %v717_v46 = vld [vmem:[#allocation8 + $0xb0] sm:$0xff] }
  0xb9   : > { %1570 = vmatpush3.msra.mxu0 %v589_v19  ;;  %769 = vmatpush1.msra.mxu1 %v728_v32  ;;  %v582_v47 = vld [vmem:[#allocation7 + $0x8] sm:$0xff]  ;;  %v597_v49 = vld [vmem:[#allocation7 + $0x80] sm:$0xff]  ;;  %v714_v50 = vld [vmem:[#allocation8 + $0x98] sm:$0xff] }
  0xba   : > { %1571 = vmatprep.subr.mxu0 %v604_v21  ;;  %770 = vmatprep.subr.mxu1 %v726_v34  ;;  %v716_v48 = vld [vmem:[#allocation8 + $0xa8] sm:$0xff]  ;;  %v581_v51 = vld [vmem:[#allocation7] sm:$0xff]  ;;  %v713_v52 = vld [vmem:[#allocation8 + $0x90] sm:$0xff] }
  0xbb   : > { %1572 = vmatpush3.msra.mxu0 %v588_v23  ;;  %771 = vmatpush1.msra.mxu1 %v725_v36  ;;  %v575_v53 = vld [vmem:[%s2514_s24] sm:$0xff]  ;;  %v742_v54 = vld [vmem:[#allocation8 + $0x178] sm:$0xff]  ;;  %v577_v59 = vld [vmem:[%s2514_s24 + $0x10] sm:$0xff] }
  0xbc   : > { %1573 = vmatprep.subr.mxu0 %v603_v25  ;;  %772 = vmatprep.subr.mxu1 %v723_v38  ;;  %v578_v55 = vld [vmem:[%s2514_s24 + $0x18] sm:$0xff]  ;;  %v739_v56 = vld [vmem:[#allocation8 + $0x160] sm:$0xff]  ;;  %v736_v60 = vld [vmem:[#allocation8 + $0x148] sm:$0xff]  ;;  %s571_s24 = scalar_lea.vmem [#allocation14], %s1534_s27  ;;  %s2131_s27 = sshll.u32 %s2223_s14, 4  ;;  %s2132_s27 = int_to_ptr.vmem [resolvable:$false] %s2131_s27 }
  0xbd   : > { %1574 = vmatpush3.msra.mxu0 %v587_v27  ;;  %773 = vmatpush1.msra.mxu1 %v722_v40  ;;  %v711_v57 = vld [vmem:[#allocation8 + $0x80] sm:$0xff]  ;;  %v710_v58 = vld [vmem:[#allocation8 + $0x78] sm:$0xff]  ;;  %v708_v61 = vld [vmem:[#allocation8 + $0x68] sm:$0xff]  ;;  %s1374_s4 = sshll.u32 %s571_s24, 4  ;;  %s2133_s0 = scalar_lea.vmem %s2132_s27, 512  ;;  %s2584_s4 = int_to_ptr.vmem [resolvable:$true] %s1374_s4 }
  0xbe   : > { %1575 = vmatprep.subr.mxu0 %v602_v29  ;;  %774 = vmatprep.subr.mxu1 %v720_v42  ;;  %v733_v62 = vld [vmem:[#allocation8 + $0x130] sm:$0xff]  ;;  %v707_v63 = vld [vmem:[#allocation8 + $0x60] sm:$0xff]  ;;  %v730_v1 = vld [vmem:[#allocation8 + $0x118] sm:$0xff]  ;;  %s2127_s7 = scalar_lea.vmem %s2584_s4, 256  ;;  %p2134_p1 = scmp.lt.s32.totalorder %s2584_s4, %s2132_s27 }
  0xbf   : > { %1576 = vmatpush3.msra.mxu0 %v586_v31  ;;  %775 = vmatpush1.msra.mxu1 %v719_v44  ;;  %v705_v0 = vld [vmem:[#allocation8 + $0x50] sm:$0xff]  ;;  %v727_v2 = vld [vmem:[#allocation8 + $0x100] sm:$0xff]  ;;  %v724_v3 = vld [vmem:[#allocation8 + $0xe8] sm:$0xff]  ;;  %p2128_p13 = scmp.ne.s32.totalorder %s2584_s4, %s2127_s7  ;;  %p2135_p4 = scmp.lt.s32.totalorder %s2133_s0, %s2127_s7 }
  0xc0   : > { %1577 = vmatprep.subr.mxu0 %v601_v33  ;;  %776 = vmatprep.subr.mxu1 %v717_v46  ;;  %v721_v4 = vld [vmem:[#allocation8 + $0xd0] sm:$0xff]  ;;  %v718_v5 = vld [vmem:[#allocation8 + $0xb8] sm:$0xff]  ;;  %v715_v6 = vld [vmem:[#allocation8 + $0xa0] sm:$0xff] }
  0xc1   : > { %1578 = vmatpush3.msra.mxu0 %v585_v35  ;;  %777 = vmatpush1.msra.mxu1 %v716_v48  ;;  %v712_v7 = vld [vmem:[#allocation8 + $0x88] sm:$0xff]  ;;  %v702_v9 = vld [vmem:[#allocation8 + $0x38] sm:$0xff]  ;;  %v709_v10 = vld [vmem:[#allocation8 + $0x70] sm:$0xff]  ;;  %v745_v48 = vlaneseq  ;;  %p2129_p9 = pnand %p2128_p13, %p2686_p5  ;;  %p2136_p6 = por %p2135_p4, %p2134_p1 }
  0xc2   : > { %1579 = vmatprep.subr.mxu0 %v600_v37  ;;  %778 = vmatprep.subr.mxu1 %v714_v50  ;;  %v704_v8 = vld [vmem:[#allocation8 + $0x48] sm:$0xff]  ;;  %v701_v11 = vld [vmem:[#allocation8 + $0x30] sm:$0xff]  ;;  %v699_v12 = vld [vmem:[#allocation8 + $0x20] sm:$0xff] }
  0xc3   : > { %1580 = vmatpush3.msra.mxu0 %v584_v39  ;;  %779 = vmatpush1.msra.mxu1 %v713_v52  ;;  %v706_v13 = vld [vmem:[#allocation8 + $0x58] sm:$0xff]  ;;  %v696_v15 = vld [vmem:[#allocation8 + $0x8] sm:$0xff]  ;;  %v703_v16 = vld [vmem:[#allocation8 + $0x40] sm:$0xff]  ;;  %p2130_p11 = pneg %p2129_p9 }
  0xc4   : > { %1581 = vmatprep.subr.mxu0 %v599_v41  ;;  %780 = vmatprep.subr.mxu1 %v711_v57  ;;  %v698_v14 = vld [vmem:[#allocation8 + $0x18] sm:$0xff]  ;;  %v695_v17 = vld [vmem:[#allocation8] sm:$0xff]  ;;  %v700_v19 = vld [vmem:[#allocation8 + $0x28] sm:$0xff] }
  0xc5   : > { %1582 = vmatpush3.msra.mxu0 %v583_v43  ;;  %781 = vmatpush1.msra.mxu1 %v710_v58  ;;  %v697_v20 = vld [vmem:[#allocation8 + $0x10] sm:$0xff]  ;;  %v957_v21 = vld [vmem:[#allocation10 + $0x78] sm:$0xff]  ;;  %v1541_v23 = vld [vmem:[%s2630_s3] ss:$0 sm:$0xff]  ;;  %p2137_p8 = pnand %p2136_p6, %p2130_p11 }
  0xc6   : > { %1583 = vmatprep.subr.mxu0 %v598_v45  ;;  %782 = vmatprep.subr.mxu1 %v708_v61  ;;  %v956_v29 = vld [vmem:[#allocation10 + $0x70] sm:$0xff]  ;;  %v955_v32 = vld [vmem:[#allocation10 + $0x68] sm:$0xff]  ;;  %v954_v33 = vld [vmem:[#allocation10 + $0x60] sm:$0xff] }
  0xc7   : > { %1584 = vmatpush3.msra.mxu0 %v582_v47  ;;  %783 = vmatpush1.msra.mxu1 %v707_v63  ;;  %v579_v34 = vld [vmem:[%s2524_s21] sm:$0xff]  ;;  %v580_v35 = vld [vmem:[%s2524_s21 + $0x8] sm:$0xff] }
  0xc8   : > { %1585 = vmatprep.subr.mxu0 %v597_v49  ;;  %784 = vmatprep.subr.mxu1 %v705_v0  ;;  %v953_v36 = vld [vmem:[#allocation10 + $0x58] sm:$0xff]  ;;  %v952_v37 = vld [vmem:[#allocation10 + $0x50] sm:$0xff]  ;;  %v951_v38 = vld [vmem:[#allocation10 + $0x48] sm:$0xff]  ;;  %v2551_v49 = vshrl.u32 %v745_v48, 7 }
  0xc9   : > { %1586 = vmatpush3.msra.mxu0 %v581_v51  ;;  %785 = vmatpush1.msra.mxu1 %v704_v8  ;;  %v950_v39 = vld [vmem:[#allocation10 + $0x40] sm:$0xff]  ;;  %v949_v40 = vld [vmem:[#allocation10 + $0x38] sm:$0xff]  ;;  %v948_v41 = vld [vmem:[#allocation10 + $0x30] sm:$0xff] }
  0xca   : > { %685 = vmatmul.mubr.f32.vlgmr.msra.gmra.mxu0 %v575_v53  ;;  %1693 = vmatprep.subr.mxu0 %v742_v54  ;;  %v947_v42 = vld [vmem:[#allocation10 + $0x28] sm:$0xff]  ;;  %v946_v43 = vld [vmem:[#allocation10 + $0x20] sm:$0xff]  ;;  %v945_v44 = vld [vmem:[#allocation10 + $0x18] sm:$0xff]  ;;  %v747_v50 = vsub.s32 0, %v2551_v49  ;;  %v751_v51 = vsub.s32 1, %v2551_v49 }
  0xcb   : > { %689 = vmatprep.mubr.f32.mxu0 %v578_v55  ;;  %1694 = vmatpush3.msra.mxu0 %v742_v54  ;;  %v944_v45 = vld [vmem:[#allocation10 + $0x10] sm:$0xff]  ;;  %v943_v46 = vld [vmem:[#allocation10 + $0x8] sm:$0xff]  ;;  %v942_v47 = vld [vmem:[#allocation10] sm:$0xff] }
  0xcc   : > { %1695 = vmatprep.subr.mxu0 %v739_v56  ;;  %786 = vmatprep.subr.mxu1 %v702_v9  ;;  %v2558_v52 = vld [vmem:[%s2632_s5] sm:$0x7]  ;;  %v1233_v48 = vld [vmem:[#allocation13 + $0x70] sm:$0xff] }
  0xcd   : > { %1696 = vmatpush3.msra.mxu0 %v739_v56  ;;  %787 = vmatpush1.msra.mxu1 %v701_v11  ;;  %v748_v53 = vrot.slane %v2558_v52, %v747_v50  ;;  %v752_v54 = vrot.slane %v2558_v52, %v751_v51  ;;  %v1232_v50 = vld [vmem:[#allocation13 + $0x68] sm:$0xff]  ;;  %v1231_v51 = vld [vmem:[#allocation13 + $0x60] sm:$0xff] }
  0xce   : > { %690 = vmatmul.mubr.f32.gmra.mxu0 %v577_v59  ;;  %1697 = vmatprep.subr.mxu0 %v736_v60 }
  0xcf   : > { %1698 = vmatpush3.msra.mxu0 %v736_v60  ;;  %788 = vmatprep.subr.mxu1 %v699_v12 }
  0xd0   : > { %1699 = vmatprep.subr.mxu0 %v733_v62  ;;  %789 = vmatpush1.msra.mxu1 %v698_v14 }
  0xd1   : > { %1700 = vmatpush3.msra.mxu0 %v733_v62  ;;  %790 = vmatprep.subr.mxu1 %v696_v15  ;;  %v1134_v15 = vld [vmem:[#allocation11 + $0xf8] sm:$0xff] }
  0xd2   : > { %1701 = vmatprep.subr.mxu0 %v730_v1  ;;  %791 = vmatpush1.msra.mxu1 %v695_v17  ;;  %v1133_v17 = vld [vmem:[#allocation11 + $0xf0] sm:$0xff] }
  0xd3   : > { %1702 = vmatpush3.msra.mxu0 %v730_v1  ;;  %824 = vmatprep.mubr.f32.mxu1 %v2222_v18 }
  0xd4   : > { %1703 = vmatprep.subr.mxu0 %v727_v2  ;;  %1731 = vmatprep.subr.mxu1 %v957_v21 }
  0xd5   : > { %1704 = vmatpush3.msra.mxu0 %v727_v2 }
  0xd6   : > { %1705 = vmatprep.subr.mxu0 %v724_v3 }
  0xd7   : > { %1706 = vmatpush3.msra.mxu0 %v724_v3 }
  0xd8   : > { %1707 = vmatprep.subr.mxu0 %v721_v4 }
  0xd9   : > { %1708 = vmatpush3.msra.mxu0 %v721_v4 }
  0xda   : > { %1709 = vmatprep.subr.mxu0 %v718_v5 }
  0xdb   : > { %1710 = vmatpush3.msra.mxu0 %v718_v5 }
  0xdc   : > { %1711 = vmatprep.subr.mxu0 %v715_v6 }
  0xdd   : > { %1712 = vmatpush3.msra.mxu0 %v715_v6 }
  0xde   : > { %1713 = vmatprep.subr.mxu0 %v712_v7 }
  0xdf   : > { %1714 = vmatpush3.msra.mxu0 %v712_v7 }
  0xe0   : > { %1715 = vmatprep.subr.mxu0 %v709_v10 }
  0xe1   : > { %1716 = vmatpush3.msra.mxu0 %v709_v10 }
  0xe2   : > { %1717 = vmatprep.subr.mxu0 %v706_v13 }
  0xe3   : > { %1718 = vmatpush3.msra.mxu0 %v706_v13 }
  0xe4   : > { %1719 = vmatprep.subr.mxu0 %v703_v16 }
  0xe5   : > { %1720 = vmatpush3.msra.mxu0 %v703_v16  ;;  %v1118_v16 = vld [vmem:[#allocation11 + $0x78] sm:$0xff] }
  0xe6   : > { %1721 = vmatprep.subr.mxu0 %v700_v19 }
  0xe7   : > { %1722 = vmatpush3.msra.mxu0 %v700_v19  ;;  %v1132_v19 = vld [vmem:[#allocation11 + $0xe8] sm:$0xff] }
  0xe8   : > { %1723 = vmatprep.subr.mxu0 %v697_v20 }
  0xe9   : > { %1724 = vmatpush3.msra.mxu0 %v697_v20  ;;  %v1116_v20 = vld [vmem:[#allocation11 + $0x68] sm:$0xff] }
  0xea   : > { %1637 = vmatprep.subr.mxu0 %v1134_v15 }
 0x18a   : > { %v1587_v22 = vpop.f32.mrf.mxu0 }
 0x18c   : > { %v1588_v24 = vpop.f32.mrf.mxu0 }
 0x18d   : > { %v1589_v25 = vadd.f32 %v1588_v24, %v1587_v22  ;;  %v1115_v22 = vld [vmem:[#allocation11 + $0x60] sm:$0xff]  ;;  %v1114_v24 = vld [vmem:[#allocation11 + $0x58] sm:$0xff] }
 0x18e   : > { %v1590_v26 = vpop.f32.mrf.mxu0 }
 0x18f   : > { %v687_v27 = vadd.f32 %v1589_v25, %v1541_v23  ;;  %v1129_v25 = vld [vmem:[#allocation11 + $0xd0] sm:$0xff] }
 0x190   : > { %v1591_v28 = vpop.f32.mrf.mxu0 }
 0x191   : > { %v1592_v30 = vadd.f32 %v1591_v28, %v1590_v26  ;;  %825 = vmatmul.mubr.f32.vlgmr.msra.gmra.mxu1 %v687_v27  ;;  %1725 = vmatprep.mubr.f32.mxu0 %v687_v27  ;;  %v1113_v26 = vld [vmem:[#allocation11 + $0x50] sm:$0xff]  ;;  %v1128_v27 = vld [vmem:[#allocation11 + $0xc8] sm:$0xff] }
 0x192   : > { %830 = vmatprep.mubr.f32.mxu1 %v2222_v18  ;;  %1732 = vmatpush3.msra.mxu1 %v957_v21  ;;  %v1131_v21 = vld [vmem:[#allocation11 + $0xe0] sm:$0xff]  ;;  %v1112_v28 = vld [vmem:[#allocation11 + $0x48] sm:$0xff] }
 0x193   : > { %v692_v31 = vadd.f32 %v1592_v30, %v1541_v23  ;;  %1733 = vmatprep.subr.mxu1 %v956_v29  ;;  %v1130_v23 = vld [vmem:[#allocation11 + $0xd8] sm:$0xff]  ;;  %v1111_v30 = vld [vmem:[#allocation11 + $0x40] sm:$0xff] }
 0x194   : > { %1734 = vmatpush3.msra.mxu1 %v956_v29  ;;  %v1127_v29 = vld [vmem:[#allocation11 + $0xc0] sm:$0xff] }
 0x195   : > { %831 = vmatmul.mubr.f32.gmra.mxu1 %v692_v31  ;;  %1726 = vmatmul.mubr.f32.vlgmr.msra.gmra.mxu0 %v692_v31  ;;  %v1126_v31 = vld [vmem:[#allocation11 + $0xb8] sm:$0xff] }
 0x196   : > { %836 = vmatprep.mubr.f32.mxu1 %v2222_v18  ;;  %1735 = vmatprep.subr.mxu1 %v955_v32 }
 0x197   : > { %1736 = vmatpush3.msra.mxu1 %v955_v32  ;;  %1728 = vmatprep.mubr.f32.mxu0 %v579_v34  ;;  %v1110_v32 = vld [vmem:[#allocation11 + $0x38] sm:$0xff] }
 0x198   : > { %1737 = vmatprep.subr.mxu1 %v954_v33  ;;  %1638 = vmatpush3.msra.mxu0 %v1118_v16 }
 0x199   : > { %837 = vmatmul.mubr.f32.gmra.mxu1 %v579_v34  ;;  %1729 = vmatmul.mubr.f32.gmra.mxu0 %v580_v35  ;;  %v1109_v34 = vld [vmem:[#allocation11 + $0x30] sm:$0xff] }
 0x19a   : > { %842 = vmatprep.mubr.f32.mxu1 %v2222_v18  ;;  %1738 = vmatpush3.msra.mxu1 %v954_v33  ;;  %v1117_v18 = vld [vmem:[#allocation11 + $0x70] sm:$0xff] }
 0x19b   : > { %1739 = vmatprep.subr.mxu1 %v953_v36  ;;  %1639 = vmatprep.subr.mxu0 %v1133_v17  ;;  %v1125_v33 = vld [vmem:[#allocation11 + $0xb0] sm:$0xff] }
 0x19c   : > { %1740 = vmatpush3.msra.mxu1 %v953_v36  ;;  %1640 = vmatpush3.msra.mxu0 %v1117_v18  ;;  %v1108_v36 = vld [vmem:[#allocation11 + $0x28] sm:$0xff] }
 0x19d   : > { %843 = vmatmul.mubr.f32.gmra.mxu1 %v580_v35  ;;  %1741 = vmatprep.subr.mxu1 %v952_v37  ;;  %v1124_v35 = vld [vmem:[#allocation11 + $0xa8] sm:$0xff] }
 0x19e   : > { %1742 = vmatpush3.msra.mxu1 %v952_v37  ;;  %1641 = vmatprep.subr.mxu0 %v1132_v19  ;;  %v1123_v37 = vld [vmem:[#allocation11 + $0xa0] sm:$0xff] }
 0x19f   : > { %1743 = vmatprep.subr.mxu1 %v951_v38  ;;  %1642 = vmatpush3.msra.mxu0 %v1116_v20 }
 0x1a0   : > { %1744 = vmatpush3.msra.mxu1 %v951_v38  ;;  %1643 = vmatprep.subr.mxu0 %v1131_v21  ;;  %v1107_v38 = vld [vmem:[#allocation11 + $0x20] sm:$0xff] }
 0x1a1   : > { %1745 = vmatprep.subr.mxu1 %v950_v39  ;;  %1644 = vmatpush3.msra.mxu0 %v1115_v22  ;;  %v755_v22 = vsub.s32 2, %v2551_v49 }
 0x1a2   : > { %1746 = vmatpush3.msra.mxu1 %v950_v39  ;;  %1645 = vmatprep.subr.mxu0 %v1130_v23  ;;  %v1122_v39 = vld [vmem:[#allocation11 + $0x98] sm:$0xff] }
 0x1a3   : > { %1747 = vmatprep.subr.mxu1 %v949_v40  ;;  %1646 = vmatpush3.msra.mxu0 %v1114_v24 }
 0x1a4   : > { %1748 = vmatpush3.msra.mxu1 %v949_v40  ;;  %1647 = vmatprep.subr.mxu0 %v1129_v25  ;;  %v1106_v40 = vld [vmem:[#allocation11 + $0x18] sm:$0xff]  ;;  %v756_v25 = vrot.slane %v2558_v52, %v755_v22  ;;  %v1544_v22 = vld [vmem:[%s2638_s11] ss:$0 sm:$0xff] }
 0x1a5   : > { %1749 = vmatprep.subr.mxu1 %v948_v41  ;;  %1648 = vmatpush3.msra.mxu0 %v1113_v26 }
 0x1a6   : > { %1750 = vmatpush3.msra.mxu1 %v948_v41  ;;  %1649 = vmatprep.subr.mxu0 %v1128_v27  ;;  %v1121_v41 = vld [vmem:[#allocation11 + $0x90] sm:$0xff] }
 0x1a7   : > { %1751 = vmatprep.subr.mxu1 %v947_v42  ;;  %1650 = vmatpush3.msra.mxu0 %v1112_v28 }
 0x1a8   : > { %1752 = vmatpush3.msra.mxu1 %v947_v42  ;;  %1651 = vmatprep.subr.mxu0 %v1127_v29  ;;  %v1105_v42 = vld [vmem:[#allocation11 + $0x10] sm:$0xff] }
 0x1a9   : > { %1753 = vmatprep.subr.mxu1 %v946_v43  ;;  %1652 = vmatpush3.msra.mxu0 %v1111_v30 }
 0x1aa   : > { %1754 = vmatpush3.msra.mxu1 %v946_v43  ;;  %1653 = vmatprep.subr.mxu0 %v1126_v31  ;;  %v1120_v43 = vld [vmem:[#allocation11 + $0x88] sm:$0xff] }
 0x1ab   : > { %1755 = vmatprep.subr.mxu1 %v945_v44  ;;  %1654 = vmatpush3.msra.mxu0 %v1110_v32 }
 0x1ac   : > { %1756 = vmatpush3.msra.mxu1 %v945_v44  ;;  %1655 = vmatprep.subr.mxu0 %v1125_v33  ;;  %v1104_v44 = vld [vmem:[#allocation11 + $0x8] sm:$0xff] }
 0x1ad   : > { %1757 = vmatprep.subr.mxu1 %v944_v45  ;;  %1656 = vmatpush3.msra.mxu0 %v1109_v34 }
 0x1ae   : > { %1758 = vmatpush3.msra.mxu1 %v944_v45  ;;  %1657 = vmatprep.subr.mxu0 %v1124_v35  ;;  %v1119_v45 = vld [vmem:[#allocation11 + $0x80] sm:$0xff] }
 0x1af   : > { %1759 = vmatprep.subr.mxu1 %v943_v46  ;;  %1658 = vmatpush3.msra.mxu0 %v1108_v36 }
 0x1b0   : > { %1760 = vmatpush3.msra.mxu1 %v943_v46  ;;  %1659 = vmatprep.subr.mxu0 %v1123_v37  ;;  %v1103_v46 = vld [vmem:[#allocation11] sm:$0xff] }
 0x1b1   : > { %1761 = vmatprep.subr.mxu1 %v942_v47  ;;  %1660 = vmatpush3.msra.mxu0 %v1107_v38 }
 0x1b2   : > { %1762 = vmatpush3.msra.mxu1 %v942_v47  ;;  %1661 = vmatprep.subr.mxu0 %v1122_v39  ;;  %v1234_v47 = vld [vmem:[#allocation13 + $0x78] sm:$0xff] }
 0x1b3   : > { %1662 = vmatpush3.msra.mxu0 %v1106_v40  ;;  %1775 = vmatprep.subr.mxu1 %v1234_v47 }
 0x1b4   : > { %1663 = vmatprep.subr.mxu0 %v1121_v41 }
 0x1b5   : > { %1664 = vmatpush3.msra.mxu0 %v1105_v42 }
 0x1b6   : > { %1665 = vmatprep.subr.mxu0 %v1120_v43 }
 0x1b7   : > { %1666 = vmatpush3.msra.mxu0 %v1104_v44 }
 0x1b8   : > { %1667 = vmatprep.subr.mxu0 %v1119_v45 }
 0x1b9   : > { %1668 = vmatpush3.msra.mxu0 %v1103_v46 }
 0x251   : > { %v826_v55 = vpop.f32.mrf.mxu1 }
 0x252   : > { %v827_v57 = vadd.f32 %v826_v55, %v748_v53  ;;  %v1228_v55 = vld [vmem:[#allocation13 + $0x48] sm:$0xff] }
 0x253   : > { %v828_v56 = vpop.f32.mrf.mxu1 }
 0x254   : > { %v829_v58 = vadd.f32 %v828_v56, %v752_v54  ;;  %v1227_v56 = vld [vmem:[#allocation13 + $0x40] sm:$0xff] }
 0x255   : > { %v832_v59 = vpop.f32.mrf.mxu1  ;;  %v1727_v18 = vpop.f32.mrf.mxu0 }
 0x256   : > { %v934_v60 = vmul.f32 %v829_v58, %v827_v57  ;;  %v833_v62 = vadd.f32 %v832_v59, %v748_v53  ;;  %v921_v37 = vadd.f32 %v1727_v18, %v756_v25 }
 0x257   : > { %v834_v61 = vpop.f32.mrf.mxu1  ;;  %v915_v20 = vpop.f32.mrf.mxu0 }
 0x258   : > { %v835_v63 = vadd.f32 %v834_v61, %v752_v54  ;;  %1763 = vmatprep.mubr.f32.mxu1 %v934_v60  ;;  %v916_v32 = vadd.f32 %v915_v20, %v756_v25 }
 0x259   : > { %v838_v0 = vpop.f32.mrf.mxu1  ;;  %v1730_v21 = vpop.f32.mrf.mxu0 }
 0x25a   : > { %v935_v1 = vmul.f32 %v835_v63, %v833_v62  ;;  %v839_v6 = vadd.f32 %v838_v0, %v748_v53  ;;  %v931_v33 = vadd.f32 %v1730_v21, %v756_v25 }
 0x25b   : > { %v840_v2 = vpop.f32.mrf.mxu1  ;;  %v925_v24 = vpop.f32.mrf.mxu0 }
 0x25c   : > { %v841_v3 = vadd.f32 %v840_v2, %v752_v54  ;;  %1764 = vmatmul.mubr.f32.vlgmr.msra.gmra.mxu1 %v935_v1  ;;  %v938_v11 = vmul.f32 %v839_v6, %v829_v58  ;;  %v1225_v58 = vld [vmem:[#allocation13 + $0x30] sm:$0xff]  ;;  %v926_v27 = vadd.f32 %v925_v24, %v756_v25  ;;  %v1545_v24 = vld [vmem:[%s2639_s12] ss:$0 sm:$0xff] }
 0x25d   : > { %v844_v4 = vpop.f32.mrf.mxu1  ;;  %1776 = vmatpush3.msra.mxu1 %v1234_v47  ;;  %v1224_v47 = vld [vmem:[#allocation13 + $0x28] sm:$0xff] }
 0x25e   : > { %v936_v5 = vmul.f32 %v841_v3, %v827_v57  ;;  %v845_v9 = vadd.f32 %v844_v4, %v748_v53  ;;  %v940_v13 = vmul.f32 %v841_v3, %v839_v6  ;;  %1777 = vmatprep.subr.mxu1 %v1233_v48  ;;  %v1230_v53 = vld [vmem:[#allocation13 + $0x58] sm:$0xff] }
 0x25f   : > { %v846_v7 = vpop.f32.mrf.mxu1  ;;  %1778 = vmatpush3.msra.mxu1 %v1233_v48  ;;  %v1226_v57 = vld [vmem:[#allocation13 + $0x38] sm:$0xff]  ;;  %v1223_v48 = vld [vmem:[#allocation13 + $0x20] sm:$0xff] }
 0x260   : > { %v847_v8 = vadd.f32 %v846_v7, %v752_v54  ;;  %1766 = vmatprep.mubr.f32.mxu1 %v936_v5  ;;  %v939_v12 = vmul.f32 %v845_v9, %v835_v63  ;;  %1779 = vmatprep.subr.mxu1 %v1232_v50  ;;  %v1229_v54 = vld [vmem:[#allocation13 + $0x50] sm:$0xff] }
 0x261   : > { %1780 = vmatpush3.msra.mxu1 %v1232_v50  ;;  %v1222_v50 = vld [vmem:[#allocation13 + $0x18] sm:$0xff] }
 0x262   : > { %v937_v10 = vmul.f32 %v847_v8, %v833_v62  ;;  %v941_v14 = vmul.f32 %v847_v8, %v845_v9  ;;  %1781 = vmatprep.subr.mxu1 %v1231_v51 }
 0x263   : > { %1782 = vmatpush3.msra.mxu1 %v1231_v51  ;;  %v1221_v51 = vld [vmem:[#allocation13 + $0x10] sm:$0xff] }
 0x264   : > { %1767 = vmatmul.mubr.f32.gmra.mxu1 %v937_v10  ;;  %1783 = vmatprep.subr.mxu1 %v1230_v53 }
 0x265   : > { %1769 = vmatprep.mubr.f32.mxu1 %v938_v11  ;;  %1784 = vmatpush3.msra.mxu1 %v1230_v53  ;;  %v1220_v53 = vld [vmem:[#allocation13 + $0x8] sm:$0xff] }
 0x266   : > { %1785 = vmatprep.subr.mxu1 %v1229_v54 }
 0x267   : > { %1786 = vmatpush3.msra.mxu1 %v1229_v54  ;;  %v1219_v54 = vld [vmem:[#allocation13] sm:$0xff] }
 0x268   : > { %1770 = vmatmul.mubr.f32.gmra.mxu1 %v939_v12  ;;  %1787 = vmatprep.subr.mxu1 %v1228_v55 }
 0x269   : > { %1772 = vmatprep.mubr.f32.mxu1 %v940_v13  ;;  %1788 = vmatpush3.msra.mxu1 %v1228_v55 }
 0x26a   : > { %1789 = vmatprep.subr.mxu1 %v1227_v56 }
 0x26b   : > { %1790 = vmatpush3.msra.mxu1 %v1227_v56  ;;  %v1542_v56 = vld [vmem:[%s2635_s8] ss:$0 sm:$0xff] }
 0x26c   : > { %1773 = vmatmul.mubr.f32.gmra.mxu1 %v941_v14  ;;  %1791 = vmatprep.subr.mxu1 %v1226_v57 }
 0x26d   : > { %1792 = vmatpush3.msra.mxu1 %v1226_v57 }
 0x26e   : > { %1793 = vmatprep.subr.mxu1 %v1225_v58 }
 0x26f   : > { %1794 = vmatpush3.msra.mxu1 %v1225_v58 }
 0x270   : > { %1795 = vmatprep.subr.mxu1 %v1224_v47 }
 0x271   : > { %1796 = vmatpush3.msra.mxu1 %v1224_v47 }
 0x272   : > { %1797 = vmatprep.subr.mxu1 %v1223_v48 }
 0x273   : > { %1798 = vmatpush3.msra.mxu1 %v1223_v48 }
 0x274   : > { %1799 = vmatprep.subr.mxu1 %v1222_v50 }
 0x275   : > { %1800 = vmatpush3.msra.mxu1 %v1222_v50 }
 0x276   : > { %1801 = vmatprep.subr.mxu1 %v1221_v51 }
 0x277   : > { %1802 = vmatpush3.msra.mxu1 %v1221_v51 }
 0x278   : > { %1803 = vmatprep.subr.mxu1 %v1220_v53 }
 0x279   : > { %1804 = vmatpush3.msra.mxu1 %v1220_v53 }
 0x27a   : > { %1805 = vmatprep.subr.mxu1 %v1219_v54 }
 0x27b   : > { %1806 = vmatpush3.msra.mxu1 %v1219_v54 }
 0x31c   : > { %v1765_v59 = vpop.f32.mrf.mxu1 }
 0x31e   : > { %v1024_v60 = vpop.f32.mrf.mxu1 }
 0x324   : > { %v1768_v61 = vpop.f32.mrf.mxu1 }
 0x325   : > { %v1064_v62 = vsub.f32 %v1768_v61, %v1765_v59 }
 0x326   : > { %v1034_v63 = vpop.f32.mrf.mxu1 }
 0x327   : > { %v1063_v0 = vsub.f32 %v1034_v63, %v1024_v60  ;;  %v1067_v3 = vmul.f32 1.442695, %v1064_v62 }
 0x328   : > { %v1771_v1 = vpop.f32.mrf.mxu1 }
 0x329   : > { %v1065_v2 = vmul.f32 1.442695, %v1063_v0 }
 0x32a   : > { %v1044_v4 = vpop.f32.mrf.mxu1 }
 0x32b   : > { %1921 = vpow2.f32 %v1065_v2 }
 0x32c   : > { %v1774_v5 = vpop.f32.mrf.mxu1  ;;  %1923 = vpow2.f32 %v1067_v3  ;;  %v1543_v3 = vld [vmem:[%s2637_s10] ss:$0 sm:$0xff] }
 0x32d   : > { %v1076_v6 = vsub.f32 %v1774_v5, %v1771_v1 }
 0x32e   : > { %v1054_v7 = vpop.f32.mrf.mxu1 }
 0x32f   : > { %v1079_v8 = vmul.f32 1.442695, %v1076_v6  ;;  %v1075_v9 = vsub.f32 %v1054_v7, %v1044_v4 }
 0x331   : > { %1925 = vpow2.f32 %v1079_v8  ;;  %v1077_v10 = vmul.f32 1.442695, %v1075_v9 }
 0x333   : > { %1927 = vpow2.f32 %v1077_v10 }
 0x338   : > { %v1922_v11 = vpop.eup %1921 }
 0x339   : > { %v1069_v12 = vadd.f32 1.0, %v1922_v11  ;;  %v1924_v13 = vpop.eup %1923 }
 0x33a   : > { %v1070_v15 = vadd.f32 1.0, %v1924_v13 }
 0x33b   : > { %1929 = vrcp.f32 %v1069_v12 }
 0x33e   : > { %v1926_v14 = vpop.eup %1925 }
 0x33f   : > { %v1082_v16 = vadd.f32 1.0, %v1926_v14 }
 0x340   : > { %v1928_v17 = vpop.eup %1927 }
 0x341   : > { %1931 = vrcp.f32 %v1082_v16  ;;  %v1081_v19 = vadd.f32 1.0, %v1928_v17 }
 0x342   : > { %1933 = vrcp.f32 %v1070_v15 }
 0x343   : > { %1935 = vrcp.f32 %v1081_v19 }
 0x348   : > { %v1930_v23 = vpop.eup %1929 }
 0x349   : > { %v1089_v28 = vsub.f32 1.0, %v1930_v23  ;;  %v1087_v49 = vmul.f32 %v1930_v23, %v916_v32 }
 0x34b   : > { %v1091_v36 = vmul.f32 %v1089_v28, %v926_v27 }
 0x34d   : > { %v1093_v52 = vadd.f32 %v1091_v36, %v1087_v49 }
 0x34e   : > { %v1932_v26 = vpop.eup %1931 }
 0x34f   : > { %v1934_v29 = vpop.eup %1933  ;;  %v1098_v30 = vsub.f32 1.0, %v1932_v26  ;;  %v1096_v42 = vmul.f32 %v1932_v26, %v921_v37 }
 0x350   : > { %v1936_v31 = vpop.eup %1935  ;;  %v1090_v35 = vsub.f32 1.0, %v1934_v29  ;;  %v1088_v45 = vmul.f32 %v1934_v29, %v921_v37 }
 0x351   : > { %v1097_v34 = vsub.f32 1.0, %v1936_v31  ;;  %v1100_v38 = vmul.f32 %v1098_v30, %v931_v33  ;;  %v1095_v40 = vmul.f32 %v1936_v31, %v916_v32 }
 0x352   : > { %v1092_v43 = vmul.f32 %v1090_v35, %v931_v33 }
 0x353   : > { %v1099_v39 = vmul.f32 %v1097_v34, %v926_v27  ;;  %v1102_v44 = vadd.f32 %v1100_v38, %v1096_v42 }
 0x354   : > { %v1094_v46 = vadd.f32 %v1092_v43, %v1088_v45 }
 0x355   : > { %v1101_v41 = vadd.f32 %v1099_v39, %v1095_v40 }
 0x357   : > { %1206 = vmatprep.mubr.f32.mxu0 %v1101_v41 }
 0x358   : > { %1207 = vmatmul.mubr.f32.vlgmr.msra.gmra.mxu0 %v1093_v52 }
 0x359   : > { %1211 = vmatprep.mubr.f32.mxu0 %v1102_v44 }
 0x35c   : > { %1212 = vmatmul.mubr.f32.gmra.mxu0 %v1094_v46 }
 0x418   : > { %v1669_v55 = vpop.f32.mrf.mxu0 }
 0x41a   : > { %v1670_v57 = vpop.f32.mrf.mxu0 }
 0x41b   : > { %v1671_v58 = vadd.f32 %v1670_v57, %v1669_v55 }
 0x41c   : > { %v1672_v59 = vpop.f32.mrf.mxu0 }
 0x41d   : > { %v1209_v60 = vadd.f32 %v1671_v58, %v1542_v56 }
 0x41e   : > { %v1673_v61 = vpop.f32.mrf.mxu0 }
 0x41f   : > { %v1217_v62 = vmax.f32 %v1209_v60, 0.0  ;;  %v1674_v63 = vadd.f32 %v1673_v61, %v1672_v59 }
 0x421   : > { %v1214_v0 = vadd.f32 %v1674_v63, %v1542_v56  ;;  %1807 = vmatprep.mubr.f32.mxu1 %v1217_v62 }
 0x423   : > { %v1218_v1 = vmax.f32 %v1214_v0, 0.0 }
 0x425   : > { %1808 = vmatmul.mubr.f32.vlgmr.msra.gmra.mxu1 %v1218_v1 }
 0x4e5   : > { %v1809_v2 = vpop.f32.mrf.mxu1 }
 0x4e6   : > { %v1314_v6 = vadd.f32 %v1809_v2, %v1543_v3 }
 0x4e7   : > { %v1308_v4 = vpop.f32.mrf.mxu1 }
 0x4e8   : > { %v1309_v5 = vadd.f32 %v1543_v3, %v1308_v4 }
 0x4ea   : > { %1317 = vadd.xlane.f32.xlu0 %v1309_v5 }
 0x4ee   : > { %1319 = vadd.xlane.f32.xlu0 %v1314_v6 }
 0x573   : > { %v1318_v7 = vpop.xlane.xlu0 %1317 }
 0x574   : > { %v1322_v8 = vmul.f32 0.0078125, %v1318_v7 }
 0x576   : > { %v1324_v9 = vsub.f32 %v1309_v5, %v1322_v8 }
 0x577   : > { %v1320_v10 = vpop.xlane.xlu0 %1319 }
 0x578   : > { %v1323_v11 = vmul.f32 0.0078125, %v1320_v10  ;;  %v1326_v12 = vmul.f32 %v1324_v9, %v1324_v9 }
 0x57a   : > { %v1325_v13 = vsub.f32 %v1314_v6, %v1323_v11  ;;  %1328 = vadd.xlane.f32.xlu1 %v1326_v12 }
 0x57c   : > { %v1327_v14 = vmul.f32 %v1325_v13, %v1325_v13 }
 0x57e   : > { %1330 = vadd.xlane.f32.xlu1 %v1327_v14 }
 0x603   : > { %v1329_v15 = vpop.xlane.xlu1 %1328 }
 0x604   : > { %v1332_v16 = vmul.f32 0.0078125, %v1329_v15 }
 0x606   : > { %v1334_v17 = vadd.f32 1e-05, %v1332_v16 }
 0x607   : > { %v1331_v18 = vpop.xlane.xlu1 %1330 }
 0x608   : > { %1937 = vrsqrt.f32 %v1334_v17  ;;  %v1333_v19 = vmul.f32 0.0078125, %v1331_v18 }
 0x60a   : > { %v1335_v20 = vadd.f32 1e-05, %v1333_v19 }
 0x60c   : > { %1939 = vrsqrt.f32 %v1335_v20 }
 0x615   : > { %v1938_v21 = vpop.eup %1937 }
 0x616   : > { %v1338_v23 = vmul.f32 %v1938_v21, %v1324_v9 }
 0x618   : > { %v1347_v25 = vmul.f32 %v1544_v22, %v1338_v23 }
 0x619   : > { %v1940_v26 = vpop.eup %1939 }
 0x61a   : > { %v1356_v27 = vadd.f32 %v1545_v24, %v1347_v25  ;;  %v1339_v28 = vmul.f32 %v1940_v26, %v1325_v13 }
 0x61c   : > { %v1348_v29 = vmul.f32 %v1544_v22, %v1339_v28  ;;  %1358 = vst [vmem:[%s571_s24] sm:$0xff] %v1356_v27 }
 0x61e   : > { %v1357_v30 = vadd.f32 %v1545_v24, %v1348_v29 }
 0x620   : > { %1359 = vst [vmem:[%s571_s24 + $0x8] sm:$0xff] %v1357_v30 }
 0x621   : > { %2140 = shalt.err (!%p2137_p8)
}
 0x622   : > { %s2141_s30 = scalar_lea.hbm %s2582_s9, 256  ;;  %s2145_s18 = scalar_lea.hbm %s2685_s2, 512 }
 0x623   : > { %p2142_p3 = scmp.ne.s32.totalorder %s2582_s9, %s2141_s30  ;;  %p2146_p2 = scmp.lt.s32.totalorder %s2582_s9, %s2685_s2 }
 0x624   : > { %p2147_p10 = scmp.lt.s32.totalorder %s2145_s18, %s2141_s30 }
 0x625   : > { %p2143_p7 = pnand %p2142_p3, %p2686_p5 }
 0x626   : > { %p2148_p0 = por %p2147_p10, %p2146_p2 }
 0x627   : > { %p2144_p12 = pneg %p2143_p7 }
 0x629   : > { %p2149_p13 = pnand %p2148_p0, %p2144_p12 }
 0x62b   : > { %2152 = shalt.err (!%p2149_p13)
}
 0x62c   : > { %s2224_s6 = smov 128   ;;  %s2225_s23 = smov 8  }
 0x62d   : > { %1834 = dma.vmem_to_hbm [thread:$0]  (%p2686_p5), %s2584_s4, 256, %s2582_s9, %s1361_s20, %s2224_s6, %s2224_s6, %s2225_s23  }
 0x62e PF: > { %s2687_s24 = sld [smem:[#allocation24_spill]]  ;;  %s1389_s15 = sand.u32 1, %s2195_s25  }
 0x62f   : > { %p2689_p11 = scmp.ge.s32.totalorder %s2207_s28, 2  ;;  %s1390_s21 = scalar_lea.sflag [#allocation4], %s1389_s15 }
 0x634   : > { %p2688_p9 = scmp.ne.s32.totalorder %s2687_s24, 0 }
 0x636   : > { %p1860_p1 = pnand %p2689_p11, %p2688_p9 }
 0x638   : > { %p1861_p4 = pneg %p1860_p1 }
 0x63a   : > { %2190 = dma.done.wait (%p1861_p4), %s1390_s21, 256  }
 0x63b   : > { %2192 = vsyncadd (%p1861_p4), %s1390_s21, 4294967040  ;;  %s2690_s28 = sld [smem:[#allocation22_spill]]  ;;  %s2693_s25 = smov %s2199_s26 }
 0x63c   : > { %s2691_s7 = sld [smem:[#allocation21_spill]] }
 0x63d   : > { %s2692_s27 = sld [smem:[#allocation23_spill]] }
 0x641   : > { %p31_p6 = scmp.ge.s32.totalorder %s2690_s28, 4  }
 0x642   : > { %s2694_s26 = smov %s2691_s7 }
 0x643   :  { %33 = sbr.rel (!%p31_p6) target bundleno = 17 (0x11), region = 150 }
 0x648   :  { %1395 = vsyncpa [#allocation3], 1 }
 0x649   :  { %1397 = vsyncpa [#allocation3 + $0x1], 1 }
 0x64a   :  { %1398 = vsyncpa [#allocation6], 1 }
 0x64b   :  { %1400 = vsyncpa [#allocation6 + $0x1], 1 }
 0x64c   :  { %1401 = vsyncpa [#allocation9], 1 }
 0x64d   :  { %1402 = vsyncpa [#allocation12], 1 }
 0x64e   :  { %1403 = vsyncpa [#allocation4], 1 }
 0x64f   :  { %1405 = vsyncpa [#allocation4 + $0x1], 1 }

// kernel: tpu_custom_call.1
= control target key start
LH: loop header
LB: loop body
LE: loop exit
PB: predicated region body
PF: predicated region fallthrough
CT: control target
= control target key end

     0   :  { %s2627_s0 = inlined_call_operand.hbm [shape: f32[32,256], index: 0, kind: input, shape index: {}]   ;;  %s2628_s1 = inlined_call_operand.hbm [shape: f32[32,128], index: 1, kind: input, shape index: {}]   ;;  %s2629_s2 = inlined_call_operand.hbm [shape: f32[256,128], index: 2, kind: input, shape index: {}]   ;;  %s2630_s3 = inlined_call_operand.vmem [shape: f32[1,128], index: 3, kind: input, shape index: {}]   ;;  %s2631_s4 = inlined_call_operand.hbm [shape: f32[128,384], index: 4, kind: input, shape index: {}]   ;;  %s2632_s5 = inlined_call_operand.vmem [shape: f32[1,384], index: 5, kind: input, shape index: {}]   ;;  %s2633_s6 = inlined_call_operand.hbm [shape: f32[128,128], index: 6, kind: input, shape index: {}]   ;;  %s2634_s7 = inlined_call_operand.hbm [shape: f32[256,128], index: 7, kind: input, shape index: {}]   ;;  %s2635_s8 = inlined_call_operand.vmem [shape: f32[1,128], index: 8, kind: input, shape index: {}]   ;;  %s2636_s9 = inlined_call_operand.hbm [shape: f32[128,128], index: 9, kind: input, shape index: {}]   ;;  %s2637_s10 = inlined_call_operand.vmem [shape: f32[1,128], index: 10, kind: input, shape index: {}]   ;;  %s2638_s11 = inlined_call_operand.vmem [shape: f32[1,128], index: 11, kind: input, shape index: {}]   ;;  %s2639_s12 = inlined_call_operand.vmem [shape: f32[1,128], index: 12, kind: input, shape index: {}]   ;;  %s2640_s13 = inlined_call_operand.hbm [shape: f32[32,128], index: 13, kind: output, shape index: {}]  }
   0x1   :  { %2651 = sst [smem:[#allocation25_spill]] %s2627_s0 }
   0x2   :  { %2652 = sst [smem:[#allocation26_spill]] %s2629_s2 }
   0x3   :  { %2653 = sst [smem:[#allocation27_spill]] %s2631_s4 }
   0x4   :  { %2654 = sst [smem:[#allocation28_spill]] %s2633_s6 }
   0x5   :  { %2655 = sst [smem:[#allocation29_spill]] %s2634_s7 }
   0x6   :  { %2656 = sst [smem:[#allocation30_spill]] %s2636_s9 }
   0x7   :  { %2657 = sst [smem:[#allocation31_spill]] %s2640_s13 }
   0x8   :  { %18 = vsyncpa [#allocation3], 0 }
   0x9   :  { %20 = vsyncpa [#allocation3 + $0x1], 0 }
   0xa   :  { %21 = vsyncpa [#allocation6], 0 }
   0xb   :  { %23 = vsyncpa [#allocation6 + $0x1], 0 }
   0xc   :  { %24 = vsyncpa [#allocation9], 0 }
   0xd   :  { %25 = vsyncpa [#allocation12], 0 }
   0xe   :  { %26 = vsyncpa [#allocation4], 0 }
   0xf   :  { %28 = vsyncpa [#allocation4 + $0x1], 0  ;;  %s2296_s25 = smov 0   ;;  %s2298_s26 = smov 0  }
  0x10   :  { %s2300_s27 = smov 0   ;;  %s2302_s28 = smov 0  }
  0x11 LB: > { %2658 = sst [smem:[#allocation21_spill]] %s2203_s27  ;;  %s2209_s29 = smov [#allocation7]   ;;  %s2207_s28 = sphi %s2302_s28, %s2690_s28   ;;  %s2203_s27 = sphi %s2300_s27, %s2692_s27   ;;  %s2199_s26 = sphi %s2298_s26, %s2694_s26   ;;  %s2195_s25 = sphi %s2296_s25, %s2693_s25  }
  0x12   : > { %s360_s30 = sshll.u32 %s2209_s29, 4  ;;  %s2317_s14 = sadd.s32 4294967295, %s2207_s28   ;;  %s361_s30 = int_to_ptr.vmem [resolvable:$true] %s360_s30 }
  0x13   : > { %p1518_p0 = scmp.ge.s32.totalorder %s2207_s28, 1  ;;  %p2644_p1 = scmp.eq.s32.totalorder %s2317_s14, 0 }
  0x14   : > { %p348_p2 = scmp.lt.s32.totalorder %s2207_s28, 3  ;;  %s2210_s16 = smov [#allocation8]  }
  0x15   : > { %s376_s17 = sshll.u32 %s2210_s16, 4  ;;  %s2211_s19 = smov [#allocation11]   ;;  %s2335_s17 = int_to_ptr.vmem [resolvable:$true] %s376_s17 }
  0x16   : > { %p2322_p3 = pnand %p1518_p0, %p348_p2  ;;  %s2337_s20 = sshll.u32 %s2211_s19, 4  ;;  %s406_s20 = int_to_ptr.vmem [resolvable:$true] %s2337_s20 }
  0x17   : > { %s1952_s22 = scalar_lea.vmem %s361_s30, 4096  ;;  %p1960_p11 = scmp.lt.s32.totalorder %s361_s30, %s361_s30 }
  0x18   : > { %p1836_p5 = pneg %p2322_p3  ;;  %p1953_p8 = scmp.ne.s32.totalorder %s361_s30, %s1952_s22 }
  0x19   : > { %p1961_p12 = scmp.lt.s32.totalorder %s1952_s22, %s1952_s22 }
  0x1a   : > { %p2331_p6 = pnand %p1836_p5, %p2644_p1 }
  0x1b   : > { %p1962_p13 = por %p1961_p12, %p1960_p11 }
  0x1c   : > { %p2341_p7 = pneg %p2331_p6 }
  0x1e   : > { %p1955_p9 = pnand %p1953_p8, %p2341_p7 }
  0x20   : > { %p1956_p10 = pneg %p1955_p9 }
  0x22   : > { %p1963_p0 = pnand %p1962_p13, %p1956_p10 }
  0x24   : > { %1966 = shalt.err (!%p1963_p0)
}
  0x25   : > { %s2642_s23 = smov 128   ;;  %s2643_s24 = smov 8  }
  0x26   : > { %s2662_s2 = sld [smem:[#allocation26_spill]]  ;;  %s1978_s19 = scalar_lea.vmem %s2335_s17, 6144 }
  0x27   : > { %p1979_p2 = scmp.ne.s32.totalorder %s2335_s17, %s1978_s19  ;;  %p1986_p9 = scmp.lt.s32.totalorder %s2335_s17, %s2335_s17 }
  0x28   : > { %p1987_p10 = scmp.lt.s32.totalorder %s1978_s19, %s1978_s19 }
  0x29   : > { %p1981_p5 = pnand %p1979_p2, %p2341_p7 }
  0x2a   : > { %p1988_p11 = por %p1987_p10, %p1986_p9 }
  0x2b   : > { %p1982_p8 = pneg %p1981_p5 }
  0x2c   : > { %1839 = dma.hbm_to_vmem [thread:$0]  (!%p2331_p6), %s2662_s2, 4096, %s361_s30, [#allocation6], %s2642_s23, %s2642_s23, %s2643_s24  }
  0x2d   : > { %p1989_p12 = pnand %p1988_p11, %p1982_p8 }
  0x2f   : > { %1992 = shalt.err (!%p1989_p12)
}
  0x30   : > { %s2214_s22 = smov 384   ;;  %s2215_s13 = smov 24  }
  0x31   : > { %s2663_s4 = sld [smem:[#allocation27_spill]]  ;;  %s2004_s16 = scalar_lea.vmem %s406_s20, 4096 }
  0x32   : > { %p2005_p13 = scmp.ne.s32.totalorder %s406_s20, %s2004_s16  ;;  %p2012_p5 = scmp.lt.s32.totalorder %s406_s20, %s406_s20 }
  0x33   : > { %p2013_p8 = scmp.lt.s32.totalorder %s2004_s16, %s2004_s16 }
  0x34   : > { %p2007_p0 = pnand %p2005_p13, %p2341_p7 }
  0x35   : > { %p2014_p9 = por %p2013_p8, %p2012_p5 }
  0x36   : > { %p2008_p2 = pneg %p2007_p0 }
  0x37   : > { %1842 = dma.hbm_to_vmem [thread:$0]  (!%p2331_p6), %s2663_s4, 6144, %s2335_s17, [#allocation9], %s2214_s22, %s2214_s22, %s2215_s13  }
  0x38   : > { %p2015_p10 = pnand %p2014_p9, %p2008_p2 }
  0x3a   : > { %2018 = shalt.err (!%p2015_p10)
}
  0x3b   : > { %s2664_s7 = sld [smem:[#allocation29_spill]]  ;;  %s2216_s13 = smov [#allocation10]  }
  0x3c   : > { %s392_s17 = sshll.u32 %s2216_s13, 4  ;;  %s2217_s22 = smov [#allocation13]   ;;  %s393_s17 = int_to_ptr.vmem [resolvable:$true] %s392_s17 }
  0x3d   : > { %s421_s29 = sshll.u32 %s2217_s22, 4  ;;  %s2030_s30 = scalar_lea.vmem %s393_s17, 2048  ;;  %s422_s29 = int_to_ptr.vmem [resolvable:$true] %s421_s29 }
  0x3e   : > { %p2031_p11 = scmp.ne.s32.totalorder %s393_s17, %s2030_s30  ;;  %p2038_p0 = scmp.lt.s32.totalorder %s393_s17, %s393_s17 }
  0x3f   : > { %p2039_p2 = scmp.lt.s32.totalorder %s2030_s30, %s2030_s30 }
  0x40   : > { %p2033_p12 = pnand %p2031_p11, %p2341_p7 }
  0x41   : > { %1848 = dma.hbm_to_vmem [thread:$0]  (!%p2331_p6), %s2664_s7, 4096, %s406_s20, [#allocation12], %s2642_s23, %s2642_s23, %s2643_s24  }
  0x42   : > { %p2034_p13 = pneg %p2033_p12  ;;  %p2040_p5 = por %p2039_p2, %p2038_p0 }
  0x44   : > { %p2041_p8 = pnand %p2040_p5, %p2034_p13 }
  0x46   : > { %2044 = shalt.err (!%p2041_p8)
}
  0x47   : > { %s2665_s6 = sld [smem:[#allocation28_spill]]  ;;  %s2056_s16 = scalar_lea.vmem %s422_s29, 2048 }
  0x48   : > { %p2057_p9 = scmp.ne.s32.totalorder %s422_s29, %s2056_s16  ;;  %p2064_p12 = scmp.lt.s32.totalorder %s422_s29, %s422_s29 }
  0x49   : > { %p2065_p0 = scmp.lt.s32.totalorder %s2056_s16, %s2056_s16 }
  0x4a   : > { %p2059_p10 = pnand %p2057_p9, %p2341_p7 }
  0x4b   : > { %p2066_p13 = por %p2065_p0, %p2064_p12 }
  0x4c   : > { %p2060_p11 = pneg %p2059_p10 }
  0x4d   : > { %1845 = dma.hbm_to_vmem [thread:$0]  (!%p2331_p6), %s2665_s6, 2048, %s393_s17, [#allocation9], %s2642_s23, %s2642_s23, %s2643_s24  }
  0x4e   : > { %p2067_p2 = pnand %p2066_p13, %p2060_p11 }
  0x50   : > { %2070 = shalt.err (!%p2067_p2)
}
  0x51   : > { %s2666_s9 = sld [smem:[#allocation30_spill]]  ;;  %s1517_s18 = sadd.s32 4294967294, %s2207_s28  }
  0x52   : > { %s2400_s21 = sadd.s32 1, %s2207_s28   ;;  %s41_s17 = sadd.s32 1, %s2203_s27 }
  0x53   : > { %2667 = sst [smem:[#allocation22_spill]] %s2400_s21  ;;  %s38_s22 = ssub.s32 %s2207_s28, %s2400_s21 }
  0x54   : > { %p48_p7 = scmp.ne.s32.totalorder %s2203_s27, %s2199_s26  ;;  %p39_p5 = scmp.eq.s32.totalorder %s38_s22, 0 }
  0x55   : > { %p49_p8 = scmp.eq.s32.totalorder %s2207_s28, 0  ;;  %p54_p9 = scmp.ne.s32.totalorder %s2199_s26, %s2195_s25 }
  0x56   : > { %p335_p10 = scmp.eq.s32.totalorder %s2317_s14, 1  ;;  %p341_p0 = scmp.eq.s32.totalorder %s1517_s18, 1 }
  0x57   : > { %1851 = dma.hbm_to_vmem [thread:$0]  (!%p2331_p6), %s2666_s9, 2048, %s422_s29, [#allocation12], %s2642_s23, %s2642_s23, %s2643_s24  }
  0x58   : > { %s2412_s30 = scalar_select %p39_p5, %s2203_s27, %s41_s17  }
  0x59   : > { %p50_p11 = por %p49_p8, %p48_p7  ;;  %p2416_p12 = por %p2644_p1, %p54_p9 }
  0x5a   : > { %2668 = sst [smem:[#allocation23_spill]] %s2412_s30  ;;  %p2420_p6 = por %p335_p10, %p48_p7 }
  0x5b   : > { %s2669_s2 = scalar_select %p2416_p12, 1, 0 }
  0x5c   : > { %s2670_s29 = scalar_select %p2420_p6, 1, 0 }
  0x5d   : > { %p1868_p13 = scmp.lt.s32.totalorder %s2207_s28, 2  ;;  %s2426_s20 = sand.u32 1, %s2203_s27  }
  0x5e   : > { %p2428_p2 = por %p341_p0, %p54_p9  ;;  %s1525_s19 = sshll.u32 %s2426_s20, 5 }
  0x5f   : > { %s1552_s13 = sshll.u32 %s2207_s28, 9  ;;  %s2673_s0 = sld [smem:[#allocation25_spill]] }
  0x60   : > { %s2671_s16 = scalar_select %p2428_p2, 1, 0 }
  0x61   : > { %s448_s18 = scalar_lea.vmem [#allocation2], %s1525_s19  ;;  %p2439_p7 = pnand %p1868_p13, %p50_p11 }
  0x62   : > { %2672 = sst [smem:[#allocation24_spill]] %s2671_s16  ;;  %s456_s24 = sshll.u32 %s448_s18, 4  ;;  %s2443_s24 = int_to_ptr.vmem [resolvable:$true] %s456_s24 }
  0x63   : > { %p2073_p8 = pneg %p2439_p7 }
  0x65   : > { %s2437_s23 = scalar_lea.hbm %s2673_s0, %s1552_s13  ;;  %s2076_s17 = scalar_lea.hbm %s2673_s0, 1024 }
  0x66   : > { %s2071_s7 = scalar_lea.hbm %s2437_s23, 512  ;;  %p2077_p11 = scmp.lt.s32.totalorder %s2437_s23, %s2673_s0 }
  0x67   : > { %p2072_p5 = scmp.ne.s32.totalorder %s2437_s23, %s2071_s7  ;;  %p2078_p0 = scmp.lt.s32.totalorder %s2076_s17, %s2071_s7 }
  0x69   : > { %p2074_p9 = pnand %p2073_p8, %p2072_p5  ;;  %p2079_p13 = por %p2078_p0, %p2077_p11 }
  0x6b   : > { %p2075_p10 = pneg %p2074_p9 }
  0x6d   : > { %p2080_p4 = pnand %p2079_p13, %p2075_p10 }
  0x6f   : > { %2083 = shalt.err (!%p2080_p4)
}
  0x70   : > { %s2084_s6 = scalar_lea.vmem %s2443_s24, 512  ;;  %s2218_s13 = smov [#allocation2]  }
  0x71   : > { %p2085_p1 = scmp.ne.s32.totalorder %s2443_s24, %s2084_s6  ;;  %s2089_s19 = sshll.u32 %s2218_s13, 4  ;;  %s2090_s19 = int_to_ptr.vmem [resolvable:$false] %s2089_s19 }
  0x72   : > { %s2091_s9 = scalar_lea.vmem %s2090_s19, 1024  ;;  %p2092_p2 = scmp.lt.s32.totalorder %s2443_s24, %s2090_s19 }
  0x73   : > { %p2087_p5 = pnand %p2085_p1, %p2073_p8  ;;  %p2093_p6 = scmp.lt.s32.totalorder %s2091_s9, %s2084_s6 }
  0x75   : > { %p2088_p9 = pneg %p2087_p5  ;;  %p2094_p12 = por %p2093_p6, %p2092_p2 }
  0x77   : > { %p2095_p11 = pnand %p2094_p12, %p2088_p9 }
  0x79   : > { %2098 = shalt.err (!%p2095_p11)
}
  0x7a   : > { %s2219_s7 = smov 256   ;;  %s2220_s17 = smov 16  }
  0x7b   : > { %s2675_s22 = scalar_lea.sflag [#allocation3], %s2426_s20  ;;  %s466_s18 = sand.u32 1, %s2207_s28  }
  0x7c   : > { %1855 = dma.hbm_to_vmem [thread:$0]  (!%p2439_p7), %s2437_s23, 512, %s2443_s24, %s2675_s22, %s2219_s7, %s2219_s7, %s2220_s17  }
  0x7d   : > { %s1529_s13 = sshll.u32 %s2426_s20, 4  ;;  %s1553_s19 = sshll.u32 %s2207_s28, 8 }
  0x7e   : > { %s470_s6 = scalar_lea.vmem [#allocation5], %s1529_s13  ;;  %s2478_s27 = scalar_lea.hbm %s2628_s1, %s1553_s19 }
  0x7f   : > { %s477_s9 = sshll.u32 %s470_s6, 4  ;;  %s467_s21 = scalar_lea.sflag [#allocation6], %s466_s18  ;;  %s2480_s9 = int_to_ptr.vmem [resolvable:$true] %s477_s9 }
  0x80   : > { %s2099_s16 = scalar_lea.hbm %s2478_s27, 256  ;;  %s2104_s20 = scalar_lea.hbm %s2628_s1, 512 }
  0x81   : > { %p2100_p1 = scmp.ne.s32.totalorder %s2478_s27, %s2099_s16  ;;  %p2105_p6 = scmp.lt.s32.totalorder %s2478_s27, %s2628_s1 }
  0x82   : > { %p2106_p2 = scmp.lt.s32.totalorder %s2104_s20, %s2099_s16 }
  0x83   : > { %p2102_p4 = pnand %p2100_p1, %p2073_p8 }
  0x84   : > { %p2107_p10 = por %p2106_p2, %p2105_p6 }
  0x85   : > { %p2103_p12 = pneg %p2102_p4 }
  0x87   : > { %p2108_p0 = pnand %p2107_p10, %p2103_p12 }
  0x89   : > { %2111 = shalt.err (!%p2108_p0)
}
  0x8a   : > { %s2112_s30 = scalar_lea.vmem %s2480_s9, 256  ;;  %s2221_s17 = smov [#allocation5]  }
  0x8b   : > { %p2113_p13 = scmp.ne.s32.totalorder %s2480_s9, %s2112_s30  ;;  %s2117_s22 = sshll.u32 %s2221_s17, 4  ;;  %s2118_s22 = int_to_ptr.vmem [resolvable:$false] %s2117_s22 }
  0x8c   : > { %s2119_s18 = scalar_lea.vmem %s2118_s22, 512  ;;  %p2120_p11 = scmp.lt.s32.totalorder %s2480_s9, %s2118_s22 }
  0x8d   : > { %p2115_p5 = pnand %p2113_p13, %p2073_p8  ;;  %p2121_p1 = scmp.lt.s32.totalorder %s2119_s18, %s2112_s30 }
  0x8f   : > { %p2116_p9 = pneg %p2115_p5  ;;  %p2122_p4 = por %p2121_p1, %p2120_p11 }
  0x91   : > { %p2123_p6 = pnand %p2122_p4, %p2116_p9 }
  0x93   : > { %2126 = shalt.err (!%p2123_p6)
}
  0x94   : > { %s2676_s16 = smov 8   ;;  %s2677_s13 = smov 128  }
  0x95   : > { %1858 = dma.hbm_to_vmem [thread:$0]  (!%p2439_p7), %s2478_s27, 256, %s2480_s9, %s467_s21, %s2677_s13, %s2677_s13, %s2676_s16  }
  0x96   : > { %489 = sbr.rel (%p2322_p3) target bundleno = 1582 (0x62e), region = 72  ;;  %s2510_s19 = sand.u32 (!%p2322_p3), 1, %s2199_s26  }
  0x97   : > { %s1533_s6 = sshll.u32 (!%p2322_p3), %s2510_s19, 5  ;;  %s492_s23 = scalar_lea.sflag (!%p2322_p3), [#allocation3], %s2510_s19 }
  0x98   : > { %s2514_s24 = scalar_lea.vmem (!%p2322_p3), [#allocation2], %s1533_s6  ;;  %p2678_p8 = scmp.ne.s32.totalorder (!%p2322_p3), %s2669_s2, 0 }
  0x9b   : > { %2170 = dma.done.wait (%p2678_p8), %s492_s23, 512  }
  0x9c   : > { %2172 = vsyncadd (%p2678_p8), %s492_s23, 4294966784  ;;  %s500_s4 = sand.u32 1, %s2317_s14   ;;  %s1534_s27 = sshll.u32 %s2510_s19, 4 }
  0x9d   : > { %s501_s15 = scalar_lea.sflag [#allocation6], %s500_s4  ;;  %s2524_s21 = scalar_lea.vmem [#allocation5], %s1534_s27 }
  0x9e   : > { %2174 = dma.done.wait (%p2678_p8), %s501_s15, 256  }
  0x9f   : > { %2176 = vsyncadd (%p2678_p8), %s501_s15, 4294967040  ;;  %p2679_p3 = scmp.eq.s32.totalorder %s2317_s14, 0 }
  0xa1   : > { %2178 = dma.done.wait (%p2679_p3), [#allocation6], 4096   ;;  %p2680_p7 = pmov %p2679_p3 }
  0xa2   : > { %p2681_p12 = pmov %p2679_p3 }
  0xa3   : > { %2180 = vsyncadd (%p2680_p7), [#allocation6], 4294963200 }
  0xa4   : > { %2182 = dma.done.wait (%p2681_p12), [#allocation9], 8192   ;;  %p2682_p2 = pmov %p2679_p3 }
  0xa6   : > { %2184 = vsyncadd (%p2682_p2), [#allocation9], 4294959104  ;;  %p2683_p10 = pmov %p2682_p2 }
  0xa7   : > { %p2684_p0 = pmov %p2682_p2 }
  0xa8   : > { %2186 = dma.done.wait (%p2683_p10), [#allocation12], 6144  }
  0xa9   : > { %2188 = vsyncadd (%p2684_p0), [#allocation12], 4294961152  ;;  %v612_v0 = vld [vmem:[#allocation7 + $0xf8] sm:$0xff]  ;;  %v611_v2 = vld [vmem:[#allocation7 + $0xf0] sm:$0xff]  ;;  %s1554_s23 = sshll.u32 %s2317_s14, 8  ;;  %s2685_s2 = sld [smem:[#allocation31_spill]] }
  0xaa   : > { %v596_v1 = vld [vmem:[#allocation7 + $0x78] sm:$0xff]  ;;  %1555 = vmatprep.subr.mxu0 %v612_v0  ;;  %v595_v3 = vld [vmem:[#allocation7 + $0x70] sm:$0xff]  ;;  %v610_v4 = vld [vmem:[#allocation7 + $0xe8] sm:$0xff]  ;;  %s1361_s20 = scalar_lea.sflag [#allocation4], %s2510_s19  ;;  %p2686_p5 = scmp.ne.s32.totalorder %s2670_s29, 0 }
  0xab   : > { %1556 = vmatpush3.msra.mxu0 %v596_v1  ;;  %v594_v5 = vld [vmem:[#allocation7 + $0x68] sm:$0xff]  ;;  %v609_v6 = vld [vmem:[#allocation7 + $0xe0] sm:$0xff]  ;;  %v608_v8 = vld [vmem:[#allocation7 + $0xd8] sm:$0xff]  ;;  %s2223_s14 = smov [#allocation14]  }
  0xac   : > { %1557 = vmatprep.subr.mxu0 %v611_v2  ;;  %v593_v7 = vld [vmem:[#allocation7 + $0x60] sm:$0xff]  ;;  %v592_v9 = vld [vmem:[#allocation7 + $0x58] sm:$0xff]  ;;  %v607_v10 = vld [vmem:[#allocation7 + $0xd0] sm:$0xff] }
  0xad   : > { %1558 = vmatpush3.msra.mxu0 %v595_v3  ;;  %v591_v11 = vld [vmem:[#allocation7 + $0x50] sm:$0xff]  ;;  %v606_v12 = vld [vmem:[#allocation7 + $0xc8] sm:$0xff]  ;;  %v605_v15 = vld [vmem:[#allocation7 + $0xc0] sm:$0xff] }
  0xae   : > { %1559 = vmatprep.subr.mxu0 %v610_v4  ;;  %v576_v13 = vld [vmem:[%s2514_s24 + $0x8] sm:$0xff]  ;;  %v741_v16 = vld [vmem:[#allocation8 + $0x170] sm:$0xff]  ;;  %v738_v18 = vld [vmem:[#allocation8 + $0x158] sm:$0xff] }
  0xaf   : > { %1560 = vmatpush3.msra.mxu0 %v594_v5  ;;  %v590_v14 = vld [vmem:[#allocation7 + $0x48] sm:$0xff]  ;;  %684 = vmatprep.mubr.f32.mxu0 %v576_v13  ;;  %v589_v19 = vld [vmem:[#allocation7 + $0x40] sm:$0xff]  ;;  %v737_v20 = vld [vmem:[#allocation8 + $0x150] sm:$0xff]  ;;  %s2582_s9 = scalar_lea.hbm %s2685_s2, %s1554_s23 }
  0xb0   : > { %1561 = vmatprep.subr.mxu0 %v609_v6  ;;  %v740_v17 = vld [vmem:[#allocation8 + $0x168] sm:$0xff]  ;;  %760 = vmatprep.subr.mxu1 %v741_v16  ;;  %v604_v21 = vld [vmem:[#allocation7 + $0xb8] sm:$0xff]  ;;  %v735_v22 = vld [vmem:[#allocation8 + $0x140] sm:$0xff] }
  0xb1   : > { %1562 = vmatpush3.msra.mxu0 %v593_v7  ;;  %761 = vmatpush1.msra.mxu1 %v740_v17  ;;  %v588_v23 = vld [vmem:[#allocation7 + $0x38] sm:$0xff]  ;;  %v603_v25 = vld [vmem:[#allocation7 + $0xb0] sm:$0xff]  ;;  %v732_v26 = vld [vmem:[#allocation8 + $0x128] sm:$0xff] }
  0xb2   : > { %1563 = vmatprep.subr.mxu0 %v608_v8  ;;  %762 = vmatprep.subr.mxu1 %v738_v18  ;;  %v734_v24 = vld [vmem:[#allocation8 + $0x138] sm:$0xff]  ;;  %v587_v27 = vld [vmem:[#allocation7 + $0x30] sm:$0xff]  ;;  %v731_v28 = vld [vmem:[#allocation8 + $0x120] sm:$0xff]  ;;  %v2222_v18 = vmov 0.0  }
  0xb3   : > { %1564 = vmatpush3.msra.mxu0 %v592_v9  ;;  %763 = vmatpush1.msra.mxu1 %v737_v20  ;;  %v602_v29 = vld [vmem:[#allocation7 + $0xa8] sm:$0xff]  ;;  %v729_v30 = vld [vmem:[#allocation8 + $0x110] sm:$0xff]  ;;  %v601_v33 = vld [vmem:[#allocation7 + $0xa0] sm:$0xff] }
  0xb4   : > { %1565 = vmatprep.subr.mxu0 %v607_v10  ;;  %764 = vmatprep.subr.mxu1 %v735_v22  ;;  %v586_v31 = vld [vmem:[#allocation7 + $0x28] sm:$0xff]  ;;  %v726_v34 = vld [vmem:[#allocation8 + $0xf8] sm:$0xff]  ;;  %v585_v35 = vld [vmem:[#allocation7 + $0x20] sm:$0xff] }
  0xb5   : > { %1566 = vmatpush3.msra.mxu0 %v591_v11  ;;  %765 = vmatpush1.msra.mxu1 %v734_v24  ;;  %v728_v32 = vld [vmem:[#allocation8 + $0x108] sm:$0xff]  ;;  %v725_v36 = vld [vmem:[#allocation8 + $0xf0] sm:$0xff]  ;;  %v600_v37 = vld [vmem:[#allocation7 + $0x98] sm:$0xff] }
  0xb6   : > { %1567 = vmatprep.subr.mxu0 %v606_v12  ;;  %766 = vmatprep.subr.mxu1 %v732_v26  ;;  %v723_v38 = vld [vmem:[#allocation8 + $0xe0] sm:$0xff]  ;;  %v584_v39 = vld [vmem:[#allocation7 + $0x18] sm:$0xff]  ;;  %v599_v41 = vld [vmem:[#allocation7 + $0x90] sm:$0xff] }
  0xb7   : > { %1568 = vmatpush3.msra.mxu0 %v590_v14  ;;  %767 = vmatpush1.msra.mxu1 %v731_v28  ;;  %v722_v40 = vld [vmem:[#allocation8 + $0xd8] sm:$0xff]  ;;  %v720_v42 = vld [vmem:[#allocation8 + $0xc8] sm:$0xff]  ;;  %v583_v43 = vld [vmem:[#allocation7 + $0x10] sm:$0xff] }
  0xb8   : > { %1569 = vmatprep.subr.mxu0 %v605_v15  ;;  %768 = vmatprep.subr.mxu1 %v729_v30  ;;  %v719_v44 = vld [vmem:[#allocation8 + $0xc0] sm:$0xff]  ;;  %v598_v45 = vld [vmem:[#allocation7 + $0x88] sm:$0xff]  ;;  %v717_v46 = vld [vmem:[#allocation8 + $0xb0] sm:$0xff] }
  0xb9   : > { %1570 = vmatpush3.msra.mxu0 %v589_v19  ;;  %769 = vmatpush1.msra.mxu1 %v728_v32  ;;  %v582_v47 = vld [vmem:[#allocation7 + $0x8] sm:$0xff]  ;;  %v597_v49 = vld [vmem:[#allocation7 + $0x80] sm:$0xff]  ;;  %v714_v50 = vld [vmem:[#allocation8 + $0x98] sm:$0xff] }
  0xba   : > { %1571 = vmatprep.subr.mxu0 %v604_v21  ;;  %770 = vmatprep.subr.mxu1 %v726_v34  ;;  %v716_v48 = vld [vmem:[#allocation8 + $0xa8] sm:$0xff]  ;;  %v581_v51 = vld [vmem:[#allocation7] sm:$0xff]  ;;  %v713_v52 = vld [vmem:[#allocation8 + $0x90] sm:$0xff] }
  0xbb   : > { %1572 = vmatpush3.msra.mxu0 %v588_v23  ;;  %771 = vmatpush1.msra.mxu1 %v725_v36  ;;  %v575_v53 = vld [vmem:[%s2514_s24] sm:$0xff]  ;;  %v742_v54 = vld [vmem:[#allocation8 + $0x178] sm:$0xff]  ;;  %v577_v59 = vld [vmem:[%s2514_s24 + $0x10] sm:$0xff] }
  0xbc   : > { %1573 = vmatprep.subr.mxu0 %v603_v25  ;;  %772 = vmatprep.subr.mxu1 %v723_v38  ;;  %v578_v55 = vld [vmem:[%s2514_s24 + $0x18] sm:$0xff]  ;;  %v739_v56 = vld [vmem:[#allocation8 + $0x160] sm:$0xff]  ;;  %v736_v60 = vld [vmem:[#allocation8 + $0x148] sm:$0xff]  ;;  %s571_s24 = scalar_lea.vmem [#allocation14], %s1534_s27  ;;  %s2131_s27 = sshll.u32 %s2223_s14, 4  ;;  %s2132_s27 = int_to_ptr.vmem [resolvable:$false] %s2131_s27 }
  0xbd   : > { %1574 = vmatpush3.msra.mxu0 %v587_v27  ;;  %773 = vmatpush1.msra.mxu1 %v722_v40  ;;  %v711_v57 = vld [vmem:[#allocation8 + $0x80] sm:$0xff]  ;;  %v710_v58 = vld [vmem:[#allocation8 + $0x78] sm:$0xff]  ;;  %v708_v61 = vld [vmem:[#allocation8 + $0x68] sm:$0xff]  ;;  %s1374_s4 = sshll.u32 %s571_s24, 4  ;;  %s2133_s0 = scalar_lea.vmem %s2132_s27, 512  ;;  %s2584_s4 = int_to_ptr.vmem [resolvable:$true] %s1374_s4 }
  0xbe   : > { %1575 = vmatprep.subr.mxu0 %v602_v29  ;;  %774 = vmatprep.subr.mxu1 %v720_v42  ;;  %v733_v62 = vld [vmem:[#allocation8 + $0x130] sm:$0xff]  ;;  %v707_v63 = vld [vmem:[#allocation8 + $0x60] sm:$0xff]  ;;  %v730_v1 = vld [vmem:[#allocation8 + $0x118] sm:$0xff]  ;;  %s2127_s7 = scalar_lea.vmem %s2584_s4, 256  ;;  %p2134_p1 = scmp.lt.s32.totalorder %s2584_s4, %s2132_s27 }
  0xbf   : > { %1576 = vmatpush3.msra.mxu0 %v586_v31  ;;  %775 = vmatpush1.msra.mxu1 %v719_v44  ;;  %v705_v0 = vld [vmem:[#allocation8 + $0x50] sm:$0xff]  ;;  %v727_v2 = vld [vmem:[#allocation8 + $0x100] sm:$0xff]  ;;  %v724_v3 = vld [vmem:[#allocation8 + $0xe8] sm:$0xff]  ;;  %p2128_p13 = scmp.ne.s32.totalorder %s2584_s4, %s2127_s7  ;;  %p2135_p4 = scmp.lt.s32.totalorder %s2133_s0, %s2127_s7 }
  0xc0   : > { %1577 = vmatprep.subr.mxu0 %v601_v33  ;;  %776 = vmatprep.subr.mxu1 %v717_v46  ;;  %v721_v4 = vld [vmem:[#allocation8 + $0xd0] sm:$0xff]  ;;  %v718_v5 = vld [vmem:[#allocation8 + $0xb8] sm:$0xff]  ;;  %v715_v6 = vld [vmem:[#allocation8 + $0xa0] sm:$0xff] }
  0xc1   : > { %1578 = vmatpush3.msra.mxu0 %v585_v35  ;;  %777 = vmatpush1.msra.mxu1 %v716_v48  ;;  %v712_v7 = vld [vmem:[#allocation8 + $0x88] sm:$0xff]  ;;  %v702_v9 = vld [vmem:[#allocation8 + $0x38] sm:$0xff]  ;;  %v709_v10 = vld [vmem:[#allocation8 + $0x70] sm:$0xff]  ;;  %v745_v48 = vlaneseq  ;;  %p2129_p9 = pnand %p2128_p13, %p2686_p5  ;;  %p2136_p6 = por %p2135_p4, %p2134_p1 }
  0xc2   : > { %1579 = vmatprep.subr.mxu0 %v600_v37  ;;  %778 = vmatprep.subr.mxu1 %v714_v50  ;;  %v704_v8 = vld [vmem:[#allocation8 + $0x48] sm:$0xff]  ;;  %v701_v11 = vld [vmem:[#allocation8 + $0x30] sm:$0xff]  ;;  %v699_v12 = vld [vmem:[#allocation8 + $0x20] sm:$0xff] }
  0xc3   : > { %1580 = vmatpush3.msra.mxu0 %v584_v39  ;;  %779 = vmatpush1.msra.mxu1 %v713_v52  ;;  %v706_v13 = vld [vmem:[#allocation8 + $0x58] sm:$0xff]  ;;  %v696_v15 = vld [vmem:[#allocation8 + $0x8] sm:$0xff]  ;;  %v703_v16 = vld [vmem:[#allocation8 + $0x40] sm:$0xff]  ;;  %p2130_p11 = pneg %p2129_p9 }
  0xc4   : > { %1581 = vmatprep.subr.mxu0 %v599_v41  ;;  %780 = vmatprep.subr.mxu1 %v711_v57  ;;  %v698_v14 = vld [vmem:[#allocation8 + $0x18] sm:$0xff]  ;;  %v695_v17 = vld [vmem:[#allocation8] sm:$0xff]  ;;  %v700_v19 = vld [vmem:[#allocation8 + $0x28] sm:$0xff] }
  0xc5   : > { %1582 = vmatpush3.msra.mxu0 %v583_v43  ;;  %781 = vmatpush1.msra.mxu1 %v710_v58  ;;  %v697_v20 = vld [vmem:[#allocation8 + $0x10] sm:$0xff]  ;;  %v957_v21 = vld [vmem:[#allocation10 + $0x78] sm:$0xff]  ;;  %v1541_v23 = vld [vmem:[%s2630_s3] ss:$0 sm:$0xff]  ;;  %p2137_p8 = pnand %p2136_p6, %p2130_p11 }
  0xc6   : > { %1583 = vmatprep.subr.mxu0 %v598_v45  ;;  %782 = vmatprep.subr.mxu1 %v708_v61  ;;  %v956_v29 = vld [vmem:[#allocation10 + $0x70] sm:$0xff]  ;;  %v955_v32 = vld [vmem:[#allocation10 + $0x68] sm:$0xff]  ;;  %v954_v33 = vld [vmem:[#allocation10 + $0x60] sm:$0xff] }
  0xc7   : > { %1584 = vmatpush3.msra.mxu0 %v582_v47  ;;  %783 = vmatpush1.msra.mxu1 %v707_v63  ;;  %v579_v34 = vld [vmem:[%s2524_s21] sm:$0xff]  ;;  %v580_v35 = vld [vmem:[%s2524_s21 + $0x8] sm:$0xff] }
  0xc8   : > { %1585 = vmatprep.subr.mxu0 %v597_v49  ;;  %784 = vmatprep.subr.mxu1 %v705_v0  ;;  %v953_v36 = vld [vmem:[#allocation10 + $0x58] sm:$0xff]  ;;  %v952_v37 = vld [vmem:[#allocation10 + $0x50] sm:$0xff]  ;;  %v951_v38 = vld [vmem:[#allocation10 + $0x48] sm:$0xff]  ;;  %v2551_v49 = vshrl.u32 %v745_v48, 7 }
  0xc9   : > { %1586 = vmatpush3.msra.mxu0 %v581_v51  ;;  %785 = vmatpush1.msra.mxu1 %v704_v8  ;;  %v950_v39 = vld [vmem:[#allocation10 + $0x40] sm:$0xff]  ;;  %v949_v40 = vld [vmem:[#allocation10 + $0x38] sm:$0xff]  ;;  %v948_v41 = vld [vmem:[#allocation10 + $0x30] sm:$0xff] }
  0xca   : > { %685 = vmatmul.mubr.f32.vlgmr.msra.gmra.mxu0 %v575_v53  ;;  %1693 = vmatprep.subr.mxu0 %v742_v54  ;;  %v947_v42 = vld [vmem:[#allocation10 + $0x28] sm:$0xff]  ;;  %v946_v43 = vld [vmem:[#allocation10 + $0x20] sm:$0xff]  ;;  %v945_v44 = vld [vmem:[#allocation10 + $0x18] sm:$0xff]  ;;  %v747_v50 = vsub.s32 0, %v2551_v49  ;;  %v751_v51 = vsub.s32 1, %v2551_v49 }
  0xcb   : > { %689 = vmatprep.mubr.f32.mxu0 %v578_v55  ;;  %1694 = vmatpush3.msra.mxu0 %v742_v54  ;;  %v944_v45 = vld [vmem:[#allocation10 + $0x10] sm:$0xff]  ;;  %v943_v46 = vld [vmem:[#allocation10 + $0x8] sm:$0xff]  ;;  %v942_v47 = vld [vmem:[#allocation10] sm:$0xff] }
  0xcc   : > { %1695 = vmatprep.subr.mxu0 %v739_v56  ;;  %786 = vmatprep.subr.mxu1 %v702_v9  ;;  %v2558_v52 = vld [vmem:[%s2632_s5] sm:$0x7]  ;;  %v1233_v48 = vld [vmem:[#allocation13 + $0x70] sm:$0xff] }
  0xcd   : > { %1696 = vmatpush3.msra.mxu0 %v739_v56  ;;  %787 = vmatpush1.msra.mxu1 %v701_v11  ;;  %v748_v53 = vrot.slane %v2558_v52, %v747_v50  ;;  %v752_v54 = vrot.slane %v2558_v52, %v751_v51  ;;  %v1232_v50 = vld [vmem:[#allocation13 + $0x68] sm:$0xff]  ;;  %v1231_v51 = vld [vmem:[#allocation13 + $0x60] sm:$0xff] }
  0xce   : > { %690 = vmatmul.mubr.f32.gmra.mxu0 %v577_v59  ;;  %1697 = vmatprep.subr.mxu0 %v736_v60 }
  0xcf   : > { %1698 = vmatpush3.msra.mxu0 %v736_v60  ;;  %788 = vmatprep.subr.mxu1 %v699_v12 }
  0xd0   : > { %1699 = vmatprep.subr.mxu0 %v733_v62  ;;  %789 = vmatpush1.msra.mxu1 %v698_v14 }
  0xd1   : > { %1700 = vmatpush3.msra.mxu0 %v733_v62  ;;  %790 = vmatprep.subr.mxu1 %v696_v15  ;;  %v1134_v15 = vld [vmem:[#allocation11 + $0xf8] sm:$0xff] }
  0xd2   : > { %1701 = vmatprep.subr.mxu0 %v730_v1  ;;  %791 = vmatpush1.msra.mxu1 %v695_v17  ;;  %v1133_v17 = vld [vmem:[#allocation11 + $0xf0] sm:$0xff] }
  0xd3   : > { %1702 = vmatpush3.msra.mxu0 %v730_v1  ;;  %824 = vmatprep.mubr.f32.mxu1 %v2222_v18 }
  0xd4   : > { %1703 = vmatprep.subr.mxu0 %v727_v2  ;;  %1731 = vmatprep.subr.mxu1 %v957_v21 }
  0xd5   : > { %1704 = vmatpush3.msra.mxu0 %v727_v2 }
  0xd6   : > { %1705 = vmatprep.subr.mxu0 %v724_v3 }
  0xd7   : > { %1706 = vmatpush3.msra.mxu0 %v724_v3 }
  0xd8   : > { %1707 = vmatprep.subr.mxu0 %v721_v4 }
  0xd9   : > { %1708 = vmatpush3.msra.mxu0 %v721_v4 }
  0xda   : > { %1709 = vmatprep.subr.mxu0 %v718_v5 }
  0xdb   : > { %1710 = vmatpush3.msra.mxu0 %v718_v5 }
  0xdc   : > { %1711 = vmatprep.subr.mxu0 %v715_v6 }
  0xdd   : > { %1712 = vmatpush3.msra.mxu0 %v715_v6 }
  0xde   : > { %1713 = vmatprep.subr.mxu0 %v712_v7 }
  0xdf   : > { %1714 = vmatpush3.msra.mxu0 %v712_v7 }
  0xe0   : > { %1715 = vmatprep.subr.mxu0 %v709_v10 }
  0xe1   : > { %1716 = vmatpush3.msra.mxu0 %v709_v10 }
  0xe2   : > { %1717 = vmatprep.subr.mxu0 %v706_v13 }
  0xe3   : > { %1718 = vmatpush3.msra.mxu0 %v706_v13 }
  0xe4   : > { %1719 = vmatprep.subr.mxu0 %v703_v16 }
  0xe5   : > { %1720 = vmatpush3.msra.mxu0 %v703_v16  ;;  %v1118_v16 = vld [vmem:[#allocation11 + $0x78] sm:$0xff] }
  0xe6   : > { %1721 = vmatprep.subr.mxu0 %v700_v19 }
  0xe7   : > { %1722 = vmatpush3.msra.mxu0 %v700_v19  ;;  %v1132_v19 = vld [vmem:[#allocation11 + $0xe8] sm:$0xff] }
  0xe8   : > { %1723 = vmatprep.subr.mxu0 %v697_v20 }
  0xe9   : > { %1724 = vmatpush3.msra.mxu0 %v697_v20  ;;  %v1116_v20 = vld [vmem:[#allocation11 + $0x68] sm:$0xff] }
  0xea   : > { %1637 = vmatprep.subr.mxu0 %v1134_v15 }
 0x18a   : > { %v1587_v22 = vpop.f32.mrf.mxu0 }
 0x18c   : > { %v1588_v24 = vpop.f32.mrf.mxu0 }
 0x18d   : > { %v1589_v25 = vadd.f32 %v1588_v24, %v1587_v22  ;;  %v1115_v22 = vld [vmem:[#allocation11 + $0x60] sm:$0xff]  ;;  %v1114_v24 = vld [vmem:[#allocation11 + $0x58] sm:$0xff] }
 0x18e   : > { %v1590_v26 = vpop.f32.mrf.mxu0 }
 0x18f   : > { %v687_v27 = vadd.f32 %v1589_v25, %v1541_v23  ;;  %v1129_v25 = vld [vmem:[#allocation11 + $0xd0] sm:$0xff] }
 0x190   : > { %v1591_v28 = vpop.f32.mrf.mxu0 }
 0x191   : > { %v1592_v30 = vadd.f32 %v1591_v28, %v1590_v26  ;;  %825 = vmatmul.mubr.f32.vlgmr.msra.gmra.mxu1 %v687_v27  ;;  %1725 = vmatprep.mubr.f32.mxu0 %v687_v27  ;;  %v1113_v26 = vld [vmem:[#allocation11 + $0x50] sm:$0xff]  ;;  %v1128_v27 = vld [vmem:[#allocation11 + $0xc8] sm:$0xff] }
 0x192   : > { %830 = vmatprep.mubr.f32.mxu1 %v2222_v18  ;;  %1732 = vmatpush3.msra.mxu1 %v957_v21  ;;  %v1131_v21 = vld [vmem:[#allocation11 + $0xe0] sm:$0xff]  ;;  %v1112_v28 = vld [vmem:[#allocation11 + $0x48] sm:$0xff] }
 0x193   : > { %v692_v31 = vadd.f32 %v1592_v30, %v1541_v23  ;;  %1733 = vmatprep.subr.mxu1 %v956_v29  ;;  %v1130_v23 = vld [vmem:[#allocation11 + $0xd8] sm:$0xff]  ;;  %v1111_v30 = vld [vmem:[#allocation11 + $0x40] sm:$0xff] }
 0x194   : > { %1734 = vmatpush3.msra.mxu1 %v956_v29  ;;  %v1127_v29 = vld [vmem:[#allocation11 + $0xc0] sm:$0xff] }
 0x195   : > { %831 = vmatmul.mubr.f32.gmra.mxu1 %v692_v31  ;;  %1726 = vmatmul.mubr.f32.vlgmr.msra.gmra.mxu0 %v692_v31  ;;  %v1126_v31 = vld [vmem:[#allocation11 + $0xb8] sm:$0xff] }
 0x196   : > { %836 = vmatprep.mubr.f32.mxu1 %v2222_v18  ;;  %1735 = vmatprep.subr.mxu1 %v955_v32 }
 0x197   : > { %1736 = vmatpush3.msra.mxu1 %v955_v32  ;;  %1728 = vmatprep.mubr.f32.mxu0 %v579_v34  ;;  %v1110_v32 = vld [vmem:[#allocation11 + $0x38] sm:$0xff] }
 0x198   : > { %1737 = vmatprep.subr.mxu1 %v954_v33  ;;  %1638 = vmatpush3.msra.mxu0 %v1118_v16 }
 0x199   : > { %837 = vmatmul.mubr.f32.gmra.mxu1 %v579_v34  ;;  %1729 = vmatmul.mubr.f32.gmra.mxu0 %v580_v35  ;;  %v1109_v34 = vld [vmem:[#allocation11 + $0x30] sm:$0xff] }
 0x19a   : > { %842 = vmatprep.mubr.f32.mxu1 %v2222_v18  ;;  %1738 = vmatpush3.msra.mxu1 %v954_v33  ;;  %v1117_v18 = vld [vmem:[#allocation11 + $0x70] sm:$0xff] }
 0x19b   : > { %1739 = vmatprep.subr.mxu1 %v953_v36  ;;  %1639 = vmatprep.subr.mxu0 %v1133_v17  ;;  %v1125_v33 = vld [vmem:[#allocation11 + $0xb0] sm:$0xff] }
 0x19c   : > { %1740 = vmatpush3.msra.mxu1 %v953_v36  ;;  %1640 = vmatpush3.msra.mxu0 %v1117_v18  ;;  %v1108_v36 = vld [vmem:[#allocation11 + $0x28] sm:$0xff] }
 0x19d   : > { %843 = vmatmul.mubr.f32.gmra.mxu1 %v580_v35  ;;  %1741 = vmatprep.subr.mxu1 %v952_v37  ;;  %v1124_v35 = vld [vmem:[#allocation11 + $0xa8] sm:$0xff] }
 0x19e   : > { %1742 = vmatpush3.msra.mxu1 %v952_v37  ;;  %1641 = vmatprep.subr.mxu0 %v1132_v19  ;;  %v1123_v37 = vld [vmem:[#allocation11 + $0xa0] sm:$0xff] }
 0x19f   : > { %1743 = vmatprep.subr.mxu1 %v951_v38  ;;  %1642 = vmatpush3.msra.mxu0 %v1116_v20 }
 0x1a0   : > { %1744 = vmatpush3.msra.mxu1 %v951_v38  ;;  %1643 = vmatprep.subr.mxu0 %v1131_v21  ;;  %v1107_v38 = vld [vmem:[#allocation11 + $0x20] sm:$0xff] }
 0x1a1   : > { %1745 = vmatprep.subr.mxu1 %v950_v39  ;;  %1644 = vmatpush3.msra.mxu0 %v1115_v22  ;;  %v755_v22 = vsub.s32 2, %v2551_v49 }
 0x1a2   : > { %1746 = vmatpush3.msra.mxu1 %v950_v39  ;;  %1645 = vmatprep.subr.mxu0 %v1130_v23  ;;  %v1122_v39 = vld [vmem:[#allocation11 + $0x98] sm:$0xff] }
 0x1a3   : > { %1747 = vmatprep.subr.mxu1 %v949_v40  ;;  %1646 = vmatpush3.msra.mxu0 %v1114_v24 }
 0x1a4   : > { %1748 = vmatpush3.msra.mxu1 %v949_v40  ;;  %1647 = vmatprep.subr.mxu0 %v1129_v25  ;;  %v1106_v40 = vld [vmem:[#allocation11 + $0x18] sm:$0xff]  ;;  %v756_v25 = vrot.slane %v2558_v52, %v755_v22  ;;  %v1544_v22 = vld [vmem:[%s2638_s11] ss:$0 sm:$0xff] }
 0x1a5   : > { %1749 = vmatprep.subr.mxu1 %v948_v41  ;;  %1648 = vmatpush3.msra.mxu0 %v1113_v26 }
 0x1a6   : > { %1750 = vmatpush3.msra.mxu1 %v948_v41  ;;  %1649 = vmatprep.subr.mxu0 %v1128_v27  ;;  %v1121_v41 = vld [vmem:[#allocation11 + $0x90] sm:$0xff] }
 0x1a7   : > { %1751 = vmatprep.subr.mxu1 %v947_v42  ;;  %1650 = vmatpush3.msra.mxu0 %v1112_v28 }
 0x1a8   : > { %1752 = vmatpush3.msra.mxu1 %v947_v42  ;;  %1651 = vmatprep.subr.mxu0 %v1127_v29  ;;  %v1105_v42 = vld [vmem:[#allocation11 + $0x10] sm:$0xff] }
 0x1a9   : > { %1753 = vmatprep.subr.mxu1 %v946_v43  ;;  %1652 = vmatpush3.msra.mxu0 %v1111_v30 }
 0x1aa   : > { %1754 = vmatpush3.msra.mxu1 %v946_v43  ;;  %1653 = vmatprep.subr.mxu0 %v1126_v31  ;;  %v1120_v43 = vld [vmem:[#allocation11 + $0x88] sm:$0xff] }
 0x1ab   : > { %1755 = vmatprep.subr.mxu1 %v945_v44  ;;  %1654 = vmatpush3.msra.mxu0 %v1110_v32 }
 0x1ac   : > { %1756 = vmatpush3.msra.mxu1 %v945_v44  ;;  %1655 = vmatprep.subr.mxu0 %v1125_v33  ;;  %v1104_v44 = vld [vmem:[#allocation11 + $0x8] sm:$0xff] }
 0x1ad   : > { %1757 = vmatprep.subr.mxu1 %v944_v45  ;;  %1656 = vmatpush3.msra.mxu0 %v1109_v34 }
 0x1ae   : > { %1758 = vmatpush3.msra.mxu1 %v944_v45  ;;  %1657 = vmatprep.subr.mxu0 %v1124_v35  ;;  %v1119_v45 = vld [vmem:[#allocation11 + $0x80] sm:$0xff] }
 0x1af   : > { %1759 = vmatprep.subr.mxu1 %v943_v46  ;;  %1658 = vmatpush3.msra.mxu0 %v1108_v36 }
 0x1b0   : > { %1760 = vmatpush3.msra.mxu1 %v943_v46  ;;  %1659 = vmatprep.subr.mxu0 %v1123_v37  ;;  %v1103_v46 = vld [vmem:[#allocation11] sm:$0xff] }
 0x1b1   : > { %1761 = vmatprep.subr.mxu1 %v942_v47  ;;  %1660 = vmatpush3.msra.mxu0 %v1107_v38 }
 0x1b2   : > { %1762 = vmatpush3.msra.mxu1 %v942_v47  ;;  %1661 = vmatprep.subr.mxu0 %v1122_v39  ;;  %v1234_v47 = vld [vmem:[#allocation13 + $0x78] sm:$0xff] }
 0x1b3   : > { %1662 = vmatpush3.msra.mxu0 %v1106_v40  ;;  %1775 = vmatprep.subr.mxu1 %v1234_v47 }
 0x1b4   : > { %1663 = vmatprep.subr.mxu0 %v1121_v41 }
 0x1b5   : > { %1664 = vmatpush3.msra.mxu0 %v1105_v42 }
 0x1b6   : > { %1665 = vmatprep.subr.mxu0 %v1120_v43 }
 0x1b7   : > { %1666 = vmatpush3.msra.mxu0 %v1104_v44 }
 0x1b8   : > { %1667 = vmatprep.subr.mxu0 %v1119_v45 }
 0x1b9   : > { %1668 = vmatpush3.msra.mxu0 %v1103_v46 }
 0x251   : > { %v826_v55 = vpop.f32.mrf.mxu1 }
 0x252   : > { %v827_v57 = vadd.f32 %v826_v55, %v748_v53  ;;  %v1228_v55 = vld [vmem:[#allocation13 + $0x48] sm:$0xff] }
 0x253   : > { %v828_v56 = vpop.f32.mrf.mxu1 }
 0x254   : > { %v829_v58 = vadd.f32 %v828_v56, %v752_v54  ;;  %v1227_v56 = vld [vmem:[#allocation13 + $0x40] sm:$0xff] }
 0x255   : > { %v832_v59 = vpop.f32.mrf.mxu1  ;;  %v1727_v18 = vpop.f32.mrf.mxu0 }
 0x256   : > { %v934_v60 = vmul.f32 %v829_v58, %v827_v57  ;;  %v833_v62 = vadd.f32 %v832_v59, %v748_v53  ;;  %v921_v37 = vadd.f32 %v1727_v18, %v756_v25 }
 0x257   : > { %v834_v61 = vpop.f32.mrf.mxu1  ;;  %v915_v20 = vpop.f32.mrf.mxu0 }
 0x258   : > { %v835_v63 = vadd.f32 %v834_v61, %v752_v54  ;;  %1763 = vmatprep.mubr.f32.mxu1 %v934_v60  ;;  %v916_v32 = vadd.f32 %v915_v20, %v756_v25 }
 0x259   : > { %v838_v0 = vpop.f32.mrf.mxu1  ;;  %v1730_v21 = vpop.f32.mrf.mxu0 }
 0x25a   : > { %v935_v1 = vmul.f32 %v835_v63, %v833_v62  ;;  %v839_v6 = vadd.f32 %v838_v0, %v748_v53  ;;  %v931_v33 = vadd.f32 %v1730_v21, %v756_v25 }
 0x25b   : > { %v840_v2 = vpop.f32.mrf.mxu1  ;;  %v925_v24 = vpop.f32.mrf.mxu0 }
 0x25c   : > { %v841_v3 = vadd.f32 %v840_v2, %v752_v54  ;;  %1764 = vmatmul.mubr.f32.vlgmr.msra.gmra.mxu1 %v935_v1  ;;  %v938_v11 = vmul.f32 %v839_v6, %v829_v58  ;;  %v1225_v58 = vld [vmem:[#allocation13 + $0x30] sm:$0xff]  ;;  %v926_v27 = vadd.f32 %v925_v24, %v756_v25  ;;  %v1545_v24 = vld [vmem:[%s2639_s12] ss:$0 sm:$0xff] }
 0x25d   : > { %v844_v4 = vpop.f32.mrf.mxu1  ;;  %1776 = vmatpush3.msra.mxu1 %v1234_v47  ;;  %v1224_v47 = vld [vmem:[#allocation13 + $0x28] sm:$0xff] }
 0x25e   : > { %v936_v5 = vmul.f32 %v841_v3, %v827_v57  ;;  %v845_v9 = vadd.f32 %v844_v4, %v748_v53  ;;  %v940_v13 = vmul.f32 %v841_v3, %v839_v6  ;;  %1777 = vmatprep.subr.mxu1 %v1233_v48  ;;  %v1230_v53 = vld [vmem:[#allocation13 + $0x58] sm:$0xff] }
 0x25f   : > { %v846_v7 = vpop.f32.mrf.mxu1  ;;  %1778 = vmatpush3.msra.mxu1 %v1233_v48  ;;  %v1226_v57 = vld [vmem:[#allocation13 + $0x38] sm:$0xff]  ;;  %v1223_v48 = vld [vmem:[#allocation13 + $0x20] sm:$0xff] }
 0x260   : > { %v847_v8 = vadd.f32 %v846_v7, %v752_v54  ;;  %1766 = vmatprep.mubr.f32.mxu1 %v936_v5  ;;  %v939_v12 = vmul.f32 %v845_v9, %v835_v63  ;;  %1779 = vmatprep.subr.mxu1 %v1232_v50  ;;  %v1229_v54 = vld [vmem:[#allocation13 + $0x50] sm:$0xff] }
 0x261   : > { %1780 = vmatpush3.msra.mxu1 %v1232_v50  ;;  %v1222_v50 = vld [vmem:[#allocation13 + $0x18] sm:$0xff] }
 0x262   : > { %v937_v10 = vmul.f32 %v847_v8, %v833_v62  ;;  %v941_v14 = vmul.f32 %v847_v8, %v845_v9  ;;  %1781 = vmatprep.subr.mxu1 %v1231_v51 }
 0x263   : > { %1782 = vmatpush3.msra.mxu1 %v1231_v51  ;;  %v1221_v51 = vld [vmem:[#allocation13 + $0x10] sm:$0xff] }
 0x264   : > { %1767 = vmatmul.mubr.f32.gmra.mxu1 %v937_v10  ;;  %1783 = vmatprep.subr.mxu1 %v1230_v53 }
 0x265   : > { %1769 = vmatprep.mubr.f32.mxu1 %v938_v11  ;;  %1784 = vmatpush3.msra.mxu1 %v1230_v53  ;;  %v1220_v53 = vld [vmem:[#allocation13 + $0x8] sm:$0xff] }
 0x266   : > { %1785 = vmatprep.subr.mxu1 %v1229_v54 }
 0x267   : > { %1786 = vmatpush3.msra.mxu1 %v1229_v54  ;;  %v1219_v54 = vld [vmem:[#allocation13] sm:$0xff] }
 0x268   : > { %1770 = vmatmul.mubr.f32.gmra.mxu1 %v939_v12  ;;  %1787 = vmatprep.subr.mxu1 %v1228_v55 }
 0x269   : > { %1772 = vmatprep.mubr.f32.mxu1 %v940_v13  ;;  %1788 = vmatpush3.msra.mxu1 %v1228_v55 }
 0x26a   : > { %1789 = vmatprep.subr.mxu1 %v1227_v56 }
 0x26b   : > { %1790 = vmatpush3.msra.mxu1 %v1227_v56  ;;  %v1542_v56 = vld [vmem:[%s2635_s8] ss:$0 sm:$0xff] }
 0x26c   : > { %1773 = vmatmul.mubr.f32.gmra.mxu1 %v941_v14  ;;  %1791 = vmatprep.subr.mxu1 %v1226_v57 }
 0x26d   : > { %1792 = vmatpush3.msra.mxu1 %v1226_v57 }
 0x26e   : > { %1793 = vmatprep.subr.mxu1 %v1225_v58 }
 0x26f   : > { %1794 = vmatpush3.msra.mxu1 %v1225_v58 }
 0x270   : > { %1795 = vmatprep.subr.mxu1 %v1224_v47 }
 0x271   : > { %1796 = vmatpush3.msra.mxu1 %v1224_v47 }
 0x272   : > { %1797 = vmatprep.subr.mxu1 %v1223_v48 }
 0x273   : > { %1798 = vmatpush3.msra.mxu1 %v1223_v48 }
 0x274   : > { %1799 = vmatprep.subr.mxu1 %v1222_v50 }
 0x275   : > { %1800 = vmatpush3.msra.mxu1 %v1222_v50 }
 0x276   : > { %1801 = vmatprep.subr.mxu1 %v1221_v51 }
 0x277   : > { %1802 = vmatpush3.msra.mxu1 %v1221_v51 }
 0x278   : > { %1803 = vmatprep.subr.mxu1 %v1220_v53 }
 0x279   : > { %1804 = vmatpush3.msra.mxu1 %v1220_v53 }
 0x27a   : > { %1805 = vmatprep.subr.mxu1 %v1219_v54 }
 0x27b   : > { %1806 = vmatpush3.msra.mxu1 %v1219_v54 }
 0x31c   : > { %v1765_v59 = vpop.f32.mrf.mxu1 }
 0x31e   : > { %v1024_v60 = vpop.f32.mrf.mxu1 }
 0x324   : > { %v1768_v61 = vpop.f32.mrf.mxu1 }
 0x325   : > { %v1064_v62 = vsub.f32 %v1768_v61, %v1765_v59 }
 0x326   : > { %v1034_v63 = vpop.f32.mrf.mxu1 }
 0x327   : > { %v1063_v0 = vsub.f32 %v1034_v63, %v1024_v60  ;;  %v1067_v3 = vmul.f32 1.442695, %v1064_v62 }
 0x328   : > { %v1771_v1 = vpop.f32.mrf.mxu1 }
 0x329   : > { %v1065_v2 = vmul.f32 1.442695, %v1063_v0 }
 0x32a   : > { %v1044_v4 = vpop.f32.mrf.mxu1 }
 0x32b   : > { %1921 = vpow2.f32 %v1065_v2 }
 0x32c   : > { %v1774_v5 = vpop.f32.mrf.mxu1  ;;  %1923 = vpow2.f32 %v1067_v3  ;;  %v1543_v3 = vld [vmem:[%s2637_s10] ss:$0 sm:$0xff] }
 0x32d   : > { %v1076_v6 = vsub.f32 %v1774_v5, %v1771_v1 }
 0x32e   : > { %v1054_v7 = vpop.f32.mrf.mxu1 }
 0x32f   : > { %v1079_v8 = vmul.f32 1.442695, %v1076_v6  ;;  %v1075_v9 = vsub.f32 %v1054_v7, %v1044_v4 }
 0x331   : > { %1925 = vpow2.f32 %v1079_v8  ;;  %v1077_v10 = vmul.f32 1.442695, %v1075_v9 }
 0x333   : > { %1927 = vpow2.f32 %v1077_v10 }
 0x338   : > { %v1922_v11 = vpop.eup %1921 }
 0x339   : > { %v1069_v12 = vadd.f32 1.0, %v1922_v11  ;;  %v1924_v13 = vpop.eup %1923 }
 0x33a   : > { %v1070_v15 = vadd.f32 1.0, %v1924_v13 }
 0x33b   : > { %1929 = vrcp.f32 %v1069_v12 }
 0x33e   : > { %v1926_v14 = vpop.eup %1925 }
 0x33f   : > { %v1082_v16 = vadd.f32 1.0, %v1926_v14 }
 0x340   : > { %v1928_v17 = vpop.eup %1927 }
 0x341   : > { %1931 = vrcp.f32 %v1082_v16  ;;  %v1081_v19 = vadd.f32 1.0, %v1928_v17 }
 0x342   : > { %1933 = vrcp.f32 %v1070_v15 }
 0x343   : > { %1935 = vrcp.f32 %v1081_v19 }
 0x348   : > { %v1930_v23 = vpop.eup %1929 }
 0x349   : > { %v1089_v28 = vsub.f32 1.0, %v1930_v23  ;;  %v1087_v49 = vmul.f32 %v1930_v23, %v916_v32 }
 0x34b   : > { %v1091_v36 = vmul.f32 %v1089_v28, %v926_v27 }
 0x34d   : > { %v1093_v52 = vadd.f32 %v1091_v36, %v1087_v49 }
 0x34e   : > { %v1932_v26 = vpop.eup %1931 }
 0x34f   : > { %v1934_v29 = vpop.eup %1933  ;;  %v1098_v30 = vsub.f32 1.0, %v1932_v26  ;;  %v1096_v42 = vmul.f32 %v1932_v26, %v921_v37 }
 0x350   : > { %v1936_v31 = vpop.eup %1935  ;;  %v1090_v35 = vsub.f32 1.0, %v1934_v29  ;;  %v1088_v45 = vmul.f32 %v1934_v29, %v921_v37 }
 0x351   : > { %v1097_v34 = vsub.f32 1.0, %v1936_v31  ;;  %v1100_v38 = vmul.f32 %v1098_v30, %v931_v33  ;;  %v1095_v40 = vmul.f32 %v1936_v31, %v916_v32 }
 0x352   : > { %v1092_v43 = vmul.f32 %v1090_v35, %v931_v33 }
 0x353   : > { %v1099_v39 = vmul.f32 %v1097_v34, %v926_v27  ;;  %v1102_v44 = vadd.f32 %v1100_v38, %v1096_v42 }
 0x354   : > { %v1094_v46 = vadd.f32 %v1092_v43, %v1088_v45 }
 0x355   : > { %v1101_v41 = vadd.f32 %v1099_v39, %v1095_v40 }
 0x357   : > { %1206 = vmatprep.mubr.f32.mxu0 %v1101_v41 }
 0x358   : > { %1207 = vmatmul.mubr.f32.vlgmr.msra.gmra.mxu0 %v1093_v52 }
 0x359   : > { %1211 = vmatprep.mubr.f32.mxu0 %v1102_v44 }
 0x35c   : > { %1212 = vmatmul.mubr.f32.gmra.mxu0 %v1094_v46 }
 0x418   : > { %v1669_v55 = vpop.f32.mrf.mxu0 }
 0x41a   : > { %v1670_v57 = vpop.f32.mrf.mxu0 }
 0x41b   : > { %v1671_v58 = vadd.f32 %v1670_v57, %v1669_v55 }
 0x41c   : > { %v1672_v59 = vpop.f32.mrf.mxu0 }
 0x41d   : > { %v1209_v60 = vadd.f32 %v1671_v58, %v1542_v56 }
 0x41e   : > { %v1673_v61 = vpop.f32.mrf.mxu0 }
 0x41f   : > { %v1217_v62 = vmax.f32 %v1209_v60, 0.0  ;;  %v1674_v63 = vadd.f32 %v1673_v61, %v1672_v59 }
 0x421   : > { %v1214_v0 = vadd.f32 %v1674_v63, %v1542_v56  ;;  %1807 = vmatprep.mubr.f32.mxu1 %v1217_v62 }
 0x423   : > { %v1218_v1 = vmax.f32 %v1214_v0, 0.0 }
 0x425   : > { %1808 = vmatmul.mubr.f32.vlgmr.msra.gmra.mxu1 %v1218_v1 }
 0x4e5   : > { %v1809_v2 = vpop.f32.mrf.mxu1 }
 0x4e6   : > { %v1314_v6 = vadd.f32 %v1809_v2, %v1543_v3 }
 0x4e7   : > { %v1308_v4 = vpop.f32.mrf.mxu1 }
 0x4e8   : > { %v1309_v5 = vadd.f32 %v1543_v3, %v1308_v4 }
 0x4ea   : > { %1317 = vadd.xlane.f32.xlu0 %v1309_v5 }
 0x4ee   : > { %1319 = vadd.xlane.f32.xlu0 %v1314_v6 }
 0x573   : > { %v1318_v7 = vpop.xlane.xlu0 %1317 }
 0x574   : > { %v1322_v8 = vmul.f32 0.0078125, %v1318_v7 }
 0x576   : > { %v1324_v9 = vsub.f32 %v1309_v5, %v1322_v8 }
 0x577   : > { %v1320_v10 = vpop.xlane.xlu0 %1319 }
 0x578   : > { %v1323_v11 = vmul.f32 0.0078125, %v1320_v10  ;;  %v1326_v12 = vmul.f32 %v1324_v9, %v1324_v9 }
 0x57a   : > { %v1325_v13 = vsub.f32 %v1314_v6, %v1323_v11  ;;  %1328 = vadd.xlane.f32.xlu1 %v1326_v12 }
 0x57c   : > { %v1327_v14 = vmul.f32 %v1325_v13, %v1325_v13 }
 0x57e   : > { %1330 = vadd.xlane.f32.xlu1 %v1327_v14 }
 0x603   : > { %v1329_v15 = vpop.xlane.xlu1 %1328 }
 0x604   : > { %v1332_v16 = vmul.f32 0.0078125, %v1329_v15 }
 0x606   : > { %v1334_v17 = vadd.f32 1e-05, %v1332_v16 }
 0x607   : > { %v1331_v18 = vpop.xlane.xlu1 %1330 }
 0x608   : > { %1937 = vrsqrt.f32 %v1334_v17  ;;  %v1333_v19 = vmul.f32 0.0078125, %v1331_v18 }
 0x60a   : > { %v1335_v20 = vadd.f32 1e-05, %v1333_v19 }
 0x60c   : > { %1939 = vrsqrt.f32 %v1335_v20 }
 0x615   : > { %v1938_v21 = vpop.eup %1937 }
 0x616   : > { %v1338_v23 = vmul.f32 %v1938_v21, %v1324_v9 }
 0x618   : > { %v1347_v25 = vmul.f32 %v1544_v22, %v1338_v23 }
 0x619   : > { %v1940_v26 = vpop.eup %1939 }
 0x61a   : > { %v1356_v27 = vadd.f32 %v1545_v24, %v1347_v25  ;;  %v1339_v28 = vmul.f32 %v1940_v26, %v1325_v13 }
 0x61c   : > { %v1348_v29 = vmul.f32 %v1544_v22, %v1339_v28  ;;  %1358 = vst [vmem:[%s571_s24] sm:$0xff] %v1356_v27 }
 0x61e   : > { %v1357_v30 = vadd.f32 %v1545_v24, %v1348_v29 }
 0x620   : > { %1359 = vst [vmem:[%s571_s24 + $0x8] sm:$0xff] %v1357_v30 }
 0x621   : > { %2140 = shalt.err (!%p2137_p8)
}
 0x622   : > { %s2141_s30 = scalar_lea.hbm %s2582_s9, 256  ;;  %s2145_s18 = scalar_lea.hbm %s2685_s2, 512 }
 0x623   : > { %p2142_p3 = scmp.ne.s32.totalorder %s2582_s9, %s2141_s30  ;;  %p2146_p2 = scmp.lt.s32.totalorder %s2582_s9, %s2685_s2 }
 0x624   : > { %p2147_p10 = scmp.lt.s32.totalorder %s2145_s18, %s2141_s30 }
 0x625   : > { %p2143_p7 = pnand %p2142_p3, %p2686_p5 }
 0x626   : > { %p2148_p0 = por %p2147_p10, %p2146_p2 }
 0x627   : > { %p2144_p12 = pneg %p2143_p7 }
 0x629   : > { %p2149_p13 = pnand %p2148_p0, %p2144_p12 }
 0x62b   : > { %2152 = shalt.err (!%p2149_p13)
}
 0x62c   : > { %s2224_s6 = smov 128   ;;  %s2225_s23 = smov 8  }
 0x62d   : > { %1834 = dma.vmem_to_hbm [thread:$0]  (%p2686_p5), %s2584_s4, 256, %s2582_s9, %s1361_s20, %s2224_s6, %s2224_s6, %s2225_s23  }
 0x62e PF: > { %s2687_s24 = sld [smem:[#allocation24_spill]]  ;;  %s1389_s15 = sand.u32 1, %s2195_s25  }
 0x62f   : > { %p2689_p11 = scmp.ge.s32.totalorder %s2207_s28, 2  ;;  %s1390_s21 = scalar_lea.sflag [#allocation4], %s1389_s15 }
 0x634   : > { %p2688_p9 = scmp.ne.s32.totalorder %s2687_s24, 0 }
 0x636   : > { %p1860_p1 = pnand %p2689_p11, %p2688_p9 }
 0x638   : > { %p1861_p4 = pneg %p1860_p1 }
 0x63a   : > { %2190 = dma.done.wait (%p1861_p4), %s1390_s21, 256  }
 0x63b   : > { %2192 = vsyncadd (%p1861_p4), %s1390_s21, 4294967040  ;;  %s2690_s28 = sld [smem:[#allocation22_spill]]  ;;  %s2693_s25 = smov %s2199_s26 }
 0x63c   : > { %s2691_s7 = sld [smem:[#allocation21_spill]] }
 0x63d   : > { %s2692_s27 = sld [smem:[#allocation23_spill]] }
 0x641   : > { %p31_p6 = scmp.ge.s32.totalorder %s2690_s28, 4  }
 0x642   : > { %s2694_s26 = smov %s2691_s7 }
 0x643   :  { %33 = sbr.rel (!%p31_p6) target bundleno = 17 (0x11), region = 150 }
 0x648   :  { %1395 = vsyncpa [#allocation3], 1 }
 0x649   :  { %1397 = vsyncpa [#allocation3 + $0x1], 1 }
 0x64a   :  { %1398 = vsyncpa [#allocation6], 1 }
 0x64b   :  { %1400 = vsyncpa [#allocation6 + $0x1], 1 }
 0x64c   :  { %1401 = vsyncpa [#allocation9], 1 }
 0x64d   :  { %1402 = vsyncpa [#allocation12], 1 }
 0x64e   :  { %1403 = vsyncpa [#allocation4], 1 }
 0x64f   :  { %1405 = vsyncpa [#allocation4 + $0x1], 1 }

</bundles_post_ra>
